<compile_context>
chip_gen: v6e
topology: v6e:2x2x1
jax: 0.10.0
libtpu: 0.0.40
codegen_flags: <defaults>
</compile_context>

<pallas_src>
import functools
import math

import jax
import jax.numpy as jnp
from jax.experimental import pallas as pl
from jax.experimental.pallas import tpu as pltpu


def _round_up(x, m):
    return ((x + m - 1) // m) * m


def _default_dequant_dtype():
    """bf16 dequant arithmetic on v6e/v7x (native bf16 VPU); f32 otherwise."""
    try:
        kind = jax.devices()[0].device_kind.lower()
    except Exception:
        return jnp.float32
    if "v6" in kind or "v7" in kind or "7x" in kind:
        return jnp.bfloat16
    return jnp.float32


def _pick_block_n(n, m_blocks, candidates=(512, 256, 128)):
    valid = [c for c in candidates if n % c == 0]
    if not valid:
        return n  # out_features % 8 contract; full-width (lane-padded) fallback
    if m_blocks == 1:
        for c in valid:
            if n // c >= 2:
                return c  # keep >= 2 parallel grid blocks for v7x's two TCs
    return valid[0]


def _pick_half_chunk(kh, groupsize, max_half_chunk):
    """Largest tp dividing kh with tp % lcm(groupsize, 128) == 0 and
    tp <= max_half_chunk; else the smallest such divisor (kh, being a multiple
    of both groupsize and 128, always qualifies)."""
    step = groupsize * 128 // math.gcd(groupsize, 128)
    best = None
    smallest_over = None
    tp = step
    while tp <= kh:
        if kh % tp == 0:
            if tp <= max_half_chunk:
                best = tp
            elif smallest_over is None:
                smallest_over = tp
        tp += step
    if best is not None:
        return best
    return smallest_over if smallest_over is not None else kh


def pack_int4_weight(w_q, groupsize=128):
    """One-time repack of the logical (out_features, in_features) int4 weight
    (values in [0, 15]) into the TPU "global half-planar" uint8 (K/2, N) layout:
        byte[p, n] = q[n, p] | (q[n, K/2 + p] << 4).
    in_features is zero-padded up to a multiple of max(2*groupsize, 256) so
    both nibble planes are whole groups and 128-lane aligned (padded x columns
    are zero, so padded weights contribute nothing)."""
    n, k = w_q.shape
    assert k % groupsize == 0
    k_pad = _round_up(k, max(2 * groupsize, 256))
    q = jnp.asarray(w_q, jnp.uint8).T            # (k, n), K on rows
    if k_pad != k:
        q = jnp.pad(q, ((0, k_pad - k), (0, 0)))
    half = k_pad // 2
    return (q[:half, :] | (q[half:, :] << 4)).astype(jnp.uint8)


def prepare_scales_and_zeros(scales_and_zeros, groupsize=128,
                             param_dtype=jnp.bfloat16):
    """One-time split of the torchao (K//groupsize, N, 2) buffer into two
    contiguous (G, N) arrays, with the int4 "-8" folded into the zero point
    (z' = z - 8*s) and the group axis padded consistently with
    pack_int4_weight."""
    g, _, two = scales_and_zeros.shape
    assert two == 2
    s = jnp.asarray(scales_and_zeros[..., 0], jnp.float32)
    z = jnp.asarray(scales_and_zeros[..., 1], jnp.float32)
    zb = z - 8.0 * s
    k = g * groupsize
    g_pad = _round_up(k, max(2 * groupsize, 256)) // groupsize
    if g_pad != g:
        s = jnp.pad(s, ((0, g_pad - g), (0, 0)))
        zb = jnp.pad(zb, ((0, g_pad - g), (0, 0)))
    return s.astype(param_dtype), zb.astype(param_dtype)


def _weight_spec(block_shape, index_map, buffer_count):
    """Packed-weight BlockSpec; optionally deeper pipelining for decode-shaped
    (HBM-bound) calls.  Falls back to the default double buffer if this JAX
    version's BlockSpec does not accept pipeline_mode."""
    if buffer_count is not None and buffer_count > 2:
        try:
            return pl.BlockSpec(block_shape, index_map,
                                pipeline_mode=pl.Buffered(buffer_count))
        except (TypeError, AttributeError):
            pass
    return pl.BlockSpec(block_shape, index_map)


def _int4_linear_kernel(xlo_ref, xhi_ref, wp_ref, s_ref, z_ref, o_ref, acc_ref,
                        *, dequant_dtype):
    # xlo_ref/xhi_ref : (tm, tp)      bf16 activation tiles (low/high-nibble K halves)
    # wp_ref          : (tp, tn)      uint8 half-planar packed int4 weights
    # s_ref / z_ref   : (2, gph, tn)  per-group scales / folded zero points
    #                   (plane 0 = low nibble; plane 1 = high nibble, scale/16)
    # o_ref           : (tm, tn)      output tile
    # acc_ref         : (tm, tn)      f32 accumulator, lives across the K axis
    k_step = pl.program_id(2)

    @pl.when(k_step == 0)
    def _init():
        acc_ref[...] = jnp.zeros_like(acc_ref)

    tp, tn = wp_ref.shape
    gph = s_ref.shape[1]
    gs = tp // gph
    packed = wp_ref[...]

    def dequant(nibbles_u8, plane):
        # uint8 nibble bytes -> dequant dtype.  The "-8" of the int4 encoding
        # and the ">>4" of the high nibble are folded into z'/s at prep time,
        # so dequant is a single per-element multiply-add (no shift/subtract).
        q = nibbles_u8.astype(jnp.int32).astype(jnp.float32).astype(dequant_dtype)
        q = q.reshape(gph, gs, tn)
        s = s_ref[plane, :, :].astype(dequant_dtype)[:, None, :]
        z = z_ref[plane, :, :].astype(dequant_dtype)[:, None, :]
        return (q * s + z).reshape(tp, tn).astype(jnp.bfloat16)

    # Two contiguous, tp-deep bf16 MXU contractions (one per nibble plane):
    # no sublane interleave / concatenate of the dequantized weight, and the
    # live dequant working set is bounded by a single (tp, tn) plane.
    acc_ref[...] += jnp.dot(xlo_ref[...], dequant(packed & 0x0F, 0),
                            preferred_element_type=jnp.float32)
    acc_ref[...] += jnp.dot(xhi_ref[...], dequant(packed & 0xF0, 1),
                            preferred_element_type=jnp.float32)

    @pl.when(k_step == pl.num_programs(2) - 1)
    def _store():
        o_ref[...] = acc_ref[...].astype(o_ref.dtype)


def weight_only_int4_linear(x, weight_packed, scales, zeros, out_features, *,
                            groupsize=128,
                            precision=jnp.bfloat16,
                            dequant_dtype=None,
                            block_m=512, block_n=None, block_k=2048,
                            vmem_limit_bytes=32 * 1024 * 1024,
                            decode_weight_buffers=3):
    """Pallas forward of WeightOnlyInt4Linear / linear_forward_int4.

    `weight_packed` comes from `pack_int4_weight`; `scales` / `zeros` come from
    `prepare_scales_and_zeros` (both prepared once at weight-load time).
    For large prefill tiles on v5e/v6e (128 MiB VMEM) raise block_m/block_n and
    vmem_limit_bytes; keep vmem_limit_bytes <= ~48 MiB on v7x (64 MiB VMEM/TC).
    """
    orig_shape = x.shape
    kh = weight_packed.shape[0]
    K = 2 * kh
    N = out_features
    G = K // groupsize
    assert weight_packed.shape[1] == N
    assert K % (2 * groupsize) == 0
    assert scales.shape == (G, N) and zeros.shape == (G, N)

    if dequant_dtype is None:
        dequant_dtype = _default_dequant_dtype()

    # Flatten leading dims; zero-pad K if the module / pack padded in_features.
    x2 = x.reshape(-1, orig_shape[-1])
    if x2.shape[-1] < K:
        x2 = jnp.pad(x2, ((0, 0), (0, K - x2.shape[-1])))
    assert x2.shape[-1] == K
    x2 = x2.astype(precision)

    M = x2.shape[0]
    tm = min(_round_up(block_m, 16), _round_up(max(M, 1), 16))
    m_pad = _round_up(max(M, 1), tm)
    if m_pad != M:
        x2 = jnp.pad(x2, ((0, m_pad - M), (0, 0)))

    m_blocks = m_pad // tm
    tn = block_n if block_n is not None else _pick_block_n(N, m_blocks)
    assert N % tn == 0, "out_features must be divisible by the N tile"

    tp = _pick_half_chunk(kh, groupsize, max(block_k // 2, 1))
    nk = kh // tp                 # K-reduction grid steps
    gph = tp // groupsize         # groups per nibble plane per step

    # Per-call (tiny) re-layout of the quantization parameters:
    #   (G, N) -> (nk, 2, gph, N); the high-nibble plane's scales are
    #   pre-divided by 16 (exact) so the kernel uses (byte & 0xF0) directly.
    pdt = scales.dtype
    s_halves = scales.reshape(2, nk, gph, N)
    s4 = jnp.stack([s_halves[0], s_halves[1] * jnp.asarray(1.0 / 16.0, pdt)],
                   axis=1)
    z4 = zeros.reshape(2, nk, gph, N).transpose(1, 0, 2, 3)

    grid = (m_blocks, N // tn, nk)  # K (reduction) innermost

    use_extra_buf = (decode_weight_buffers is not None
                     and decode_weight_buffers > 2
                     and m_pad <= 128 and nk >= 3)
    wp_spec = _weight_spec((tp, tn), lambda i, j, k: (k, j),
                           decode_weight_buffers if use_extra_buf else None)

    sz_block = (None, 2, gph, tn)
    sz_map = lambda i, j, k: (k, 0, 0, j)

    kernel = functools.partial(_int4_linear_kernel, dequant_dtype=dequant_dtype)

    out = pl.pallas_call(
        kernel,
        out_shape=jax.ShapeDtypeStruct((m_pad, N), precision),
        grid_spec=pltpu.PrefetchScalarGridSpec(
            num_scalar_prefetch=0,
            grid=grid,
            in_specs=[
                pl.BlockSpec((tm, tp), lambda i, j, k: (i, k)),        # x, low half
                pl.BlockSpec((tm, tp), lambda i, j, k: (i, k + nk)),   # x, high half
                wp_spec,                                               # packed int4
                pl.BlockSpec(sz_block, sz_map),                        # scales
                pl.BlockSpec(sz_block, sz_map),                        # folded zeros
            ],
            out_specs=pl.BlockSpec((tm, tn), lambda i, j, k: (i, j)),
            scratch_shapes=[pltpu.VMEM((tm, tn), jnp.float32)],
        ),
        compiler_params=pltpu.CompilerParams(
            dimension_semantics=("parallel", "parallel", "arbitrary"),
            vmem_limit_bytes=vmem_limit_bytes,
        ),
    )(x2, x2, weight_packed, s4, z4)

    out = out[:M].astype(x.dtype)                      # .to(dtype=x.dtype)
    return out.reshape(orig_shape[:-1] + (N,))


if __name__ == "__main__":
    key = jax.random.PRNGKey(0)
    kx, kw, ks, kz = jax.random.split(key, 4)

    # Small-but-representative shapes satisfying the module's constraints:
    #   in_features % (inner_k_tiles * 16) == 0, in_features % groupsize == 0,
    #   out_features % 8 == 0.
    batch, seq = 2, 8
    in_features, out_features = 2048, 512
    groupsize, inner_k_tiles = 128, 8
    assert in_features % (inner_k_tiles * 16) == 0
    assert in_features % groupsize == 0
    assert out_features % 8 == 0
    G = in_features // groupsize

    # Input activations (bf16, like `precision`).
    x = jax.random.normal(kx, (batch, seq, in_features),
                          dtype=jnp.float32).astype(jnp.bfloat16)

    # Synthetic int4 weight (0..15) and group-wise qparams (bf16 buffer layout).
    w_q = jax.random.randint(kw, (out_features, in_features), 0, 16,
                             dtype=jnp.int32)
    scales = jax.random.uniform(ks, (G, out_features),
                                minval=0.01, maxval=0.05).astype(jnp.bfloat16)
    zeros = (0.1 * jax.random.normal(kz, (G, out_features))).astype(jnp.bfloat16)
    scales_and_zeros = jnp.stack([scales, zeros], axis=-1)   # (G, N, 2) buffer

    # One-time, load-time preparation (replaces the CUDA int4 repack).
    weight_packed = pack_int4_weight(w_q, groupsize)
    s_p, z_p = prepare_scales_and_zeros(scales_and_zeros, groupsize)

    out = weight_only_int4_linear(
        x, weight_packed, s_p, z_p, out_features,
        groupsize=groupsize,
        block_n=256,    # 2 N blocks and ...
        block_k=1024,   # ... 2 K steps so the demo exercises the full grid
    )
    out = jax.block_until_ready(out)

    # Reference: torchao convention — dequantize to bf16, matmul in f32.
    s_full = jnp.repeat(jnp.asarray(scales, jnp.float32), groupsize, axis=0)
    z_full = jnp.repeat(jnp.asarray(zeros, jnp.float32), groupsize, axis=0)
    w_deq = ((w_q.astype(jnp.float32).T - 8.0) * s_full + z_full
             ).astype(jnp.bfloat16)
    ref = (x.astype(jnp.float32).reshape(-1, in_features)
           @ w_deq.astype(jnp.float32)).reshape(batch, seq, out_features)

    assert out.shape == (batch, seq, out_features)
    assert out.dtype == x.dtype
    diff = out.astype(jnp.float32) - ref
    max_err = float(jnp.max(jnp.abs(diff)))
    rel_err = float(jnp.linalg.norm(diff) / jnp.linalg.norm(ref))
    # bf16 dequant + bf16 MXU operands at K=2048: small absolute / tiny relative error.
    assert max_err < 0.5, f"max abs error too large: {max_err}"
    assert rel_err < 2e-2, f"relative error too large: {rel_err}"

    print("KERNEL_OK")
</pallas_src>

<mosaic_0001>
module attributes {stable_mosaic.version = 11 : i64} {
  func.func @_int4_linear_kernel(%arg0: i32, %arg1: i32, %arg2: i32, %arg3: memref<16x512xbf16, #tpu.memory_space<vmem>>, %arg4: memref<16x512xbf16, #tpu.memory_space<vmem>>, %arg5: memref<512x256xi8, #tpu.memory_space<vmem>>, %arg6: memref<1x2x4x256xbf16, #tpu.memory_space<vmem>>, %arg7: memref<1x2x4x256xbf16, #tpu.memory_space<vmem>>, %arg8: memref<16x256xbf16, #tpu.memory_space<vmem>>, %arg9: memref<16x256xf32, #tpu.memory_space<vmem>>) attributes {dimension_semantics = [#tpu.dimension_semantics<parallel>, #tpu.dimension_semantics<parallel>, #tpu.dimension_semantics<arbitrary>], iteration_bounds = array<i64: 1, 2, 2>, scalar_prefetch = 0 : i64, scratch_operands = 1 : i64, tpu.core_type = #tpu.core_type<tc>, window_params = [{transform_indices = @transform_0, window_bounds = array<i64: 16, 512>}, {transform_indices = @transform_1, window_bounds = array<i64: 16, 512>}, {transform_indices = @transform_2, window_bounds = array<i64: 512, 256>}, {transform_indices = @transform_3, window_bounds = array<i64: 1, 2, 4, 256>}, {transform_indices = @transform_4, window_bounds = array<i64: 1, 2, 4, 256>}, {transform_indices = @transform_5, window_bounds = array<i64: 16, 256>}]} {
    %c0_i32 = arith.constant 0 : i32
    %0 = arith.cmpi eq, %arg2, %c0_i32 : i32
    %1 = arith.extui %0 : i1 to i32
    %c0_i32_0 = arith.constant 0 : i32
    %2 = arith.cmpi ne, %1, %c0_i32_0 : i32
    scf.if %2 {
      %cst_31 = arith.constant 0.000000e+00 : f32
      %55 = vector.broadcast %cst_31 : f32 to vector<16x256xf32>
      %c0_32 = arith.constant 0 : index
      %c0_33 = arith.constant 0 : index
      %56 = vector.load %arg9[%c0_32, %c0_33] : memref<16x256xf32, #tpu.memory_space<vmem>>, vector<16x256xf32>
      tpu.vector_store %arg9[%c0_32, %c0_33], %55 {strides = array<i32>} : memref<16x256xf32, #tpu.memory_space<vmem>>, vector<16x256xf32>,
    } else {
    }
    %c0 = arith.constant 0 : index
    %c0_1 = arith.constant 0 : index
    %3 = vector.load %arg5[%c0, %c0_1] : memref<512x256xi8, #tpu.memory_space<vmem>>, vector<512x256xi8>
    %c0_2 = arith.constant 0 : index
    %c0_3 = arith.constant 0 : index
    %4 = vector.load %arg9[%c0_2, %c0_3] : memref<16x256xf32, #tpu.memory_space<vmem>>, vector<16x256xf32>
    %c0_4 = arith.constant 0 : index
    %c0_5 = arith.constant 0 : index
    %5 = vector.load %arg3[%c0_4, %c0_5] : memref<16x512xbf16, #tpu.memory_space<vmem>>, vector<16x512xbf16>
    %c15_i8 = arith.constant 15 : i8
    %6 = vector.broadcast %c15_i8 : i8 to vector<512x256xi8>
    %7 = arith.andi %3, %6 : vector<512x256xi8>
    %8 = arith.extui %7 : vector<512x256xi8> to vector<512x256xi32>
    %9 = arith.sitofp %8 : vector<512x256xi32> to vector<512x256xf32>
    %10 = vector.shape_cast %9 : vector<512x256xf32> to vector<4x128x256xf32>
    %c0_6 = arith.constant 0 : index
    %c0_7 = arith.constant 0 : index
    %c0_8 = arith.constant 0 : index
    %c0_9 = arith.constant 0 : index
    %11 = vector.load %arg6[%c0_6, %c0_7, %c0_8, %c0_9] : memref<1x2x4x256xbf16, #tpu.memory_space<vmem>>, vector<1x1x4x256xbf16>
    %12 = vector.shape_cast %11 : vector<1x1x4x256xbf16> to vector<4x256xbf16>
    %13 = arith.extf %12 : vector<4x256xbf16> to vector<4x256xf32>
    %14 = vector.shape_cast %13 : vector<4x256xf32> to vector<4x1x256xf32>
    %c0_10 = arith.constant 0 : index
    %c0_11 = arith.constant 0 : index
    %c0_12 = arith.constant 0 : index
    %c0_13 = arith.constant 0 : index
    %15 = vector.load %arg7[%c0_10, %c0_11, %c0_12, %c0_13] : memref<1x2x4x256xbf16, #tpu.memory_space<vmem>>, vector<1x1x4x256xbf16>
    %16 = vector.shape_cast %15 : vector<1x1x4x256xbf16> to vector<4x256xbf16>
    %17 = arith.extf %16 : vector<4x256xbf16> to vector<4x256xf32>
    %18 = vector.shape_cast %17 : vector<4x256xf32> to vector<4x1x256xf32>
    %19 = vector.broadcast %14 : vector<4x1x256xf32> to vector<4x128x256xf32>
    %20 = arith.mulf %10, %19 : vector<4x128x256xf32>
    %21 = vector.broadcast %18 : vector<4x1x256xf32> to vector<4x128x256xf32>
    %22 = arith.addf %20, %21 : vector<4x128x256xf32>
    %23 = vector.shape_cast %22 : vector<4x128x256xf32> to vector<512x256xf32>
    %24 = arith.truncf %23 : vector<512x256xf32> to vector<512x256xbf16>
    %cst = arith.constant dense<0.000000e+00> : vector<16x256xf32>
    %25 = tpu.matmul %5, %24, %cst {dimension_numbers = #tpu.dot_dimension_numbers<[1], [0], [0], [1], [0, 0, 1, 1], [], []>} : vector<16x512xbf16>, vector<512x256xbf16>, vector<16x256xf32> -> vector<16x256xf32>
    %26 = arith.addf %4, %25 : vector<16x256xf32>
    %c0_14 = arith.constant 0 : index
    %c0_15 = arith.constant 0 : index
    %27 = vector.load %arg9[%c0_14, %c0_15] : memref<16x256xf32, #tpu.memory_space<vmem>>, vector<16x256xf32>
    tpu.vector_store %arg9[%c0_14, %c0_15], %26 {strides = array<i32>} : memref<16x256xf32, #tpu.memory_space<vmem>>, vector<16x256xf32>,
    %c0_16 = arith.constant 0 : index
    %c0_17 = arith.constant 0 : index
    %28 = vector.load %arg9[%c0_16, %c0_17] : memref<16x256xf32, #tpu.memory_space<vmem>>, vector<16x256xf32>
    %c0_18 = arith.constant 0 : index
    %c0_19 = arith.constant 0 : index
    %29 = vector.load %arg4[%c0_18, %c0_19] : memref<16x512xbf16, #tpu.memory_space<vmem>>, vector<16x512xbf16>
    %c-16_i8 = arith.constant -16 : i8
    %30 = vector.broadcast %c-16_i8 : i8 to vector<512x256xi8>
    %31 = arith.andi %3, %30 : vector<512x256xi8>
    %32 = arith.extui %31 : vector<512x256xi8> to vector<512x256xi32>
    %33 = arith.sitofp %32 : vector<512x256xi32> to vector<512x256xf32>
    %34 = vector.shape_cast %33 : vector<512x256xf32> to vector<4x128x256xf32>
    %c0_20 = arith.constant 0 : index
    %c1 = arith.constant 1 : index
    %c0_21 = arith.constant 0 : index
    %c0_22 = arith.constant 0 : index
    %35 = vector.load %arg6[%c0_20, %c1, %c0_21, %c0_22] : memref<1x2x4x256xbf16, #tpu.memory_space<vmem>>, vector<1x1x4x256xbf16>
    %36 = vector.shape_cast %35 : vector<1x1x4x256xbf16> to vector<4x256xbf16>
    %37 = arith.extf %36 : vector<4x256xbf16> to vector<4x256xf32>
    %38 = vector.shape_cast %37 : vector<4x256xf32> to vector<4x1x256xf32>
    %c0_23 = arith.constant 0 : index
    %c1_24 = arith.constant 1 : index
    %c0_25 = arith.constant 0 : index
    %c0_26 = arith.constant 0 : index
    %39 = vector.load %arg7[%c0_23, %c1_24, %c0_25, %c0_26] : memref<1x2x4x256xbf16, #tpu.memory_space<vmem>>, vector<1x1x4x256xbf16>
    %40 = vector.shape_cast %39 : vector<1x1x4x256xbf16> to vector<4x256xbf16>
    %41 = arith.extf %40 : vector<4x256xbf16> to vector<4x256xf32>
    %42 = vector.shape_cast %41 : vector<4x256xf32> to vector<4x1x256xf32>
    %43 = vector.broadcast %38 : vector<4x1x256xf32> to vector<4x128x256xf32>
    %44 = arith.mulf %34, %43 : vector<4x128x256xf32>
    %45 = vector.broadcast %42 : vector<4x1x256xf32> to vector<4x128x256xf32>
    %46 = arith.addf %44, %45 : vector<4x128x256xf32>
    %47 = vector.shape_cast %46 : vector<4x128x256xf32> to vector<512x256xf32>
    %48 = arith.truncf %47 : vector<512x256xf32> to vector<512x256xbf16>
    %cst_27 = arith.constant dense<0.000000e+00> : vector<16x256xf32>
    %49 = tpu.matmul %29, %48, %cst_27 {dimension_numbers = #tpu.dot_dimension_numbers<[1], [0], [0], [1], [0, 0, 1, 1], [], []>} : vector<16x512xbf16>, vector<512x256xbf16>, vector<16x256xf32> -> vector<16x256xf32>
    %50 = arith.addf %28, %49 : vector<16x256xf32>
    %c0_28 = arith.constant 0 : index
    %c0_29 = arith.constant 0 : index
    %51 = vector.load %arg9[%c0_28, %c0_29] : memref<16x256xf32, #tpu.memory_space<vmem>>, vector<16x256xf32>
    tpu.vector_store %arg9[%c0_28, %c0_29], %50 {strides = array<i32>} : memref<16x256xf32, #tpu.memory_space<vmem>>, vector<16x256xf32>,
    %c1_i32 = arith.constant 1 : i32
    %52 = arith.cmpi eq, %arg2, %c1_i32 : i32
    %53 = arith.extui %52 : i1 to i32
    %c0_i32_30 = arith.constant 0 : i32
    %54 = arith.cmpi ne, %53, %c0_i32_30 : i32
    scf.if %54 {
      %c0_31 = arith.constant 0 : index
      %c0_32 = arith.constant 0 : index
      %55 = vector.load %arg9[%c0_31, %c0_32] : memref<16x256xf32, #tpu.memory_space<vmem>>, vector<16x256xf32>
      %56 = arith.truncf %55 : vector<16x256xf32> to vector<16x256xbf16>
      %c0_33 = arith.constant 0 : index
      %c0_34 = arith.constant 0 : index
      %57 = vector.load %arg8[%c0_33, %c0_34] : memref<16x256xbf16, #tpu.memory_space<vmem>>, vector<16x256xbf16>
      tpu.vector_store %arg8[%c0_33, %c0_34], %56 {strides = array<i32>} : memref<16x256xbf16, #tpu.memory_space<vmem>>, vector<16x256xbf16>,
    } else {
    }
    return
  }
  func.func @transform_0(%arg0: i32, %arg1: i32, %arg2: i32) -> (i32, i32) {
    %c0_i32 = arith.constant 0 : i32
    return %arg0, %arg2 : i32, i32
  }
  func.func @transform_1(%arg0: i32, %arg1: i32, %arg2: i32) -> (i32, i32) {
    %c2_i32 = arith.constant 2 : i32
    %0 = arith.addi %arg2, %c2_i32 : i32
    %c0_i32 = arith.constant 0 : i32
    return %arg0, %0 : i32, i32
  }
  func.func @transform_2(%arg0: i32, %arg1: i32, %arg2: i32) -> (i32, i32) {
    %c0_i32 = arith.constant 0 : i32
    return %arg2, %arg1 : i32, i32
  }
  func.func @transform_3(%arg0: i32, %arg1: i32, %arg2: i32) -> (i32, i32, i32, i32) {
    %c0_i32 = arith.constant 0 : i32
    %c0_i32_0 = arith.constant 0 : i32
    %c0_i32_1 = arith.constant 0 : i32
    return %arg2, %c0_i32, %c0_i32_0, %arg1 : i32, i32, i32, i32
  }
  func.func @transform_4(%arg0: i32, %arg1: i32, %arg2: i32) -> (i32, i32, i32, i32) {
    %c0_i32 = arith.constant 0 : i32
    %c0_i32_0 = arith.constant 0 : i32
    %c0_i32_1 = arith.constant 0 : i32
    return %arg2, %c0_i32, %c0_i32_0, %arg1 : i32, i32, i32, i32
  }
  func.func @transform_5(%arg0: i32, %arg1: i32, %arg2: i32) -> (i32, i32) {
    %c0_i32 = arith.constant 0 : i32
    return %arg0, %arg1 : i32, i32
  }
}

</mosaic_0001>

<bundles_post_ra>
// kernel: tpu_custom_call.1
= control target key start
LH: loop header
LB: loop body
LE: loop exit
PB: predicated region body
PF: predicated region fallthrough
CT: control target
= control target key end

     0   :  { %s4888_s0 = inlined_call_operand.hbm [shape: bf16[16,2048], index: 0, kind: input, shape index: {}]   ;;  %s4889_s1 = inlined_call_operand.hbm [shape: bf16[16,2048], index: 1, kind: input, shape index: {}]   ;;  %s4890_s2 = inlined_call_operand.hbm [shape: u8[1024,512], index: 2, kind: input, shape index: {}]   ;;  %s4891_s3 = inlined_call_operand.hbm [shape: bf16[2,2,4,512], index: 3, kind: input, shape index: {}]   ;;  %s4892_s4 = inlined_call_operand.hbm [shape: bf16[2,2,4,512], index: 4, kind: input, shape index: {}]   ;;  %s4893_s5 = inlined_call_operand.hbm [shape: bf16[16,512], index: 5, kind: output, shape index: {}]  }
   0x1   :  { %4928 = sst [smem:[#allocation39_spill]] %s4888_s0 }
   0x2   :  { %4929 = sst [smem:[#allocation40_spill]] %s4889_s1 }
   0x3   :  { %4930 = sst [smem:[#allocation41_spill]] %s4890_s2 }
   0x4   :  { %4931 = sst [smem:[#allocation42_spill]] %s4891_s3 }
   0x5   :  { %4932 = sst [smem:[#allocation43_spill]] %s4892_s4 }
   0x6   :  { %4933 = sst [smem:[#allocation44_spill]] %s4893_s5 }
   0x7   :  { %10 = vsyncpa [#allocation4], 0 }
   0x8   :  { %12 = vsyncpa [#allocation4 + $0x1], 0 }
   0x9   :  { %13 = vsyncpa [#allocation7], 0 }
   0xa   :  { %15 = vsyncpa [#allocation7 + $0x1], 0 }
   0xb   :  { %16 = vsyncpa [#allocation10], 0 }
   0xc   :  { %18 = vsyncpa [#allocation10 + $0x1], 0 }
   0xd   :  { %19 = vsyncpa [#allocation5], 0 }
   0xe   :  { %21 = vsyncpa [#allocation5 + $0x1], 0  ;;  %s3348_s18 = smov 0   ;;  %s3350_s19 = smov 0  }
   0xf   :  { %s3352_s20 = smov 0   ;;  %s3354_s21 = smov 0  }
  0x10   :  { %s3356_s22 = smov 0   ;;  %s3358_s23 = smov 0  }
  0x11   :  { %s3360_s24 = smov 0   ;;  %s3362_s25 = smov 0  }
  0x12   :  { %s3364_s26 = smov 0   ;;  %s3366_s27 = smov 0  }
  0x13   :  { %s3368_s28 = smov 0   ;;  %s3370_s29 = smov 0  }
  0x14   :  { %s3372_s30 = smov 0   ;;  %s3374_s6 = smov 0  }
  0x15   :  { %s3376_s7 = smov 0   ;;  %s3378_s8 = smov 0  }
  0x16   :  { %s3380_s9 = smov 0  }
  0x17 LB: > { %4934 = sst [smem:[#allocation18_spill]] %s3234_s18  ;;  %s3432_s10 = sadd.s32 4294967295, %s3298_s9   ;;  %s3298_s9 = sphi %s3380_s9, %s27_s9   ;;  %s3294_s8 = sphi %s3378_s8, %s5027_s8   ;;  %s3290_s7 = sphi %s3376_s7, %s5019_s7   ;;  %s3286_s6 = sphi %s3374_s6, %s5018_s6   ;;  %s3282_s30 = sphi %s3372_s30, %s5017_s30   ;;  %s3278_s29 = sphi %s3370_s29, %s5016_s29   ;;  %s3274_s28 = sphi %s3368_s28, %s5026_s28   ;;  %s3270_s27 = sphi %s3366_s27, %s5025_s27   ;;  %s3266_s26 = sphi %s3364_s26, %s5014_s26   ;;  %s3262_s25 = sphi %s3362_s25, %s5013_s25   ;;  %s3258_s24 = sphi %s3360_s24, %s5024_s24   ;;  %s3254_s23 = sphi %s3358_s23, %s5011_s23   ;;  %s3250_s22 = sphi %s3356_s22, %s5023_s22   ;;  %s3246_s21 = sphi %s3354_s21, %s5022_s21   ;;  %s3242_s20 = sphi %s3352_s20, %s5009_s20   ;;  %s3238_s19 = sphi %s3350_s19, %s5008_s19   ;;  %s3234_s18 = sphi %s3348_s18, %s5007_s18  }
  0x18   : > { %4935 = sst [smem:[#allocation19_spill]] %s3238_s19  ;;  %s39_s11 = sadd.s32 1, %s3290_s7 }
  0x19   : > { %4936 = sst [smem:[#allocation20_spill]] %s3242_s20  ;;  %p3435_p0 = scmp.ge.s32.totalorder %s39_s11, 2 }
  0x1a   : > { %4937 = sst [smem:[#allocation21_spill]] %s3254_s23  ;;  %p4913_p1 = scmp.eq.s32.totalorder %s3298_s9, 0 }
  0x1b   : > { %4938 = sst [smem:[#allocation22_spill]] %s3262_s25  ;;  %p4897_p2 = scmp.eq.s32.totalorder %s3432_s10, 0 }
  0x1c   : > { %4939 = sst [smem:[#allocation23_spill]] %s3266_s26  ;;  %s78_s13 = sadd.s32 2, %s3290_s7 }
  0x1d   : > { %4940 = sst [smem:[#allocation24_spill]] %s3270_s27  ;;  %s5029_s11 = smov (%p3435_p0, %s39_s11), 0 }
  0x1e   : > { %4941 = sst [smem:[#allocation25_spill]] %s3278_s29  ;;  %s85_s14 = sadd.s32 1, %s3266_s26 }
  0x1f   : > { %4942 = sst [smem:[#allocation26_spill]] %s3282_s30  ;;  %p92_p3 = scmp.ne.s32.totalorder %s3266_s26, %s3262_s25 }
  0x20   : > { %4943 = sst [smem:[#allocation27_spill]] %s3286_s6  ;;  %s79_s15 = sadd.s32 2, %s5029_s11 }
  0x21   : > { %4944 = sst [smem:[#allocation28_spill]] %s3290_s7  ;;  %p98_p4 = scmp.ne.s32.totalorder %s3262_s25, %s3258_s24 }
  0x22   : > { %4945 = sst [smem:[#allocation29_spill]] %s3294_s8  ;;  %s81_s16 = ssub.s32 %s78_s13, %s79_s15 }
  0x23   : > { %4947 = sst [smem:[#allocation30_spill]] %s5029_s11  ;;  %p3453_p5 = por %p92_p3, %p4913_p1 }
  0x24   : > { %p83_p6 = scmp.eq.s32.totalorder %s81_s16, 0  ;;  %p3459_p7 = por %p98_p4, %p4897_p2 }
  0x25   : > { %p4896_p9 = scmp.lt.s32.totalorder %s3298_s9, 4  ;;  %s4898_s24 = sshll.u32 %s3290_s7, 8 }
  0x26   : > { %s3465_s6 = scalar_select %p83_p6, %s3266_s26, %s85_s14  }
  0x27   : > { %s4899_s13 = sand.u32 1, %s3298_s9   ;;  %s260_s15 = sand.u32 1, %s3266_s26  }
  0x28   : > { %4950 = sst [smem:[#allocation31_spill]] %s3465_s6  ;;  %s2721_s30 = sshll.u32 %s260_s15, 5 }
  0x29   : > { %s4951_s1 = sld [smem:[#allocation40_spill]]  ;;  %s262_s4 = scalar_lea.vmem [#allocation6], %s2721_s30 }
  0x2a   : > { %s273_s27 = sshll.u32 %s262_s4, 4  ;;  %p3483_p10 = pnand %p4896_p9, %p3453_p5  ;;  %s274_s27 = int_to_ptr.vmem [resolvable:$true] %s273_s27 }
  0x2b   : > { %p2737_p11 = scmp.ge.s32.totalorder %s3298_s9, 1  ;;  %p351_p12 = scmp.lt.s32.totalorder %s3298_s9, 5 }
  0x2c   : > { %s3491_s15 = scalar_lea.sflag [#allocation7], %s4899_s13  ;;  %p2979_p13 = pneg %p3483_p10 }
  0x2d   : > { %s2990_s2 = scalar_lea.vmem %s274_s27, 512  ;;  %s3300_s4 = smov [#allocation6]  }
  0x2e   : > { %p2991_p3 = scmp.ne.s32.totalorder %s274_s27, %s2990_s2  ;;  %s2995_s25 = sshll.u32 %s3300_s4, 4  ;;  %s2996_s25 = int_to_ptr.vmem [resolvable:$false] %s2995_s25 }
  0x2f   : > { %s3476_s16 = scalar_lea.hbm %s4951_s1, %s4898_s24  ;;  %s2997_s30 = scalar_lea.vmem %s2996_s25, 1024 }
  0x30   : > { %s2571_s0 = scalar_lea.hbm %s3476_s16, 512  ;;  %p2993_p4 = pnand %p2991_p3, %p2979_p13 }
  0x31   : > { %p2998_p5 = scmp.lt.s32.totalorder %s274_s27, %s2996_s25  ;;  %p2999_p9 = scmp.lt.s32.totalorder %s2997_s30, %s2990_s2 }
  0x32   : > { %p2994_p6 = pneg %p2993_p4 }
  0x33   : > { %p3000_p8 = por %p2999_p9, %p2998_p5 }
  0x35   : > { %p3001_p2 = pnand %p3000_p8, %p2994_p6 }
  0x37   : > { %3004 = shalt.err (!%p3001_p2)
}
  0x38   : > { %s4900_s17 = smov 1024   ;;  %s4901_s2 = smov 256  }
  0x39   : > { %s4903_s4 = smov 16   ;;  %p3507_p2 = pnand %p2737_p11, %p351_p12 }
  0x3a   : > { %2787 = dma.hbm_to_vmem [thread:$0]  (!%p3483_p10), %s2571_s0, 512, %s274_s27, %s3491_s15, %s4900_s17, %s4901_s2, %s4903_s4  }
  0x3b   : > { %s2715_s30 = sadd.s32 4294967294, %s3298_s9   ;;  %s42_s24 = sadd.s32 1, %s3294_s8 }
  0x3c   : > { %s3515_s13 = ssub.s32 %s3290_s7, %s5029_s11  ;;  %s5031_s24 = smov (!%p3435_p0, %s42_s24), %s3294_s8 }
  0x3d   : > { %s113_s0 = sadd.s32 1, %s3254_s23  ;;  %p44_p9 = scmp.ge.s32.totalorder %s5031_s24, 2 }
  0x3e   : > { %p120_p10 = scmp.ne.s32.totalorder %s3254_s23, %s3250_s22  ;;  %p126_p11 = scmp.ne.s32.totalorder %s3250_s22, %s3246_s21 }
  0x3f   : > { %s197_s27 = sadd.s32 1, %s3242_s20  ;;  %s5033_s24 = smov (%p44_p9, %s5031_s24), 0 }
  0x40   : > { %4954 = sst [smem:[#allocation32_spill]] %s5033_s24  ;;  %p3531_p12 = por %p120_p10, %p4913_p1 }
  0x41   : > { %p4956_p0 = scmp.eq.s32.totalorder %s3432_s10, 0  ;;  %s109_s14 = ssub.s32 %s3294_s8, %s5033_s24 }
  0x42   : > { %p207_p3 = scmp.ne.s32.totalorder %s3242_s20, %s3238_s19  ;;  %s110_s21 = sor.u32 %s109_s14, %s3515_s13 }
  0x43   : > { %p3537_p13 = por %p126_p11, %p4956_p0  ;;  %p195_p4 = scmp.eq.s32.totalorder %s109_s14, 0 }
  0x44   : > { %p111_p6 = scmp.eq.s32.totalorder %s110_s21, 0  ;;  %p4959_p5 = scmp.eq.s32.totalorder %s3432_s10, 3 }
  0x45   : > { %s4957_s16 = scalar_select %p3537_p13, 1, 0 }
  0x46   : > { %p3548_p9 = por %p4959_p5, %p207_p3  ;;  %p213_p10 = scmp.ne.s32.totalorder %s3238_s19, %s3234_s18 }
  0x47   : > { %4958 = sst [smem:[#allocation33_spill]] %s4957_s16  ;;  %p214_p11 = scmp.eq.s32.totalorder %s2715_s30, 3 }
  0x48   : > { %s4960_s17 = scalar_select %p3548_p9, 1, 0 }
  0x49   : > { %s3553_s2 = scalar_select %p195_p4, %s3242_s20, %s197_s27  }
  0x4a   : > { %4961 = sst [smem:[#allocation34_spill]] %s4960_s17  ;;  %s285_s1 = sand.u32 1, %s3254_s23  }
  0x4b   : > { %4962 = sst [smem:[#allocation35_spill]] %s3553_s2  ;;  %s2726_s24 = sshll.u32 %s3294_s8, 1 }
  0x4c   : > { %s3556_s4 = scalar_select %p111_p6, %s3254_s23, %s113_s0  }
  0x4d   : > { %p3562_p0 = por %p214_p11, %p213_p10  ;;  %s3566_s14 = sshll.u32 %s285_s1, 8 }
  0x4e   : > { %4963 = sst [smem:[#allocation36_spill]] %s3556_s4  ;;  %s2765_s21 = sshll.u32 %s3290_s7, 6 }
  0x4f   : > { %s4964_s11 = scalar_select %p3562_p0, 1, 0 }
  0x50   : > { %s3569_s6 = sadd.s32 %s2765_s21, %s2726_s24  ;;  %p4966_p3 = scmp.lt.s32.totalorder %s3298_s9, 4 }
  0x51   : > { %4965 = sst [smem:[#allocation37_spill]] %s4964_s11  ;;  %s3580_s27 = sshll.u32 %s285_s1, 3 }
  0x52   : > { %p3575_p4 = pnand %p4966_p3, %p3531_p12  ;;  %s2731_s8 = sshll.u32 %s3290_s7, 3 }
  0x53   : > { %s3583_s26 = sadd.s32 %s2731_s8, %s2726_s24  ;;  %s311_s4 = scalar_lea.vmem [#allocation9], %s3580_s27 }
  0x54   : > { %s320_s21 = sshll.u32 %s311_s4, 4  ;;  %s2732_s23 = sshll.u32 %s3583_s26, 5  ;;  %s321_s21 = int_to_ptr.vmem [resolvable:$true] %s320_s21 }
  0x55   : > { %s4968_s3 = sld [smem:[#allocation42_spill]]  ;;  %s4969_s11 = sand.u32 1, %s3298_s9  }
  0x56   : > { %s3592_s18 = scalar_lea.sflag [#allocation10], %s4969_s11  ;;  %p4921_p12 = pneg %p3575_p4 }
  0x57   : > { %s3019_s1 = scalar_lea.vmem %s321_s21, 128  ;;  %s3304_s8 = smov [#allocation9]  }
  0x58   : > { %p3020_p6 = scmp.ne.s32.totalorder %s321_s21, %s3019_s1  ;;  %s3024_s24 = sshll.u32 %s3304_s8, 4  ;;  %s3025_s24 = int_to_ptr.vmem [resolvable:$false] %s3024_s24 }
  0x59   : > { %s3026_s26 = scalar_lea.vmem %s3025_s24, 256  ;;  %p3027_p11 = scmp.lt.s32.totalorder %s321_s21, %s3025_s24 }
  0x5a   : > { %p3022_p5 = pnand %p3020_p6, %p4921_p12  ;;  %p3028_p3 = scmp.lt.s32.totalorder %s3026_s26, %s3019_s1 }
  0x5b   : > { %s319_s20 = scalar_lea.hbm %s4968_s3, %s2732_s23 }
  0x5c   : > { %p3023_p10 = pneg %p3022_p5  ;;  %p3029_p1 = por %p3028_p3, %p3027_p11 }
  0x5e   : > { %p3030_p8 = pnand %p3029_p1, %p3023_p10 }
  0x60   : > { %3033 = shalt.err (!%p3030_p8)
}
  0x61   : > { %s4920_s2 = smov 128   ;;  %s4970_s11 = sld [smem:[#allocation24_spill]] }
  0x62   : > { %s4922_s4 = smov 64   ;;  %s4923_s12 = smov 4  }
  0x63   : > { %2793 = dma.hbm_to_vmem [thread:$0]  (!%p3575_p4), %s319_s20, 128, %s321_s21, %s3592_s18, %s4920_s2, %s4922_s4, %s4923_s12  }
  0x64   : > { %s4971_s24 = sld [smem:[#allocation43_spill]]  ;;  %s334_s30 = scalar_lea.vmem [#allocation11], %s3580_s27 }
  0x65   : > { %s343_s3 = sshll.u32 %s334_s30, 4  ;;  %s55_s17 = sadd.s32 1, %s3278_s29  ;;  %s3611_s3 = int_to_ptr.vmem [resolvable:$true] %s343_s3 }
  0x66   : > { %p62_p1 = scmp.ne.s32.totalorder %s3278_s29, %s3274_s28  ;;  %p4972_p8 = scmp.eq.s32.totalorder %s3515_s13, 0 }
  0x67   : > { %p4974_p6 = scmp.eq.s32.totalorder %s3298_s9, 0  ;;  %p68_p10 = scmp.ne.s32.totalorder %s3274_s28, %s4970_s11 }
  0x68   : > { %s3619_s19 = scalar_select %p4972_p8, %s3278_s29, %s55_s17  }
  0x69   : > { %p64_p5 = por %p4974_p6, %p62_p1  ;;  %s234_s16 = sand.u32 1, %s3278_s29  }
  0x6a   : > { %s3608_s26 = scalar_lea.hbm %s4971_s24, %s2732_s23  ;;  %4973 = sst [smem:[#allocation38_spill]] %s3619_s19 }
  0x6b   : > { %s4975_s20 = sshll.u32 %s3290_s7, 8  ;;  %s4976_s1 = sld [smem:[#allocation39_spill]] }
  0x6c   : > { %p4977_p11 = scmp.eq.s32.totalorder %s3432_s10, 0  ;;  %s2718_s27 = sshll.u32 %s234_s16, 5 }
  0x6d   : > { %p4979_p12 = scmp.lt.s32.totalorder %s3298_s9, 4  ;;  %s4981_s17 = sshll.u32 %s3569_s6, 7 }
  0x6e   : > { %p3635_p3 = por %p4977_p11, %p68_p10  ;;  %s4982_s24 = sld [smem:[#allocation41_spill]] }
  0x6f   : > { %p3641_p0 = pnand %p4979_p12, %p64_p5  ;;  %s238_s2 = scalar_lea.vmem [#allocation3], %s2718_s27 }
  0x70   : > { %s287_s21 = scalar_lea.vmem [#allocation8], %s3566_s14  ;;  %s235_s12 = scalar_lea.sflag [#allocation4], %s234_s16 }
  0x71   : > { %s3631_s23 = scalar_lea.hbm %s4976_s1, %s4975_s20  ;;  %s248_s20 = sshll.u32 %s238_s2, 4  ;;  %s249_s20 = int_to_ptr.vmem [resolvable:$true] %s248_s20 }
  0x72   : > { %s297_s1 = sshll.u32 %s287_s21, 4  ;;  %p3036_p1 = pneg %p3641_p0  ;;  %s298_s1 = int_to_ptr.vmem [resolvable:$true] %s297_s1 }
  0x73   : > { %s3047_s7 = scalar_lea.vmem %s249_s20, 512  ;;  %s3308_s19 = smov [#allocation3]  }
  0x74   : > { %s3650_s4 = scalar_lea.hbm %s4982_s24, %s4981_s17  ;;  %p3048_p12 = scmp.ne.s32.totalorder %s249_s20, %s3047_s7 }
  0x75   : > { %s3052_s6 = sshll.u32 %s3308_s19, 4  ;;  %s3053_s6 = int_to_ptr.vmem [resolvable:$false] %s3052_s6 }
  0x76   : > { %p3050_p8 = pnand %p3048_p12, %p3036_p1  ;;  %s3054_s29 = scalar_lea.vmem %s3053_s6, 1024 }
  0x77   : > { %p3055_p5 = scmp.lt.s32.totalorder %s249_s20, %s3053_s6  ;;  %p3056_p10 = scmp.lt.s32.totalorder %s3054_s29, %s3047_s7 }
  0x78   : > { %p3051_p6 = pneg %p3050_p8 }
  0x79   : > { %p3057_p11 = por %p3056_p10, %p3055_p5 }
  0x7b   : > { %p3058_p9 = pnand %p3057_p11, %p3051_p6 }
  0x7d   : > { %3061 = shalt.err (!%p3058_p9)
}
  0x7e   : > { %s4983_s14 = smov 16   ;;  %s4984_s27 = smov 256  }
  0x7f   : > { %s4985_s16 = smov 1024   ;;  %s3075_s17 = scalar_lea.vmem %s298_s1, 4096 }
  0x80   : > { %2784 = dma.hbm_to_vmem [thread:$0]  (!%p3641_p0), %s3631_s23, 512, %s249_s20, %s235_s12, %s4985_s16, %s4984_s27, %s4983_s14  }
  0x81   : > { %p3076_p1 = scmp.ne.s32.totalorder %s298_s1, %s3075_s17  ;;  %p4986_p12 = pneg %p3575_p4 }
  0x82   : > { %s3309_s19 = smov [#allocation8]  }
  0x83   : > { %p3078_p8 = pnand %p3076_p1, %p4986_p12  ;;  %s3080_s29 = sshll.u32 %s3309_s19, 4  ;;  %s3081_s29 = int_to_ptr.vmem [resolvable:$false] %s3080_s29 }
  0x84   : > { %s3082_s7 = scalar_lea.vmem %s3081_s29, 8192  ;;  %p3083_p9 = scmp.lt.s32.totalorder %s298_s1, %s3081_s29 }
  0x85   : > { %p3079_p13 = pneg %p3078_p8  ;;  %p3084_p6 = scmp.lt.s32.totalorder %s3082_s7, %s3075_s17 }
  0x87   : > { %p3085_p5 = por %p3084_p6, %p3083_p9 }
  0x89   : > { %p3086_p10 = pnand %p3085_p5, %p3079_p13 }
  0x8b   : > { %3089 = shalt.err (!%p3086_p10)
}
  0x8c   : > { %s3310_s13 = smov 512   ;;  %s3103_s12 = scalar_lea.vmem %s3611_s3, 128 }
  0x8d   : > { %2790 = dma.hbm_to_vmem [thread:$0]  (!%p3575_p4), %s3650_s4, 4096, %s298_s1, %s3491_s15, %s3310_s13, %s4984_s27, %s4983_s14  }
  0x8e   : > { %p3104_p0 = scmp.ne.s32.totalorder %s3611_s3, %s3103_s12  ;;  %p4987_p11 = pmov %p4986_p12 }
  0x8f   : > { %s3311_s23 = smov [#allocation11]  }
  0x90   : > { %p3106_p1 = pnand %p3104_p0, %p4987_p11  ;;  %s3108_s11 = sshll.u32 %s3311_s23, 4  ;;  %s3109_s11 = int_to_ptr.vmem [resolvable:$false] %s3108_s11 }
  0x91   : > { %s3110_s8 = scalar_lea.vmem %s3109_s11, 256  ;;  %p3111_p13 = scmp.lt.s32.totalorder %s3611_s3, %s3109_s11 }
  0x92   : > { %p3107_p12 = pneg %p3106_p1  ;;  %p3112_p8 = scmp.lt.s32.totalorder %s3110_s8, %s3103_s12 }
  0x94   : > { %p3113_p9 = por %p3112_p8, %p3111_p13 }
  0x96   : > { %p3114_p6 = pnand %p3113_p9, %p3107_p12 }
  0x98   : > { %3117 = shalt.err (!%p3114_p6)
}
  0x99   : > { %s4988_s24 = smov 4   ;;  %s4989_s2 = smov 64  }
  0x9a   : > { %s4990_s15 = smov 128   ;;  %355 = sbr.rel (%p3507_p2) target bundleno = 837 (0x345), region = 40 }
  0x9b   : > { %2796 = dma.hbm_to_vmem [thread:$0]  (!%p3575_p4), %s3608_s26, 128, %s3611_s3, %s3592_s18, %s4990_s15, %s4989_s2, %s4988_s24  }
  0x9c   : > { %s357_s4 = sand.u32 (!%p3507_p2), 1, %s3274_s28  }
  0x9d   : > { %s2738_s20 = sshll.u32 (!%p3507_p2), %s357_s4, 5  ;;  %s358_s21 = scalar_lea.sflag (!%p3507_p2), [#allocation4], %s357_s4 }
  0x9e   : > { %s3687_s1 = scalar_lea.vmem (!%p3507_p2), [#allocation3], %s2738_s20 }
  0x9f   : > { %3213 = dma.done.wait (%p3635_p3), %s358_s21, 512  }
  0xa0   : > { %3215 = vsyncadd (%p3635_p3), %s358_s21, 4294966784  ;;  %s4991_s0 = sld [smem:[#allocation22_spill]]  ;;  %s366_s6 = sand.u32 1, %s3432_s10  }
  0xa1   : > { %s367_s25 = scalar_lea.sflag [#allocation7], %s366_s6 }
  0xa6   : > { %s368_s3 = sand.u32 1, %s4991_s0  }
  0xa7   : > { %s2739_s18 = sshll.u32 %s368_s3, 5 }
  0xa8   : > { %s3695_s26 = scalar_lea.vmem [#allocation6], %s2739_s18 }
  0xa9   : > { %3217 = dma.done.wait (%p3459_p7), %s367_s25, 512  }
  0xaa   : > { %3219 = vsyncadd (%p3459_p7), %s367_s25, 4294966784  ;;  %s4992_s14 = sld [smem:[#allocation33_spill]]  ;;  %s377_s27 = sand.u32 1, %s3250_s22  }
  0xab   : > { %s2740_s16 = sshll.u32 %s377_s27, 8 }
  0xac   : > { %s3702_s30 = scalar_lea.vmem [#allocation8], %s2740_s16 }
  0xb0   : > { %p4993_p2 = scmp.ne.s32.totalorder %s4992_s14, 0 }
  0xb2   : > { %3221 = dma.done.wait (%p4993_p2), %s367_s25, 4096  }
  0xb3   : > { %3223 = vsyncadd (%p4993_p2), %s367_s25, 4294963200  ;;  %s3708_s10 = sshll.u32 %s377_s27, 3  ;;  %s385_s17 = scalar_lea.sflag [#allocation10], %s366_s6 }
  0xb4   : > { %s388_s19 = scalar_lea.vmem [#allocation9], %s3708_s10 }
  0xb5   : > { %3225 = dma.done.wait (%p4993_p2), %s385_s17, 256  }
  0xb6   : > { %3227 = vsyncadd (%p4993_p2), %s385_s17, 4294967040  ;;  %s4994_s5 = sld [smem:[#allocation19_spill]]  ;;  %s397_s13 = scalar_lea.vmem [#allocation11], %s3708_s10 }
  0xb7   : > { %s4995_s23 = sld [smem:[#allocation26_spill]] }
  0xbc   : > { %s441_s29 = sand.u32 1, %s4994_s5  }
  0xbd   : > { %s2743_s7 = sshll.u32 %s441_s29, 4  ;;  %p2744_p7 = scmp.ne.s32.totalorder %s4995_s23, 0 }
  0xbe   : > { %s3719_s12 = scalar_lea.vmem [#allocation12], %s2743_s7 }
  0xbf   : > { %460 = sbr.rel (%p2744_p7) target bundleno = 199 (0xc7), region = 64 }
  0xc4   : > { %v3312_v0 = vmov 0.0  }
  0xc5   : > { %461 = vst [vmem:[#allocation2 + $0x10] sm:$0xff] %v3312_v0  ;;  %462 = vst [vmem:[#allocation2] sm:$0xff] %v3312_v0 }
  0xc6   : > { %463 = vst [vmem:[#allocation2 + $0x18] sm:$0xff] %v3312_v0  ;;  %464 = vst [vmem:[#allocation2 + $0x8] sm:$0xff] %v3312_v0 }
  0xc7 PF: > { %v472_v1 = vld [vmem:[%s3702_s30 + $0x38] sm:$0xff]  ;;  %v921_v2 = vld [vmem:[%s388_s19] sm:$0xf]  ;;  %v927_v3 = vlaneseq  ;;  %v471_v4 = vld [vmem:[%s3702_s30 + $0x30] sm:$0xff]  ;;  %v3313_v7 = vmov 1966171168  }
  0xc8   : > { %v3726_v5 = vand.u32 252645135, %v472_v1  ;;  %v922_v6 = vunpack.c.l.bf16 %v921_v2  ;;  %v925_v8 = vunpack.c.l.s4 %v3313_v7  ;;  %v948_v9 = vld [vmem:[%s397_s13] sm:$0xf]  ;;  %v3730_v10 = vand.u32 4042322160, %v472_v1 }
  0xc9   : > { %v928_v11 = vshrl.u32 %v927_v3, 7  ;;  %v949_v12 = vunpack.c.l.bf16 %v948_v9  ;;  %v3732_v13 = vand.u32 252645135, %v471_v4  ;;  %v3734_v14 = vand.u32 4042322160, %v471_v4  ;;  %v488_v15 = vld [vmem:[%s3702_s30 + $0xb8] sm:$0xff] }
  0xca   : > { %v566_v16 = vunpack.c.2.s8 %v3726_v5  ;;  %v568_v17 = vunpack.c.3.s8 %v3726_v5  ;;  %v926_v18 = vunpack.c.0.s8 %v925_v8  ;;  %v3739_v19 = vand.u32 252645135, %v488_v15  ;;  %v487_v36 = vld [vmem:[%s3702_s30 + $0xb0] sm:$0xff]  ;;  %s4996_s11 = sld [smem:[#allocation26_spill]] }
  0xcb   : > { %v3741_v20 = vsub.s32 0, %v928_v11  ;;  %v3743_v21 = vsub.s32 1, %v928_v11  ;;  %v565_v22 = vunpack.c.2.s8 %v3732_v13  ;;  %v567_v23 = vunpack.c.3.s8 %v3732_v13 }
  0xcc   : > { %v694_v24 = vand.u32 255, %v566_v16  ;;  %v696_v25 = vand.u32 255, %v568_v17  ;;  %v3747_v26 = vsub.s32 %v926_v18, %v928_v11  ;;  %v630_v27 = vunpack.c.2.s8 %v3739_v19 }
  0xcd   : > { %v693_v28 = vand.u32 255, %v565_v22  ;;  %v695_v29 = vand.u32 255, %v567_v23  ;;  %v632_v30 = vunpack.c.3.s8 %v3739_v19  ;;  %v3751_v31 = vand.u32 4042322160, %v488_v15 }
  0xce   : > { %v822_v32 = vcvt.s32.f32 %v694_v24  ;;  %v824_v33 = vcvt.s32.f32 %v696_v25  ;;  %v3754_v34 = vrot.slane %v922_v6, %v3747_v26  ;;  %v3757_v35 = vrot.slane %v949_v12, %v3747_v26 }
  0xcf   : > { %v821_v37 = vcvt.s32.f32 %v693_v28  ;;  %v823_v38 = vcvt.s32.f32 %v695_v29  ;;  %v758_v39 = vand.u32 255, %v630_v27  ;;  %v760_v40 = vand.u32 255, %v632_v30 }
  0xd0   : > { %v931_v41 = vcombine.high %v3754_v34, %v3754_v34  ;;  %v938_v42 = vrot.slane %v3754_v34, %v3747_v26  ;;  %v958_v43 = vcombine.high %v3757_v35, %v3757_v35  ;;  %v965_v44 = vrot.slane %v3757_v35, %v3747_v26  ;;  %p2755_p4 = scmp.ne.s32.totalorder %s4996_s11, 1 }
  0xd1   : > { %v886_v45 = vcvt.s32.f32 %v758_v39  ;;  %v888_v46 = vcvt.s32.f32 %v760_v40  ;;  %v3768_v47 = vand.u32 252645135, %v487_v36  ;;  %v3770_v48 = vand.u32 4042322160, %v487_v36 }
  0xd2   : > { %v3773_v49 = vrot.slane %v938_v42, %v3743_v21  ;;  %v3776_v50 = vrot.slane %v965_v44, %v3743_v21  ;;  %v3779_v51 = vrot.slane %v938_v42, %v3741_v20  ;;  %v3782_v52 = vrot.slane %v965_v44, %v3741_v20 }
  0xd3   : > { %v946_v53 = vcombine.high %v938_v42, %v938_v42  ;;  %v973_v54 = vcombine.high %v965_v44, %v965_v44  ;;  %v629_v55 = vunpack.c.2.s8 %v3768_v47  ;;  %v631_v56 = vunpack.c.3.s8 %v3768_v47 }
  0xd4   : > { %v1044_v57 = vmul.f32 %v3773_v49, %v822_v32  ;;  %v1046_v58 = vmul.f32 %v3773_v49, %v824_v33  ;;  %v1043_v59 = vmul.f32 %v3779_v51, %v821_v37  ;;  %v1045_v60 = vmul.f32 %v3779_v51, %v823_v38 }
  0xd5   : > { %v3791_v61 = vrot.slane %v946_v53, %v3743_v21  ;;  %v3794_v62 = vrot.slane %v973_v54, %v3743_v21  ;;  %v757_v63 = vand.u32 255, %v629_v55  ;;  %v759_v0 = vand.u32 255, %v631_v56 }
  0xd6   : > { %v1212_v1 = vadd.f32 %v3776_v50, %v1044_v57  ;;  %v1214_v2 = vadd.f32 %v3776_v50, %v1046_v58  ;;  %v1211_v3 = vadd.f32 %v3782_v52, %v1043_v59  ;;  %v1213_v4 = vadd.f32 %v3782_v52, %v1045_v60 }
  0xd7   : > { %v1108_v6 = vmul.f32 %v3791_v61, %v886_v45  ;;  %v1110_v7 = vmul.f32 %v3791_v61, %v888_v46  ;;  %v885_v8 = vcvt.s32.f32 %v757_v63  ;;  %v887_v9 = vcvt.s32.f32 %v759_v0  ;;  %v470_v63 = vld [vmem:[%s3702_s30 + $0x28] sm:$0xff] }
  0xd8   : > { %v1326_v11 = vpack.c.bf16 %v1214_v2, %v1212_v1  ;;  %v1325_v12 = vpack.c.bf16 %v1213_v4, %v1211_v3  ;;  %v3803_v15 = vrot.slane %v946_v53, %v3741_v20  ;;  %v3806_v16 = vrot.slane %v973_v54, %v3741_v20  ;;  %v469_v4 = vld [vmem:[%s3702_s30 + $0x20] sm:$0xff] }
  0xd9   : > { %v1276_v17 = vadd.f32 %v3794_v62, %v1108_v6  ;;  %v1278_v18 = vadd.f32 %v3794_v62, %v1110_v7  ;;  %v562_v22 = vunpack.c.0.s8 %v3726_v5  ;;  %v564_v23 = vunpack.c.1.s8 %v3726_v5 }
  0xda   : > { %1395 = vmatprep.subr.bf16.mxu0 %v1326_v11  ;;  %v1107_v24 = vmul.f32 %v3803_v15, %v885_v8  ;;  %v1109_v25 = vmul.f32 %v3803_v15, %v887_v9  ;;  %v561_v27 = vunpack.c.0.s8 %v3732_v13  ;;  %v563_v28 = vunpack.c.1.s8 %v3732_v13 }
  0xdb   : > { %1396 = vmatpush1.bf16.msra.mxu0 %v1325_v12  ;;  %v1358_v29 = vpack.c.bf16 %v1278_v18, %v1276_v17  ;;  %v690_v30 = vand.u32 255, %v562_v22  ;;  %v692_v32 = vand.u32 255, %v564_v23  ;;  %v626_v33 = vunpack.c.0.s8 %v3739_v19 }
  0xdc   : > { %v1275_v36 = vadd.f32 %v3806_v16, %v1107_v24  ;;  %v1277_v37 = vadd.f32 %v3806_v16, %v1109_v25  ;;  %v689_v5 = vand.u32 255, %v561_v27  ;;  %v691_v38 = vand.u32 255, %v563_v28  ;;  %v486_v25 = vld [vmem:[%s3702_s30 + $0xa8] sm:$0xff] }
  0xdd   : > { %1438 = vmatprep.subr.bf16.mxu1 %v1358_v29  ;;  %v818_v39 = vcvt.s32.f32 %v690_v30  ;;  %v820_v40 = vcvt.s32.f32 %v692_v32  ;;  %v628_v42 = vunpack.c.1.s8 %v3739_v19  ;;  %v754_v44 = vand.u32 255, %v626_v33  ;;  %v485_v32 = vld [vmem:[%s3702_s30 + $0xa0] sm:$0xff] }
  0xde   : > { %v1357_v13 = vpack.c.bf16 %v1277_v37, %v1275_v36  ;;  %v817_v45 = vcvt.s32.f32 %v689_v5  ;;  %v819_v46 = vcvt.s32.f32 %v691_v38  ;;  %v625_v53 = vunpack.c.0.s8 %v3768_v47 }
  0xdf   : > { %v1040_v54 = vmul.f32 %v3773_v49, %v818_v39  ;;  %v1042_v55 = vmul.f32 %v3773_v49, %v820_v40  ;;  %v756_v56 = vand.u32 255, %v628_v42  ;;  %v882_v57 = vcvt.s32.f32 %v754_v44 }
  0xe0   : > { %1439 = vmatpush1.bf16.msra.mxu1 %v1357_v13  ;;  %v1039_v58 = vmul.f32 %v3779_v51, %v817_v45  ;;  %v1041_v59 = vmul.f32 %v3779_v51, %v819_v46  ;;  %v627_v19 = vunpack.c.1.s8 %v3768_v47  ;;  %v753_v60 = vand.u32 255, %v625_v53 }
  0xe1   : > { %v1208_v0 = vadd.f32 %v3776_v50, %v1040_v54  ;;  %v1210_v1 = vadd.f32 %v3776_v50, %v1042_v55  ;;  %v884_v2 = vcvt.s32.f32 %v756_v56  ;;  %v1104_v3 = vmul.f32 %v3791_v61, %v882_v57 }
  0xe2   : > { %v1207_v6 = vadd.f32 %v3782_v52, %v1039_v58  ;;  %v1209_v7 = vadd.f32 %v3782_v52, %v1041_v59  ;;  %v755_v8 = vand.u32 255, %v627_v19  ;;  %v881_v9 = vcvt.s32.f32 %v753_v60 }
  0xe3   : > { %v1324_v11 = vpack.c.bf16 %v1210_v1, %v1208_v0  ;;  %v1106_v47 = vmul.f32 %v3791_v61, %v884_v2  ;;  %v1272_v12 = vadd.f32 %v3794_v62, %v1104_v3  ;;  %v3835_v17 = vand.u32 252645135, %v470_v63 }
  0xe4   : > { %v1323_v18 = vpack.c.bf16 %v1209_v7, %v1207_v6  ;;  %v883_v22 = vcvt.s32.f32 %v755_v8  ;;  %v1103_v23 = vmul.f32 %v3803_v15, %v881_v9  ;;  %v3838_v24 = vand.u32 252645135, %v469_v4 }
  0xe5   : > { %1397 = vmatprep.subr.bf16.mxu0 %v1324_v11  ;;  %v1274_v27 = vadd.f32 %v3794_v62, %v1106_v47  ;;  %v558_v28 = vunpack.c.2.s8 %v3835_v17  ;;  %v560_v29 = vunpack.c.3.s8 %v3835_v17  ;;  %v3844_v30 = vand.u32 4042322160, %v469_v4 }
  0xe6   : > { %1398 = vmatpush1.bf16.msra.mxu0 %v1323_v18  ;;  %v1105_v33 = vmul.f32 %v3803_v15, %v883_v22  ;;  %v1271_v36 = vadd.f32 %v3806_v16, %v1103_v23  ;;  %v557_v37 = vunpack.c.2.s8 %v3838_v24  ;;  %v559_v5 = vunpack.c.3.s8 %v3838_v24 }
  0xe7   : > { %v1356_v38 = vpack.c.bf16 %v1274_v27, %v1272_v12  ;;  %v686_v39 = vand.u32 255, %v558_v28  ;;  %v688_v40 = vand.u32 255, %v560_v29  ;;  %v3851_v42 = vand.u32 252645135, %v486_v25 }
  0xe8   : > { %v1273_v44 = vadd.f32 %v3806_v16, %v1105_v33  ;;  %v685_v13 = vand.u32 255, %v557_v37  ;;  %v687_v45 = vand.u32 255, %v559_v5  ;;  %v3854_v46 = vand.u32 252645135, %v485_v32 }
  0xe9   : > { %1440 = vmatprep.subr.bf16.mxu1 %v1356_v38  ;;  %v814_v53 = vcvt.s32.f32 %v686_v39  ;;  %v816_v54 = vcvt.s32.f32 %v688_v40  ;;  %v622_v55 = vunpack.c.2.s8 %v3851_v42  ;;  %v624_v56 = vunpack.c.3.s8 %v3851_v42 }
  0xea   : > { %v1355_v57 = vpack.c.bf16 %v1273_v44, %v1271_v36  ;;  %v813_v58 = vcvt.s32.f32 %v685_v13  ;;  %v815_v59 = vcvt.s32.f32 %v687_v45  ;;  %v621_v19 = vunpack.c.2.s8 %v3854_v46 }
  0xeb   : > { %v1036_v60 = vmul.f32 %v3773_v49, %v814_v53  ;;  %v1038_v63 = vmul.f32 %v3773_v49, %v816_v54  ;;  %v750_v0 = vand.u32 255, %v622_v55  ;;  %v752_v1 = vand.u32 255, %v624_v56 }
  0xec   : > { %1441 = vmatpush1.bf16.msra.mxu1 %v1355_v57  ;;  %v1035_v2 = vmul.f32 %v3779_v51, %v813_v58  ;;  %v1037_v3 = vmul.f32 %v3779_v51, %v815_v59  ;;  %v623_v4 = vunpack.c.3.s8 %v3854_v46  ;;  %v749_v6 = vand.u32 255, %v621_v19 }
  0xed   : > { %v1204_v7 = vadd.f32 %v3776_v50, %v1036_v60  ;;  %v1206_v8 = vadd.f32 %v3776_v50, %v1038_v63  ;;  %v878_v9 = vcvt.s32.f32 %v750_v0  ;;  %v880_v11 = vcvt.s32.f32 %v752_v1 }
  0xee   : > { %v1203_v47 = vadd.f32 %v3782_v52, %v1035_v2  ;;  %v1205_v12 = vadd.f32 %v3782_v52, %v1037_v3  ;;  %v751_v18 = vand.u32 255, %v623_v4  ;;  %v877_v22 = vcvt.s32.f32 %v749_v6 }
  0xef   : > { %v1322_v23 = vpack.c.bf16 %v1206_v8, %v1204_v7  ;;  %v1100_v25 = vmul.f32 %v3791_v61, %v878_v9  ;;  %v1102_v27 = vmul.f32 %v3791_v61, %v880_v11  ;;  %v3870_v28 = vand.u32 4042322160, %v485_v32 }
  0xf0   : > { %v1321_v29 = vpack.c.bf16 %v1205_v12, %v1203_v47  ;;  %v879_v33 = vcvt.s32.f32 %v751_v18  ;;  %v1099_v36 = vmul.f32 %v3803_v15, %v877_v22  ;;  %v554_v37 = vunpack.c.0.s8 %v3835_v17  ;;  %v467_v18 = vld [vmem:[%s3702_s30 + $0x10] sm:$0xff] }
  0xf1   : > { %1399 = vmatprep.subr.bf16.mxu0 %v1322_v23  ;;  %v1268_v5 = vadd.f32 %v3794_v62, %v1100_v25  ;;  %v1270_v38 = vadd.f32 %v3794_v62, %v1102_v27  ;;  %v556_v39 = vunpack.c.1.s8 %v3835_v17  ;;  %v553_v40 = vunpack.c.0.s8 %v3838_v24 }
  0xf2   : > { %1400 = vmatpush1.bf16.msra.mxu0 %v1321_v29  ;;  %v1101_v44 = vmul.f32 %v3803_v15, %v879_v33  ;;  %v1267_v32 = vadd.f32 %v3806_v16, %v1099_v36  ;;  %v682_v13 = vand.u32 255, %v554_v37  ;;  %v555_v45 = vunpack.c.1.s8 %v3838_v24 }
  0xf3   : > { %v1354_v53 = vpack.c.bf16 %v1270_v38, %v1268_v5  ;;  %v684_v54 = vand.u32 255, %v556_v39  ;;  %v681_v55 = vand.u32 255, %v553_v40  ;;  %v618_v56 = vunpack.c.0.s8 %v3851_v42 }
  0xf4   : > { %v1269_v57 = vadd.f32 %v3806_v16, %v1101_v44  ;;  %v810_v58 = vcvt.s32.f32 %v682_v13  ;;  %v683_v17 = vand.u32 255, %v555_v45  ;;  %v620_v59 = vunpack.c.1.s8 %v3851_v42  ;;  %v468_v42 = vld [vmem:[%s3702_s30 + $0x18] sm:$0xff] }
  0xf5   : > { %1442 = vmatprep.subr.bf16.mxu1 %v1354_v53  ;;  %v812_v19 = vcvt.s32.f32 %v684_v54  ;;  %v809_v60 = vcvt.s32.f32 %v681_v55  ;;  %v746_v63 = vand.u32 255, %v618_v56  ;;  %v617_v0 = vunpack.c.0.s8 %v3854_v46  ;;  %v484_v56 = vld [vmem:[%s3702_s30 + $0x98] sm:$0xff] }
  0xf6   : > { %v1353_v24 = vpack.c.bf16 %v1269_v57, %v1267_v32  ;;  %v1032_v1 = vmul.f32 %v3773_v49, %v810_v58  ;;  %v811_v2 = vcvt.s32.f32 %v683_v17  ;;  %v748_v3 = vand.u32 255, %v620_v59  ;;  %v483_v57 = vld [vmem:[%s3702_s30 + $0x90] sm:$0xff] }
  0xf7   : > { %v1034_v4 = vmul.f32 %v3773_v49, %v812_v19  ;;  %v1031_v6 = vmul.f32 %v3779_v51, %v809_v60  ;;  %v874_v7 = vcvt.s32.f32 %v746_v63  ;;  %v619_v8 = vunpack.c.1.s8 %v3854_v46 }
  0xf8   : > { %1443 = vmatpush1.bf16.msra.mxu1 %v1353_v24  ;;  %v1200_v9 = vadd.f32 %v3776_v50, %v1032_v1  ;;  %v1033_v11 = vmul.f32 %v3779_v51, %v811_v2  ;;  %v876_v47 = vcvt.s32.f32 %v748_v3  ;;  %v745_v12 = vand.u32 255, %v617_v0 }
  0xf9   : > { %v1202_v22 = vadd.f32 %v3776_v50, %v1034_v4  ;;  %v1199_v23 = vadd.f32 %v3782_v52, %v1031_v6  ;;  %v1096_v25 = vmul.f32 %v3791_v61, %v874_v7  ;;  %v747_v27 = vand.u32 255, %v619_v8 }
  0xfa   : > { %v1201_v29 = vadd.f32 %v3782_v52, %v1033_v11  ;;  %v1098_v46 = vmul.f32 %v3791_v61, %v876_v47  ;;  %v873_v33 = vcvt.s32.f32 %v745_v12  ;;  %v3898_v36 = vand.u32 252645135, %v468_v42 }
  0xfb   : > { %v1320_v37 = vpack.c.bf16 %v1202_v22, %v1200_v9  ;;  %v1264_v5 = vadd.f32 %v3794_v62, %v1096_v25  ;;  %v875_v38 = vcvt.s32.f32 %v747_v27  ;;  %v3901_v39 = vand.u32 252645135, %v467_v18 }
  0xfc   : > { %v1319_v40 = vpack.c.bf16 %v1201_v29, %v1199_v23  ;;  %v1266_v44 = vadd.f32 %v3794_v62, %v1098_v46  ;;  %v1095_v32 = vmul.f32 %v3803_v15, %v873_v33  ;;  %v550_v13 = vunpack.c.2.s8 %v3898_v36 }
  0xfd   : > { %1401 = vmatprep.subr.bf16.mxu0 %v1320_v37  ;;  %v1097_v45 = vmul.f32 %v3803_v15, %v875_v38  ;;  %v552_v53 = vunpack.c.3.s8 %v3898_v36  ;;  %v549_v54 = vunpack.c.2.s8 %v3901_v39  ;;  %v551_v55 = vunpack.c.3.s8 %v3901_v39 }
  0xfe   : > { %1402 = vmatpush1.bf16.msra.mxu0 %v1319_v40  ;;  %v1352_v58 = vpack.c.bf16 %v1266_v44, %v1264_v5  ;;  %v1263_v17 = vadd.f32 %v3806_v16, %v1095_v32  ;;  %v678_v59 = vand.u32 255, %v550_v13  ;;  %v3913_v19 = vand.u32 4042322160, %v467_v18 }
  0xff   : > { %v1265_v60 = vadd.f32 %v3806_v16, %v1097_v45  ;;  %v680_v63 = vand.u32 255, %v552_v53  ;;  %v677_v0 = vand.u32 255, %v549_v54  ;;  %v679_v24 = vand.u32 255, %v551_v55 }
 0x100   : > { %1444 = vmatprep.subr.bf16.mxu1 %v1352_v58  ;;  %v806_v1 = vcvt.s32.f32 %v678_v59  ;;  %v524_v2 = vand.u32 252645135, %v484_v56  ;;  %v3916_v3 = vand.u32 252645135, %v483_v57  ;;  %v3918_v4 = vand.u32 4042322160, %v483_v57 }
 0x101   : > { %v1351_v6 = vpack.c.bf16 %v1265_v60, %v1263_v17  ;;  %v808_v7 = vcvt.s32.f32 %v680_v63  ;;  %v805_v8 = vcvt.s32.f32 %v677_v0  ;;  %v807_v42 = vcvt.s32.f32 %v679_v24 }
 0x102   : > { %v1028_v9 = vmul.f32 %v3773_v49, %v806_v1  ;;  %v614_v11 = vunpack.c.2.s8 %v524_v2  ;;  %v616_v47 = vunpack.c.3.s8 %v524_v2  ;;  %v613_v12 = vunpack.c.2.s8 %v3916_v3 }
 0x103   : > { %1445 = vmatpush1.bf16.msra.mxu1 %v1351_v6  ;;  %v1030_v18 = vmul.f32 %v3773_v49, %v808_v7  ;;  %v1027_v22 = vmul.f32 %v3779_v51, %v805_v8  ;;  %v1029_v23 = vmul.f32 %v3779_v51, %v807_v42  ;;  %v615_v25 = vunpack.c.3.s8 %v3916_v3 }
 0x104   : > { %v1196_v27 = vadd.f32 %v3776_v50, %v1028_v9  ;;  %v742_v29 = vand.u32 255, %v614_v11  ;;  %v744_v46 = vand.u32 255, %v616_v47  ;;  %v741_v33 = vand.u32 255, %v613_v12 }
 0x105   : > { %v1198_v37 = vadd.f32 %v3776_v50, %v1030_v18  ;;  %v1195_v5 = vadd.f32 %v3782_v52, %v1027_v22  ;;  %v1197_v38 = vadd.f32 %v3782_v52, %v1029_v23  ;;  %v743_v40 = vand.u32 255, %v615_v25 }
 0x106   : > { %v870_v44 = vcvt.s32.f32 %v742_v29  ;;  %v872_v32 = vcvt.s32.f32 %v744_v46  ;;  %v869_v13 = vcvt.s32.f32 %v741_v33  ;;  %v546_v45 = vunpack.c.0.s8 %v3898_v36  ;;  %v466_v29 = vld [vmem:[%s3702_s30 + $0x8] sm:$0xff] }
 0x107   : > { %v1318_v53 = vpack.c.bf16 %v1198_v37, %v1196_v27  ;;  %v1317_v54 = vpack.c.bf16 %v1197_v38, %v1195_v5  ;;  %v871_v55 = vcvt.s32.f32 %v743_v40  ;;  %v548_v56 = vunpack.c.1.s8 %v3898_v36 }
 0x108   : > { %v1092_v57 = vmul.f32 %v3791_v61, %v870_v44  ;;  %v1094_v58 = vmul.f32 %v3791_v61, %v872_v32  ;;  %v1091_v17 = vmul.f32 %v3803_v15, %v869_v13  ;;  %v674_v59 = vand.u32 255, %v546_v45 }
 0x109   : > { %1403 = vmatprep.subr.bf16.mxu0 %v1318_v53  ;;  %v1093_v60 = vmul.f32 %v3803_v15, %v871_v55  ;;  %v676_v63 = vand.u32 255, %v548_v56  ;;  %v545_v0 = vunpack.c.0.s8 %v3901_v39  ;;  %v547_v24 = vunpack.c.1.s8 %v3901_v39 }
 0x10a   : > { %1404 = vmatpush1.bf16.msra.mxu0 %v1317_v54  ;;  %v1260_v1 = vadd.f32 %v3794_v62, %v1092_v57  ;;  %v1262_v36 = vadd.f32 %v3794_v62, %v1094_v58  ;;  %v1259_v6 = vadd.f32 %v3806_v16, %v1091_v17  ;;  %v802_v7 = vcvt.s32.f32 %v674_v59  ;;  %v465_v54 = vld [vmem:[%s3702_s30] sm:$0xff] }
 0x10b   : > { %v1261_v8 = vadd.f32 %v3806_v16, %v1093_v60  ;;  %v804_v42 = vcvt.s32.f32 %v676_v63  ;;  %v673_v9 = vand.u32 255, %v545_v0  ;;  %v675_v11 = vand.u32 255, %v547_v24  ;;  %v2953_v17 = vld [vmem:[%s3687_s1 + $0x4] ss:$16 sps:$4 sm:$0xff]  }
 0x10c   : > { %v1350_v47 = vpack.c.bf16 %v1262_v36, %v1260_v1  ;;  %v1024_v12 = vmul.f32 %v3773_v49, %v802_v7  ;;  %v610_v18 = vunpack.c.0.s8 %v524_v2  ;;  %v612_v22 = vunpack.c.1.s8 %v524_v2  ;;  %1427 = vmatprep.mubr.bf16.mxu0 %v2953_v17 }
 0x10d   : > { %v1349_v39 = vpack.c.bf16 %v1261_v8, %v1259_v6  ;;  %v1026_v23 = vmul.f32 %v3773_v49, %v804_v42  ;;  %v801_v25 = vcvt.s32.f32 %v673_v9  ;;  %v803_v27 = vcvt.s32.f32 %v675_v11 }
 0x10e   : > { %1446 = vmatprep.subr.bf16.mxu1 %v1350_v47  ;;  %v1192_v46 = vadd.f32 %v3776_v50, %v1024_v12  ;;  %v738_v33 = vand.u32 255, %v610_v18  ;;  %v740_v37 = vand.u32 255, %v612_v22  ;;  %v609_v5 = vunpack.c.0.s8 %v3916_v3  ;;  %v482_v18 = vld [vmem:[%s3702_s30 + $0x88] sm:$0xff]  ;;  %v481_v22 = vld [vmem:[%s3702_s30 + $0x80] sm:$0xff] }
 0x10f   : > { %1447 = vmatpush1.bf16.msra.mxu1 %v1349_v39  ;;  %v1194_v38 = vadd.f32 %v3776_v50, %v1026_v23  ;;  %v1023_v2 = vmul.f32 %v3779_v51, %v801_v25  ;;  %v1025_v40 = vmul.f32 %v3779_v51, %v803_v27  ;;  %v611_v44 = vunpack.c.1.s8 %v3916_v3 }
 0x110   : > { %v866_v32 = vcvt.s32.f32 %v738_v33  ;;  %v868_v13 = vcvt.s32.f32 %v740_v37  ;;  %v737_v45 = vand.u32 255, %v609_v5  ;;  %v3951_v53 = vand.u32 252645135, %v466_v29 }
 0x111   : > { %v1316_v55 = vpack.c.bf16 %v1194_v38, %v1192_v46  ;;  %v1191_v56 = vadd.f32 %v3782_v52, %v1023_v2  ;;  %v1193_v57 = vadd.f32 %v3782_v52, %v1025_v40  ;;  %v739_v58 = vand.u32 255, %v611_v44 }
 0x112   : > { %v1088_v59 = vmul.f32 %v3791_v61, %v866_v32  ;;  %v1090_v60 = vmul.f32 %v3791_v61, %v868_v13  ;;  %v865_v63 = vcvt.s32.f32 %v737_v45  ;;  %v542_v3 = vunpack.c.2.s8 %v3951_v53 }
 0x113   : > { %1405 = vmatprep.subr.bf16.mxu0 %v1316_v55  ;;  %v1315_v0 = vpack.c.bf16 %v1193_v57, %v1191_v56  ;;  %v867_v24 = vcvt.s32.f32 %v739_v58  ;;  %v544_v1 = vunpack.c.3.s8 %v3951_v53  ;;  %v3961_v36 = vand.u32 252645135, %v465_v54 }
 0x114   : > { %v1256_v6 = vadd.f32 %v3794_v62, %v1088_v59  ;;  %v1258_v7 = vadd.f32 %v3794_v62, %v1090_v60  ;;  %v1087_v8 = vmul.f32 %v3803_v15, %v865_v63  ;;  %v670_v42 = vand.u32 255, %v542_v3 }
 0x115   : > { %1406 = vmatpush1.bf16.msra.mxu0 %v1315_v0  ;;  %v1089_v9 = vmul.f32 %v3803_v15, %v867_v24  ;;  %v672_v11 = vand.u32 255, %v544_v1  ;;  %v541_v47 = vunpack.c.2.s8 %v3961_v36  ;;  %v543_v12 = vunpack.c.3.s8 %v3961_v36 }
 0x116   : > { %v1348_v39 = vpack.c.bf16 %v1258_v7, %v1256_v6  ;;  %v1255_v23 = vadd.f32 %v3806_v16, %v1087_v8  ;;  %v798_v25 = vcvt.s32.f32 %v670_v42  ;;  %v3972_v27 = vand.u32 4042322160, %v465_v54  ;;  %v2956_v54 = vld [vmem:[%s3687_s1 + $0xc] ss:$16 sps:$4 sm:$0xff]  }
 0x117   : > { %v1257_v29 = vadd.f32 %v3806_v16, %v1089_v9  ;;  %v800_v46 = vcvt.s32.f32 %v672_v11  ;;  %v669_v33 = vand.u32 255, %v541_v47  ;;  %v671_v37 = vand.u32 255, %v543_v12  ;;  %1470 = vmatprep.mubr.bf16.mxu1 %v2956_v54 }
 0x118   : > { %1448 = vmatprep.subr.bf16.mxu1 %v1348_v39  ;;  %v1020_v5 = vmul.f32 %v3773_v49, %v798_v25  ;;  %v3976_v38 = vand.u32 252645135, %v482_v18  ;;  %v3978_v2 = vand.u32 252645135, %v481_v22  ;;  %v3980_v40 = vand.u32 4042322160, %v481_v22 }
 0x119   : > { %v1347_v44 = vpack.c.bf16 %v1257_v29, %v1255_v23  ;;  %v1022_v32 = vmul.f32 %v3773_v49, %v800_v46  ;;  %v797_v13 = vcvt.s32.f32 %v669_v33  ;;  %v799_v45 = vcvt.s32.f32 %v671_v37 }
 0x11a   : > { %v1188_v55 = vadd.f32 %v3776_v50, %v1020_v5  ;;  %v606_v56 = vunpack.c.2.s8 %v3976_v38  ;;  %v608_v57 = vunpack.c.3.s8 %v3976_v38  ;;  %v605_v58 = vunpack.c.2.s8 %v3978_v2 }
 0x11b   : > { %1449 = vmatpush1.bf16.msra.mxu1 %v1347_v44  ;;  %v1190_v17 = vadd.f32 %v3776_v50, %v1022_v32  ;;  %v1019_v59 = vmul.f32 %v3779_v51, %v797_v13  ;;  %v1021_v60 = vmul.f32 %v3779_v51, %v799_v45  ;;  %v607_v63 = vunpack.c.3.s8 %v3978_v2 }
 0x11c   : > { %v734_v3 = vand.u32 255, %v606_v56  ;;  %v736_v0 = vand.u32 255, %v608_v57  ;;  %v733_v24 = vand.u32 255, %v605_v58  ;;  %v538_v1 = vunpack.c.0.s8 %v3951_v53 }
 0x11d   : > { %v1314_v6 = vpack.c.bf16 %v1190_v17, %v1188_v55  ;;  %v1187_v7 = vadd.f32 %v3782_v52, %v1019_v59  ;;  %v1189_v8 = vadd.f32 %v3782_v52, %v1021_v60  ;;  %v735_v42 = vand.u32 255, %v607_v63  ;;  %v480_v63 = vld [vmem:[%s3702_s30 + $0x78] sm:$0xff] }
 0x11e   : > { %v862_v9 = vcvt.s32.f32 %v734_v3  ;;  %v864_v11 = vcvt.s32.f32 %v736_v0  ;;  %v861_v47 = vcvt.s32.f32 %v733_v24  ;;  %v540_v12 = vunpack.c.1.s8 %v3951_v53 }
 0x11f   : > { %1407 = vmatprep.subr.bf16.mxu0 %v1314_v6  ;;  %v1313_v18 = vpack.c.bf16 %v1189_v8, %v1187_v7  ;;  %v863_v22 = vcvt.s32.f32 %v735_v42  ;;  %v666_v39 = vand.u32 255, %v538_v1  ;;  %v537_v23 = vunpack.c.0.s8 %v3961_v36 }
 0x120   : > { %v1084_v25 = vmul.f32 %v3791_v61, %v862_v9  ;;  %v1086_v29 = vmul.f32 %v3791_v61, %v864_v11  ;;  %v1083_v46 = vmul.f32 %v3803_v15, %v861_v47  ;;  %v668_v33 = vand.u32 255, %v540_v12 }
 0x121   : > { %1408 = vmatpush1.bf16.msra.mxu0 %v1313_v18  ;;  %v1085_v37 = vmul.f32 %v3803_v15, %v863_v22  ;;  %v794_v5 = vcvt.s32.f32 %v666_v39  ;;  %v539_v53 = vunpack.c.1.s8 %v3961_v36  ;;  %v665_v44 = vand.u32 255, %v537_v23 }
 0x122   : > { %v1252_v32 = vadd.f32 %v3794_v62, %v1084_v25  ;;  %v1254_v13 = vadd.f32 %v3794_v62, %v1086_v29  ;;  %v1251_v45 = vadd.f32 %v3806_v16, %v1083_v46  ;;  %v796_v54 = vcvt.s32.f32 %v668_v33 }
 0x123   : > { %v1253_v55 = vadd.f32 %v3806_v16, %v1085_v37  ;;  %v1016_v56 = vmul.f32 %v3773_v49, %v794_v5  ;;  %v667_v57 = vand.u32 255, %v539_v53  ;;  %v793_v58 = vcvt.s32.f32 %v665_v44  ;;  %v479_v53 = vld [vmem:[%s3702_s30 + $0x70] sm:$0xff] }
 0x124   : > { %v1346_v17 = vpack.c.bf16 %v1254_v13, %v1252_v32  ;;  %v1018_v59 = vmul.f32 %v3773_v49, %v796_v54  ;;  %v602_v60 = vunpack.c.0.s8 %v3976_v38  ;;  %v604_v36 = vunpack.c.1.s8 %v3976_v38 }
 0x125   : > { %v1345_v3 = vpack.c.bf16 %v1253_v55, %v1251_v45  ;;  %v1184_v0 = vadd.f32 %v3776_v50, %v1016_v56  ;;  %v795_v24 = vcvt.s32.f32 %v667_v57  ;;  %v1015_v1 = vmul.f32 %v3779_v51, %v793_v58  ;;  %v496_v58 = vld [vmem:[%s3702_s30 + $0xf8] sm:$0xff] }
 0x126   : > { %1450 = vmatprep.subr.bf16.mxu1 %v1346_v17  ;;  %v1186_v6 = vadd.f32 %v3776_v50, %v1018_v59  ;;  %v730_v7 = vand.u32 255, %v602_v60  ;;  %v732_v8 = vand.u32 255, %v604_v36  ;;  %v601_v42 = vunpack.c.0.s8 %v3978_v2 }
 0x127   : > { %1451 = vmatpush1.bf16.msra.mxu1 %v1345_v3  ;;  %v1017_v49 = vmul.f32 %v3779_v51, %v795_v24  ;;  %v1183_v9 = vadd.f32 %v3782_v52, %v1015_v1  ;;  %v603_v38 = vunpack.c.1.s8 %v3978_v2  ;;  %v4018_v11 = vand.u32 252645135, %v480_v63  ;;  %v495_v3 = vld [vmem:[%s3702_s30 + $0xf0] sm:$0xff] }
 0x128   : > { %v1312_v47 = vpack.c.bf16 %v1186_v6, %v1184_v0  ;;  %v858_v12 = vcvt.s32.f32 %v730_v7  ;;  %v860_v18 = vcvt.s32.f32 %v732_v8  ;;  %v729_v22 = vand.u32 255, %v601_v42 }
 0x129   : > { %v1185_v50 = vadd.f32 %v3782_v52, %v1017_v49  ;;  %v731_v39 = vand.u32 255, %v603_v38  ;;  %v598_v23 = vunpack.c.2.s8 %v4018_v11  ;;  %v600_v25 = vunpack.c.3.s8 %v4018_v11 }
 0x12a   : > { %1409 = vmatprep.subr.bf16.mxu0 %v1312_v47  ;;  %v1080_v51 = vmul.f32 %v3791_v61, %v858_v12  ;;  %v1082_v29 = vmul.f32 %v3791_v61, %v860_v18  ;;  %v857_v2 = vcvt.s32.f32 %v729_v22  ;;  %v945_v46 = vrot.slane %v931_v41, %v3747_v26 }
 0x12b   : > { %v1311_v33 = vpack.c.bf16 %v1185_v50, %v1183_v9  ;;  %v859_v37 = vcvt.s32.f32 %v731_v39  ;;  %v726_v5 = vand.u32 255, %v598_v23  ;;  %v728_v52 = vand.u32 255, %v600_v25 }
 0x12c   : > { %v1248_v44 = vadd.f32 %v3794_v62, %v1080_v51  ;;  %v1250_v32 = vadd.f32 %v3794_v62, %v1082_v29  ;;  %v1079_v13 = vmul.f32 %v3803_v15, %v857_v2  ;;  %v972_v61 = vrot.slane %v958_v43, %v3747_v26 }
 0x12d   : > { %1410 = vmatpush1.bf16.msra.mxu0 %v1311_v33  ;;  %v1081_v34 = vmul.f32 %v3803_v15, %v859_v37  ;;  %v854_v41 = vcvt.s32.f32 %v726_v5  ;;  %v856_v45 = vcvt.s32.f32 %v728_v52  ;;  %v4039_v54 = vrot.slane %v945_v46, %v3743_v21 }
 0x12e   : > { %v1344_v55 = vpack.c.bf16 %v1250_v32, %v1248_v44  ;;  %v1247_v56 = vadd.f32 %v3806_v16, %v1079_v13  ;;  %v4043_v62 = vrot.slane %v972_v61, %v3743_v21  ;;  %v4045_v57 = vand.u32 252645135, %v479_v53 }
 0x12f   : > { %v1249_v35 = vadd.f32 %v3806_v16, %v1081_v34  ;;  %v1076_v43 = vmul.f32 %v4039_v54, %v854_v41  ;;  %v1078_v15 = vmul.f32 %v4039_v54, %v856_v45  ;;  %v4052_v17 = vrot.slane %v945_v46, %v3741_v20 }
 0x130   : > { %1452 = vmatprep.subr.bf16.mxu1 %v1344_v55  ;;  %v597_v59 = vunpack.c.2.s8 %v4045_v57  ;;  %v599_v60 = vunpack.c.3.s8 %v4045_v57  ;;  %v4057_v36 = vrot.slane %v972_v61, %v3741_v20  ;;  %v4059_v63 = vand.u32 4042322160, %v479_v53 }
 0x131   : > { %v1343_v0 = vpack.c.bf16 %v1249_v35, %v1247_v56  ;;  %v1244_v16 = vadd.f32 %v4043_v62, %v1076_v43  ;;  %v1246_v24 = vadd.f32 %v4043_v62, %v1078_v15  ;;  %v4064_v1 = vand.u32 252645135, %v496_v58 }
 0x132   : > { %v725_v6 = vand.u32 255, %v597_v59  ;;  %v727_v7 = vand.u32 255, %v599_v60  ;;  %v947_v8 = vcombine.high %v945_v46, %v945_v46  ;;  %v974_v42 = vcombine.high %v972_v61, %v972_v61 }
 0x133   : > { %1453 = vmatpush1.bf16.msra.mxu1 %v1343_v0  ;;  %v1342_v49 = vpack.c.bf16 %v1246_v24, %v1244_v16  ;;  %v662_v9 = vunpack.c.2.s8 %v4064_v1  ;;  %v664_v38 = vunpack.c.3.s8 %v4064_v1  ;;  %v4068_v47 = vand.u32 252645135, %v495_v3 }
 0x134   : > { %v853_v12 = vcvt.s32.f32 %v725_v6  ;;  %v855_v18 = vcvt.s32.f32 %v727_v7  ;;  %v4071_v22 = vrot.slane %v947_v8, %v3743_v21  ;;  %v4074_v50 = vrot.slane %v974_v42, %v3743_v21 }
 0x135   : > { %1411 = vmatprep.subr.bf16.mxu0 %v1342_v49  ;;  %v790_v39 = vand.u32 255, %v662_v9  ;;  %v792_v23 = vand.u32 255, %v664_v38  ;;  %v661_v25 = vunpack.c.2.s8 %v4068_v47  ;;  %v663_v51 = vunpack.c.3.s8 %v4068_v47 }
 0x136   : > { %v1075_v29 = vmul.f32 %v4052_v17, %v853_v12  ;;  %v1077_v2 = vmul.f32 %v4052_v17, %v855_v18  ;;  %v4081_v46 = vrot.slane %v947_v8, %v3741_v20  ;;  %v4084_v33 = vrot.slane %v974_v42, %v3741_v20 }
 0x137   : > { %v918_v37 = vcvt.s32.f32 %v790_v39  ;;  %v920_v5 = vcvt.s32.f32 %v792_v23  ;;  %v789_v52 = vand.u32 255, %v661_v25  ;;  %v791_v53 = vand.u32 255, %v663_v51  ;;  %v478_v25 = vld [vmem:[%s3702_s30 + $0x68] sm:$0xff] }
 0x138   : > { %v1243_v44 = vadd.f32 %v4057_v36, %v1075_v29  ;;  %v1245_v32 = vadd.f32 %v4057_v36, %v1077_v2  ;;  %v4088_v13 = vand.u32 4042322160, %v495_v3  ;;  %v594_v61 = vunpack.c.0.s8 %v4018_v11 }
 0x139   : > { %v1140_v34 = vmul.f32 %v4071_v22, %v918_v37  ;;  %v1142_v41 = vmul.f32 %v4071_v22, %v920_v5  ;;  %v917_v45 = vcvt.s32.f32 %v789_v52  ;;  %v919_v55 = vcvt.s32.f32 %v791_v53 }
 0x13a   : > { %v1341_v56 = vpack.c.bf16 %v1245_v32, %v1243_v44  ;;  %v596_v58 = vunpack.c.1.s8 %v4018_v11  ;;  %v722_v35 = vand.u32 255, %v594_v61  ;;  %v593_v43 = vunpack.c.0.s8 %v4045_v57 }
 0x13b   : > { %v1308_v15 = vadd.f32 %v4074_v50, %v1140_v34  ;;  %v1310_v59 = vadd.f32 %v4074_v50, %v1142_v41  ;;  %v1139_v60 = vmul.f32 %v4081_v46, %v917_v45  ;;  %v1141_v3 = vmul.f32 %v4081_v46, %v919_v55 }
 0x13c   : > { %1412 = vmatpush2.bf16.msra.mxu0 %v1341_v56  ;;  %v724_v0 = vand.u32 255, %v596_v58  ;;  %v850_v16 = vcvt.s32.f32 %v722_v35  ;;  %v595_v24 = vunpack.c.1.s8 %v4045_v57  ;;  %v721_v6 = vand.u32 255, %v593_v43  ;;  %v477_v58 = vld [vmem:[%s3702_s30 + $0x60] sm:$0xff] }
 0x13d   : > { %v1374_v7 = vpack.c.bf16 %v1310_v59, %v1308_v15  ;;  %v1307_v11 = vadd.f32 %v4084_v33, %v1139_v60  ;;  %v1309_v8 = vadd.f32 %v4084_v33, %v1141_v3  ;;  %v658_v42 = vunpack.c.0.s8 %v4064_v1 }
 0x13e   : > { %v852_v49 = vcvt.s32.f32 %v724_v0  ;;  %v1072_v9 = vmul.f32 %v4039_v54, %v850_v16  ;;  %v723_v38 = vand.u32 255, %v595_v24  ;;  %v849_v12 = vcvt.s32.f32 %v721_v6 }
 0x13f   : > { %1454 = vmatprep.subr.bf16.mxu1 %v1374_v7  ;;  %v1373_v18 = vpack.c.bf16 %v1309_v8, %v1307_v11  ;;  %v660_v39 = vunpack.c.1.s8 %v4064_v1  ;;  %v786_v23 = vand.u32 255, %v658_v42  ;;  %v657_v57 = vunpack.c.0.s8 %v4068_v47  ;;  %v494_v11 = vld [vmem:[%s3702_s30 + $0xe8] sm:$0xff]  ;;  %v493_v8 = vld [vmem:[%s3702_s30 + $0xe0] sm:$0xff] }
 0x140   : > { %v1074_v51 = vmul.f32 %v4039_v54, %v852_v49  ;;  %v1240_v29 = vadd.f32 %v4043_v62, %v1072_v9  ;;  %v851_v2 = vcvt.s32.f32 %v723_v38  ;;  %v1071_v37 = vmul.f32 %v4052_v17, %v849_v12 }
 0x141   : > { %1455 = vmatpush2.bf16.msra.mxu1 %v1373_v18  ;;  %v788_v5 = vand.u32 255, %v660_v39  ;;  %v914_v52 = vcvt.s32.f32 %v786_v23  ;;  %v659_v53 = vunpack.c.1.s8 %v4068_v47  ;;  %v785_v44 = vand.u32 255, %v657_v57 }
 0x142   : > { %v1242_v1 = vadd.f32 %v4043_v62, %v1074_v51  ;;  %v1073_v32 = vmul.f32 %v4052_v17, %v851_v2  ;;  %v1239_v61 = vadd.f32 %v4057_v36, %v1071_v37  ;;  %v4114_v34 = vand.u32 252645135, %v478_v25 }
 0x143   : > { %v916_v41 = vcvt.s32.f32 %v788_v5  ;;  %v1136_v45 = vmul.f32 %v4071_v22, %v914_v52  ;;  %v787_v55 = vand.u32 255, %v659_v53  ;;  %v913_v56 = vcvt.s32.f32 %v785_v44 }
 0x144   : > { %v1340_v35 = vpack.c.bf16 %v1242_v1, %v1240_v29  ;;  %v1241_v47 = vadd.f32 %v4057_v36, %v1073_v32  ;;  %v590_v43 = vunpack.c.2.s8 %v4114_v34  ;;  %v592_v15 = vunpack.c.3.s8 %v4114_v34 }
 0x145   : > { %v1138_v59 = vmul.f32 %v4071_v22, %v916_v41  ;;  %v1304_v60 = vadd.f32 %v4074_v50, %v1136_v45  ;;  %v915_v3 = vcvt.s32.f32 %v787_v55  ;;  %v1135_v0 = vmul.f32 %v4081_v46, %v913_v56 }
 0x146   : > { %1413 = vmatprep.subr.bf16.mxu0 %v1340_v35  ;;  %v1339_v16 = vpack.c.bf16 %v1241_v47, %v1239_v61  ;;  %v718_v24 = vand.u32 255, %v590_v43  ;;  %v720_v6 = vand.u32 255, %v592_v15  ;;  %v4124_v7 = vand.u32 252645135, %v477_v58 }
 0x147   : > { %v1306_v42 = vadd.f32 %v4074_v50, %v1138_v59  ;;  %v1137_v49 = vmul.f32 %v4081_v46, %v915_v3  ;;  %v1303_v9 = vadd.f32 %v4084_v33, %v1135_v0  ;;  %v4131_v38 = vand.u32 4042322160, %v477_v58 }
 0x148   : > { %1414 = vmatpush2.bf16.msra.mxu0 %v1339_v16  ;;  %v846_v12 = vcvt.s32.f32 %v718_v24  ;;  %v848_v18 = vcvt.s32.f32 %v720_v6  ;;  %v589_v39 = vunpack.c.2.s8 %v4124_v7  ;;  %v591_v23 = vunpack.c.3.s8 %v4124_v7 }
 0x149   : > { %v1372_v57 = vpack.c.bf16 %v1306_v42, %v1304_v60  ;;  %v1305_v25 = vadd.f32 %v4084_v33, %v1137_v49  ;;  %v534_v51 = vand.u32 252645135, %v494_v11  ;;  %v4136_v29 = vand.u32 252645135, %v493_v8 }
 0x14a   : > { %v1068_v2 = vmul.f32 %v4039_v54, %v846_v12  ;;  %v1070_v37 = vmul.f32 %v4039_v54, %v848_v18  ;;  %v717_v5 = vand.u32 255, %v589_v39  ;;  %v719_v52 = vand.u32 255, %v591_v23 }
 0x14b   : > { %1456 = vmatprep.subr.bf16.mxu1 %v1372_v57  ;;  %v1371_v53 = vpack.c.bf16 %v1305_v25, %v1303_v9  ;;  %v654_v44 = vunpack.c.2.s8 %v534_v51  ;;  %v656_v1 = vunpack.c.3.s8 %v534_v51  ;;  %v653_v32 = vunpack.c.2.s8 %v4136_v29 }
 0x14c   : > { %v1236_v61 = vadd.f32 %v4043_v62, %v1068_v2  ;;  %v1238_v41 = vadd.f32 %v4043_v62, %v1070_v37  ;;  %v845_v45 = vcvt.s32.f32 %v717_v5  ;;  %v847_v55 = vcvt.s32.f32 %v719_v52 }
 0x14d   : > { %1457 = vmatpush2.bf16.msra.mxu1 %v1371_v53  ;;  %v782_v56 = vand.u32 255, %v654_v44  ;;  %v784_v58 = vand.u32 255, %v656_v1  ;;  %v655_v35 = vunpack.c.3.s8 %v4136_v29  ;;  %v781_v47 = vand.u32 255, %v653_v32 }
 0x14e   : > { %v1338_v43 = vpack.c.bf16 %v1238_v41, %v1236_v61  ;;  %v1067_v15 = vmul.f32 %v4052_v17, %v845_v45  ;;  %v1069_v59 = vmul.f32 %v4052_v17, %v847_v55  ;;  %v4146_v60 = vand.u32 4042322160, %v493_v8 }
 0x14f   : > { %v910_v3 = vcvt.s32.f32 %v782_v56  ;;  %v912_v0 = vcvt.s32.f32 %v784_v58  ;;  %v783_v16 = vand.u32 255, %v655_v35  ;;  %v909_v24 = vcvt.s32.f32 %v781_v47 }
 0x150   : > { %1415 = vmatprep.subr.bf16.mxu0 %v1338_v43  ;;  %v1235_v6 = vadd.f32 %v4057_v36, %v1067_v15  ;;  %v1237_v11 = vadd.f32 %v4057_v36, %v1069_v59  ;;  %v586_v42 = vunpack.c.0.s8 %v4114_v34  ;;  %v588_v49 = vunpack.c.1.s8 %v4114_v34 }
 0x151   : > { %v1132_v9 = vmul.f32 %v4071_v22, %v910_v3  ;;  %v1134_v12 = vmul.f32 %v4071_v22, %v912_v0  ;;  %v911_v18 = vcvt.s32.f32 %v783_v16  ;;  %v1131_v8 = vmul.f32 %v4081_v46, %v909_v24 }
 0x152   : > { %v1337_v39 = vpack.c.bf16 %v1237_v11, %v1235_v6  ;;  %v714_v23 = vand.u32 255, %v586_v42  ;;  %v716_v57 = vand.u32 255, %v588_v49  ;;  %v585_v25 = vunpack.c.0.s8 %v4124_v7  ;;  %v475_v49 = vld [vmem:[%s3702_s30 + $0x50] sm:$0xff] }
 0x153   : > { %v1300_v2 = vadd.f32 %v4074_v50, %v1132_v9  ;;  %v1302_v37 = vadd.f32 %v4074_v50, %v1134_v12  ;;  %v1133_v5 = vmul.f32 %v4081_v46, %v911_v18  ;;  %v1299_v34 = vadd.f32 %v4084_v33, %v1131_v8 }
 0x154   : > { %1416 = vmatpush2.bf16.msra.mxu0 %v1337_v39  ;;  %v842_v52 = vcvt.s32.f32 %v714_v23  ;;  %v844_v53 = vcvt.s32.f32 %v716_v57  ;;  %v587_v44 = vunpack.c.1.s8 %v4124_v7  ;;  %v713_v1 = vand.u32 255, %v585_v25  ;;  %v476_v7 = vld [vmem:[%s3702_s30 + $0x58] sm:$0xff] }
 0x155   : > { %v1370_v32 = vpack.c.bf16 %v1302_v37, %v1300_v2  ;;  %v1301_v61 = vadd.f32 %v4084_v33, %v1133_v5  ;;  %v650_v41 = vunpack.c.0.s8 %v534_v51  ;;  %v652_v45 = vunpack.c.1.s8 %v534_v51 }
 0x156   : > { %v1064_v55 = vmul.f32 %v4039_v54, %v842_v52  ;;  %v1066_v56 = vmul.f32 %v4039_v54, %v844_v53  ;;  %v715_v58 = vand.u32 255, %v587_v44  ;;  %v841_v35 = vcvt.s32.f32 %v713_v1 }
 0x157   : > { %1458 = vmatprep.subr.bf16.mxu1 %v1370_v32  ;;  %v1369_v47 = vpack.c.bf16 %v1301_v61, %v1299_v34  ;;  %v778_v43 = vand.u32 255, %v650_v41  ;;  %v780_v15 = vand.u32 255, %v652_v45  ;;  %v649_v59 = vunpack.c.0.s8 %v4136_v29  ;;  %v492_v45 = vld [vmem:[%s3702_s30 + $0xd8] sm:$0xff] }
 0x158   : > { %v1232_v3 = vadd.f32 %v4043_v62, %v1064_v55  ;;  %v1234_v0 = vadd.f32 %v4043_v62, %v1066_v56  ;;  %v843_v16 = vcvt.s32.f32 %v715_v58  ;;  %v1063_v51 = vmul.f32 %v4052_v17, %v841_v35  ;;  %v491_v55 = vld [vmem:[%s3702_s30 + $0xd0] sm:$0xff] }
 0x159   : > { %1459 = vmatpush2.bf16.msra.mxu1 %v1369_v47  ;;  %v906_v24 = vcvt.s32.f32 %v778_v43  ;;  %v908_v6 = vcvt.s32.f32 %v780_v15  ;;  %v651_v11 = vunpack.c.1.s8 %v4136_v29  ;;  %v777_v42 = vand.u32 255, %v649_v59 }
 0x15a   : > { %v1336_v9 = vpack.c.bf16 %v1234_v0, %v1232_v3  ;;  %v1065_v12 = vmul.f32 %v4052_v17, %v843_v16  ;;  %v1231_v18 = vadd.f32 %v4057_v36, %v1063_v51  ;;  %v4173_v8 = vand.u32 252645135, %v476_v7 }
 0x15b   : > { %v1128_v39 = vmul.f32 %v4071_v22, %v906_v24  ;;  %v1130_v23 = vmul.f32 %v4071_v22, %v908_v6  ;;  %v779_v57 = vand.u32 255, %v651_v11  ;;  %v905_v25 = vcvt.s32.f32 %v777_v42 }
 0x15c   : > { %1417 = vmatprep.subr.bf16.mxu0 %v1336_v9  ;;  %v1233_v29 = vadd.f32 %v4057_v36, %v1065_v12  ;;  %v582_v2 = vunpack.c.2.s8 %v4173_v8  ;;  %v584_v37 = vunpack.c.3.s8 %v4173_v8  ;;  %v4180_v5 = vand.u32 252645135, %v475_v49 }
 0x15d   : > { %v1296_v34 = vadd.f32 %v4074_v50, %v1128_v39  ;;  %v1298_v52 = vadd.f32 %v4074_v50, %v1130_v23  ;;  %v907_v53 = vcvt.s32.f32 %v779_v57  ;;  %v1127_v44 = vmul.f32 %v4081_v46, %v905_v25 }
 0x15e   : > { %v1335_v1 = vpack.c.bf16 %v1233_v29, %v1231_v18  ;;  %v710_v32 = vand.u32 255, %v582_v2  ;;  %v712_v61 = vand.u32 255, %v584_v37  ;;  %v581_v41 = vunpack.c.2.s8 %v4180_v5 }
 0x15f   : > { %v1368_v56 = vpack.c.bf16 %v1298_v52, %v1296_v34  ;;  %v1129_v58 = vmul.f32 %v4081_v46, %v907_v53  ;;  %v1295_v35 = vadd.f32 %v4084_v33, %v1127_v44  ;;  %v583_v47 = vunpack.c.3.s8 %v4180_v5 }
 0x160   : > { %1418 = vmatpush2.bf16.msra.mxu0 %v1335_v1  ;;  %v838_v43 = vcvt.s32.f32 %v710_v32  ;;  %v840_v15 = vcvt.s32.f32 %v712_v61  ;;  %v709_v59 = vand.u32 255, %v581_v41  ;;  %v4191_v7 = vand.u32 4042322160, %v475_v49 }
 0x161   : > { %1460 = vmatprep.subr.bf16.mxu1 %v1368_v56  ;;  %v1297_v3 = vadd.f32 %v4084_v33, %v1129_v58  ;;  %v711_v0 = vand.u32 255, %v583_v47  ;;  %v4194_v16 = vand.u32 252645135, %v492_v45  ;;  %v4196_v51 = vand.u32 252645135, %v491_v55 }
 0x162   : > { %v1060_v24 = vmul.f32 %v4039_v54, %v838_v43  ;;  %v1062_v6 = vmul.f32 %v4039_v54, %v840_v15  ;;  %v837_v11 = vcvt.s32.f32 %v709_v59  ;;  %v4200_v42 = vand.u32 4042322160, %v491_v55 }
 0x163   : > { %v1367_v9 = vpack.c.bf16 %v1297_v3, %v1295_v35  ;;  %v839_v12 = vcvt.s32.f32 %v711_v0  ;;  %v646_v49 = vunpack.c.2.s8 %v4194_v16  ;;  %v648_v18 = vunpack.c.3.s8 %v4194_v16 }
 0x164   : > { %v1228_v39 = vadd.f32 %v4043_v62, %v1060_v24  ;;  %v1230_v23 = vadd.f32 %v4043_v62, %v1062_v6  ;;  %v1059_v57 = vmul.f32 %v4052_v17, %v837_v11  ;;  %v645_v25 = vunpack.c.2.s8 %v4196_v51 }
 0x165   : > { %1461 = vmatpush2.bf16.msra.mxu1 %v1367_v9  ;;  %v1061_v29 = vmul.f32 %v4052_v17, %v839_v12  ;;  %v774_v2 = vand.u32 255, %v646_v49  ;;  %v776_v37 = vand.u32 255, %v648_v18  ;;  %v647_v34 = vunpack.c.3.s8 %v4196_v51 }
 0x166   : > { %v1334_v52 = vpack.c.bf16 %v1230_v23, %v1228_v39  ;;  %v1227_v53 = vadd.f32 %v4057_v36, %v1059_v57  ;;  %v773_v44 = vand.u32 255, %v645_v25  ;;  %v578_v1 = vunpack.c.0.s8 %v4173_v8 }
 0x167   : > { %v1229_v32 = vadd.f32 %v4057_v36, %v1061_v29  ;;  %v902_v61 = vcvt.s32.f32 %v774_v2  ;;  %v904_v41 = vcvt.s32.f32 %v776_v37  ;;  %v775_v45 = vand.u32 255, %v647_v34 }
 0x168   : > { %1419 = vmatprep.subr.bf16.mxu0 %v1334_v52  ;;  %v901_v55 = vcvt.s32.f32 %v773_v44  ;;  %v580_v56 = vunpack.c.1.s8 %v4173_v8  ;;  %v706_v58 = vand.u32 255, %v578_v1  ;;  %v577_v35 = vunpack.c.0.s8 %v4180_v5 }
 0x169   : > { %v1333_v47 = vpack.c.bf16 %v1229_v32, %v1227_v53  ;;  %v1124_v43 = vmul.f32 %v4071_v22, %v902_v61  ;;  %v1126_v15 = vmul.f32 %v4071_v22, %v904_v41  ;;  %v903_v59 = vcvt.s32.f32 %v775_v45  ;;  %v474_v53 = vld [vmem:[%s3702_s30 + $0x48] sm:$0xff] }
 0x16a   : > { %v1123_v3 = vmul.f32 %v4081_v46, %v901_v55  ;;  %v708_v0 = vand.u32 255, %v580_v56  ;;  %v834_v24 = vcvt.s32.f32 %v706_v58  ;;  %v579_v6 = vunpack.c.1.s8 %v4180_v5 }
 0x16b   : > { %1420 = vmatpush2.bf16.msra.mxu0 %v1333_v47  ;;  %v1292_v11 = vadd.f32 %v4074_v50, %v1124_v43  ;;  %v1294_v8 = vadd.f32 %v4074_v50, %v1126_v15  ;;  %v1125_v9 = vmul.f32 %v4081_v46, %v903_v59  ;;  %v705_v12 = vand.u32 255, %v577_v35  ;;  %v473_v43 = vld [vmem:[%s3702_s30 + $0x40] sm:$0xff] }
 0x16c   : > { %v1291_v49 = vadd.f32 %v4084_v33, %v1123_v3  ;;  %v836_v18 = vcvt.s32.f32 %v708_v0  ;;  %v1056_v39 = vmul.f32 %v4039_v54, %v834_v24  ;;  %v707_v23 = vand.u32 255, %v579_v6 }
 0x16d   : > { %v1366_v57 = vpack.c.bf16 %v1294_v8, %v1292_v11  ;;  %v1293_v25 = vadd.f32 %v4084_v33, %v1125_v9  ;;  %v833_v29 = vcvt.s32.f32 %v705_v12  ;;  %v642_v5 = vunpack.c.0.s8 %v4194_v16 }
 0x16e   : > { %v1058_v2 = vmul.f32 %v4039_v54, %v836_v18  ;;  %v1224_v37 = vadd.f32 %v4043_v62, %v1056_v39  ;;  %v835_v34 = vcvt.s32.f32 %v707_v23  ;;  %v644_v52 = vunpack.c.1.s8 %v4194_v16 }
 0x16f   : > { %1462 = vmatprep.subr.bf16.mxu1 %v1366_v57  ;;  %v1365_v44 = vpack.c.bf16 %v1293_v25, %v1291_v49  ;;  %v1055_v1 = vmul.f32 %v4052_v17, %v833_v29  ;;  %v770_v32 = vand.u32 255, %v642_v5  ;;  %v641_v61 = vunpack.c.0.s8 %v4196_v51 }
 0x170   : > { %v1226_v41 = vadd.f32 %v4043_v62, %v1058_v2  ;;  %v1057_v45 = vmul.f32 %v4052_v17, %v835_v34  ;;  %v772_v55 = vand.u32 255, %v644_v52  ;;  %v643_v56 = vunpack.c.1.s8 %v4196_v51  ;;  %v489_v34 = vld [vmem:[%s3702_s30 + $0xc0] sm:$0xff] }
 0x171   : > { %1463 = vmatpush2.bf16.msra.mxu1 %v1365_v44  ;;  %v1223_v58 = vadd.f32 %v4057_v36, %v1055_v1  ;;  %v898_v16 = vcvt.s32.f32 %v770_v32  ;;  %v769_v35 = vand.u32 255, %v641_v61  ;;  %v4236_v47 = vand.u32 252645135, %v474_v53 }
 0x172   : > { %v1332_v15 = vpack.c.bf16 %v1226_v41, %v1224_v37  ;;  %v1225_v59 = vadd.f32 %v4057_v36, %v1057_v45  ;;  %v900_v3 = vcvt.s32.f32 %v772_v55  ;;  %v771_v0 = vand.u32 255, %v643_v56  ;;  %v490_v37 = vld [vmem:[%s3702_s30 + $0xc8] sm:$0xff] }
 0x173   : > { %v1120_v24 = vmul.f32 %v4071_v22, %v898_v16  ;;  %v897_v6 = vcvt.s32.f32 %v769_v35  ;;  %v574_v11 = vunpack.c.2.s8 %v4236_v47  ;;  %v576_v51 = vunpack.c.3.s8 %v4236_v47 }
 0x174   : > { %1421 = vmatprep.subr.bf16.mxu0 %v1332_v15  ;;  %v1331_v8 = vpack.c.bf16 %v1225_v59, %v1223_v58  ;;  %v1122_v9 = vmul.f32 %v4071_v22, %v900_v3  ;;  %v899_v12 = vcvt.s32.f32 %v771_v0  ;;  %v4244_v49 = vand.u32 252645135, %v473_v43 }
 0x175   : > { %v1288_v18 = vadd.f32 %v4074_v50, %v1120_v24  ;;  %v1119_v39 = vmul.f32 %v4081_v46, %v897_v6  ;;  %v702_v23 = vand.u32 255, %v574_v11  ;;  %v704_v57 = vand.u32 255, %v576_v51 }
 0x176   : > { %1422 = vmatpush2.bf16.msra.mxu0 %v1331_v8  ;;  %v1290_v25 = vadd.f32 %v4074_v50, %v1122_v9  ;;  %v1121_v29 = vmul.f32 %v4081_v46, %v899_v12  ;;  %v573_v5 = vunpack.c.2.s8 %v4244_v49  ;;  %v575_v2 = vunpack.c.3.s8 %v4244_v49 }
 0x177   : > { %v1287_v52 = vadd.f32 %v4084_v33, %v1119_v39  ;;  %v830_v53 = vcvt.s32.f32 %v702_v23  ;;  %v832_v44 = vcvt.s32.f32 %v704_v57  ;;  %v4255_v1 = vand.u32 4042322160, %v473_v43 }
 0x178   : > { %v1364_v32 = vpack.c.bf16 %v1290_v25, %v1288_v18  ;;  %v1289_v61 = vadd.f32 %v4084_v33, %v1121_v29  ;;  %v701_v41 = vand.u32 255, %v573_v5  ;;  %v703_v45 = vand.u32 255, %v575_v2 }
 0x179   : > { %v1052_v55 = vmul.f32 %v4039_v54, %v830_v53  ;;  %v1054_v56 = vmul.f32 %v4039_v54, %v832_v44  ;;  %v4260_v58 = vand.u32 252645135, %v490_v37  ;;  %v4262_v16 = vand.u32 252645135, %v489_v34 }
 0x17a   : > { %1464 = vmatprep.subr.bf16.mxu1 %v1364_v32  ;;  %v1363_v35 = vpack.c.bf16 %v1289_v61, %v1287_v52  ;;  %v829_v15 = vcvt.s32.f32 %v701_v41  ;;  %v831_v59 = vcvt.s32.f32 %v703_v45  ;;  %v4264_v3 = vand.u32 4042322160, %v489_v34 }
 0x17b   : > { %v1220_v43 = vadd.f32 %v4043_v62, %v1052_v55  ;;  %v1222_v0 = vadd.f32 %v4043_v62, %v1054_v56  ;;  %v638_v24 = vunpack.c.2.s8 %v4260_v58  ;;  %v640_v6 = vunpack.c.3.s8 %v4260_v58 }
 0x17c   : > { %1465 = vmatpush2.bf16.msra.mxu1 %v1363_v35  ;;  %v1051_v11 = vmul.f32 %v4052_v17, %v829_v15  ;;  %v1053_v51 = vmul.f32 %v4052_v17, %v831_v59  ;;  %v637_v8 = vunpack.c.2.s8 %v4262_v16  ;;  %v639_v9 = vunpack.c.3.s8 %v4262_v16 }
 0x17d   : > { %v1330_v12 = vpack.c.bf16 %v1222_v0, %v1220_v43  ;;  %v766_v18 = vand.u32 255, %v638_v24  ;;  %v768_v39 = vand.u32 255, %v640_v6  ;;  %v570_v23 = vunpack.c.0.s8 %v4236_v47 }
 0x17e   : > { %v1219_v57 = vadd.f32 %v4057_v36, %v1051_v11  ;;  %v1221_v25 = vadd.f32 %v4057_v36, %v1053_v51  ;;  %v765_v29 = vand.u32 255, %v637_v8  ;;  %v767_v5 = vand.u32 255, %v639_v9 }
 0x17f   : > { %1423 = vmatprep.subr.bf16.mxu0 %v1330_v12  ;;  %v894_v2 = vcvt.s32.f32 %v766_v18  ;;  %v896_v37 = vcvt.s32.f32 %v768_v39  ;;  %v572_v34 = vunpack.c.1.s8 %v4236_v47  ;;  %v698_v52 = vand.u32 255, %v570_v23 }
 0x180   : > { %v1329_v53 = vpack.c.bf16 %v1221_v25, %v1219_v57  ;;  %v893_v44 = vcvt.s32.f32 %v765_v29  ;;  %v895_v32 = vcvt.s32.f32 %v767_v5  ;;  %v569_v61 = vunpack.c.0.s8 %v4244_v49 }
 0x181   : > { %v1116_v41 = vmul.f32 %v4071_v22, %v894_v2  ;;  %v1118_v45 = vmul.f32 %v4071_v22, %v896_v37  ;;  %v700_v55 = vand.u32 255, %v572_v34  ;;  %v826_v56 = vcvt.s32.f32 %v698_v52 }
 0x182   : > { %1424 = vmatpush2.bf16.msra.mxu0 %v1329_v53  ;;  %v1115_v35 = vmul.f32 %v4081_v46, %v893_v44  ;;  %v1117_v15 = vmul.f32 %v4081_v46, %v895_v32  ;;  %v571_v59 = vunpack.c.1.s8 %v4244_v49  ;;  %v697_v47 = vand.u32 255, %v569_v61  ;;  %v2749_v32 = vld [vmem:[%s388_s19 + $0x4] sm:$0xf] }
 0x183   : > { %v1284_v43 = vadd.f32 %v4074_v50, %v1116_v41  ;;  %v1286_v0 = vadd.f32 %v4074_v50, %v1118_v45  ;;  %v828_v24 = vcvt.s32.f32 %v700_v55  ;;  %v1048_v6 = vmul.f32 %v4039_v54, %v826_v56 }
 0x184   : > { %v1283_v11 = vadd.f32 %v4084_v33, %v1115_v35  ;;  %v1285_v51 = vadd.f32 %v4084_v33, %v1117_v15  ;;  %v699_v8 = vand.u32 255, %v571_v59  ;;  %v825_v9 = vcvt.s32.f32 %v697_v47  ;;  %v2750_v47 = vld [vmem:[%s397_s13 + $0x4] sm:$0xf] }
 0x185   : > { %v1362_v12 = vpack.c.bf16 %v1286_v0, %v1284_v43  ;;  %v1050_v18 = vmul.f32 %v4039_v54, %v828_v24  ;;  %v1216_v39 = vadd.f32 %v4043_v62, %v1048_v6  ;;  %v634_v49 = vunpack.c.0.s8 %v4260_v58 }
 0x186   : > { %v1361_v23 = vpack.c.bf16 %v1285_v51, %v1283_v11  ;;  %v827_v57 = vcvt.s32.f32 %v699_v8  ;;  %v1047_v25 = vmul.f32 %v4052_v17, %v825_v9  ;;  %v636_v29 = vunpack.c.1.s8 %v4260_v58 }
 0x187   : > { %1466 = vmatprep.subr.bf16.mxu1 %v1362_v12  ;;  %v1218_v5 = vadd.f32 %v4043_v62, %v1050_v18  ;;  %v762_v2 = vand.u32 255, %v634_v49  ;;  %v633_v37 = vunpack.c.0.s8 %v4262_v16  ;;  %v635_v34 = vunpack.c.1.s8 %v4262_v16 }
 0x188   : > { %1467 = vmatpush2.bf16.msra.mxu1 %v1361_v23  ;;  %v1049_v54 = vmul.f32 %v4052_v17, %v827_v57  ;;  %v1215_v52 = vadd.f32 %v4057_v36, %v1047_v25  ;;  %v764_v53 = vand.u32 255, %v636_v29  ;;  %v1558_v44 = vunpack.c.2.s8 %v3730_v10 }
 0x189   : > { %v1328_v58 = vpack.c.bf16 %v1218_v5, %v1216_v39  ;;  %v890_v61 = vcvt.s32.f32 %v762_v2  ;;  %v761_v41 = vand.u32 255, %v633_v37  ;;  %v763_v62 = vand.u32 255, %v635_v34 }
 0x18a   : > { %v1217_v45 = vadd.f32 %v4057_v36, %v1049_v54  ;;  %v892_v55 = vcvt.s32.f32 %v764_v53  ;;  %v1560_v16 = vunpack.c.3.s8 %v3730_v10  ;;  %v1686_v56 = vand.u32 255, %v1558_v44  ;;  %v2951_v36 = vld [vmem:[%s3687_s1] ss:$16 sps:$4 sm:$0xff]  }
 0x18b   : > { %1425 = vmatprep.subr.bf16.mxu0 %v1328_v58  ;;  %v1112_v17 = vmul.f32 %v4071_v22, %v890_v61  ;;  %v889_v35 = vcvt.s32.f32 %v761_v41  ;;  %v891_v15 = vcvt.s32.f32 %v763_v62  ;;  %v1915_v59 = vunpack.c.l.bf16 %v2749_v32 }
 0x18c   : > { %v1327_v43 = vpack.c.bf16 %v1217_v45, %v1215_v52  ;;  %v1114_v0 = vmul.f32 %v4071_v22, %v892_v55  ;;  %v1688_v24 = vand.u32 255, %v1560_v16  ;;  %v1814_v6 = vcvt.s32.f32 %v1686_v56  ;;  %v2954_v52 = vld [vmem:[%s3687_s1 + $0x8] ss:$16 sps:$4 sm:$0xff]  }
 0x18d   : > { %v1280_v11 = vadd.f32 %v4074_v50, %v1112_v17  ;;  %v1111_v51 = vmul.f32 %v4081_v46, %v889_v35  ;;  %v1113_v8 = vmul.f32 %v4081_v46, %v891_v15  ;;  %v4313_v9 = vrot.slane %v1915_v59, %v3747_v26 }
 0x18e   : > { %1426 = vmatpush2.bf16.msra.mxu0 %v1327_v43  ;;  %v1282_v12 = vadd.f32 %v4074_v50, %v1114_v0  ;;  %v1816_v18 = vcvt.s32.f32 %v1688_v24  ;;  %v1943_v39 = vunpack.c.l.bf16 %v2750_v47  ;;  %v1557_v49 = vunpack.c.2.s8 %v3734_v14 }
 0x18f   : > { %v1279_v22 = vadd.f32 %v4084_v33, %v1111_v51  ;;  %v1281_v23 = vadd.f32 %v4084_v33, %v1113_v8  ;;  %v1931_v57 = vrot.slane %v4313_v9, %v3747_v26  ;;  %v1559_v46 = vunpack.c.3.s8 %v3734_v14 }
 0x190   : > { %v1360_v25 = vpack.c.bf16 %v1282_v12, %v1280_v11  ;;  %v4323_v29 = vrot.slane %v1943_v39, %v3747_v26  ;;  %v1685_v5 = vand.u32 255, %v1557_v49  ;;  %v1622_v50 = vunpack.c.2.s8 %v3751_v31 }
 0x191   : > { %v1359_v2 = vpack.c.bf16 %v1281_v23, %v1279_v22  ;;  %1428 = vmatmul.mubr.bf16.vlgmr.msra.gmra.mxu0 %v2951_v36  ;;  %v4327_v37 = vrot.slane %v1931_v57, %v3743_v21  ;;  %v1687_v34 = vand.u32 255, %v1559_v46  ;;  %v4330_v33 = vrot.slane %v1931_v57, %v3741_v20 }
 0x192   : > { %1468 = vmatprep.subr.bf16.mxu1 %v1360_v25  ;;  %v1959_v54 = vrot.slane %v4323_v29, %v3747_v26  ;;  %v1813_v53 = vcvt.s32.f32 %v1685_v5  ;;  %v1624_v44 = vunpack.c.3.s8 %v3751_v31  ;;  %v1750_v32 = vand.u32 255, %v1622_v50 }
 0x193   : > { %1469 = vmatpush2.bf16.msra.mxu1 %v1359_v2  ;;  %v2038_v58 = vmul.f32 %v4327_v37, %v1814_v6  ;;  %v2040_v61 = vmul.f32 %v4327_v37, %v1816_v18  ;;  %v1815_v41 = vcvt.s32.f32 %v1687_v34  ;;  %v1939_v62 = vcombine.high %v1931_v57, %v1931_v57 }
 0x194   : > { %v4339_v45 = vrot.slane %v1959_v54, %v3743_v21  ;;  %v2037_v55 = vmul.f32 %v4330_v33, %v1813_v53  ;;  %v4343_v16 = vrot.slane %v1959_v54, %v3741_v20  ;;  %v1752_v56 = vand.u32 255, %v1624_v44 }
 0x195   : > { %v2039_v17 = vmul.f32 %v4330_v33, %v1815_v41  ;;  %v1878_v35 = vcvt.s32.f32 %v1750_v32  ;;  %v1967_v15 = vcombine.high %v1959_v54, %v1959_v54  ;;  %v4347_v59 = vrot.slane %v1939_v62, %v3743_v21 }
 0x196   : > { %v2206_v47 = vadd.f32 %v4339_v45, %v2038_v58  ;;  %v2208_v43 = vadd.f32 %v4339_v45, %v2040_v61  ;;  %v2205_v0 = vadd.f32 %v4343_v16, %v2037_v55  ;;  %1471 = vmatmul.mubr.bf16.vlgmr.msra.gmra.mxu1 %v2954_v52  ;;  %v1880_v24 = vcvt.s32.f32 %v1752_v56 }
 0x197   : > { %v2207_v6 = vadd.f32 %v4343_v16, %v2039_v17  ;;  %v2102_v11 = vmul.f32 %v4347_v59, %v1878_v35  ;;  %v4355_v36 = vrot.slane %v1967_v15, %v3743_v21  ;;  %v1621_v51 = vunpack.c.2.s8 %v3770_v48 }
 0x198   : > { %v2320_v8 = vpack.c.bf16 %v2208_v43, %v2206_v47  ;;  %v2104_v12 = vmul.f32 %v4347_v59, %v1880_v24  ;;  %v1623_v18 = vunpack.c.3.s8 %v3770_v48  ;;  %v4361_v39 = vrot.slane %v1939_v62, %v3741_v20 }
 0x199   : > { %v2319_v49 = vpack.c.bf16 %v2207_v6, %v2205_v0  ;;  %v2270_v22 = vadd.f32 %v4355_v36, %v2102_v11  ;;  %v1749_v23 = vand.u32 255, %v1621_v51  ;;  %v4365_v57 = vrot.slane %v1967_v15, %v3741_v20 }
 0x19a   : > { %2389 = vmatprep.subr.bf16.mxu0 %v2320_v8  ;;  %v2272_v46 = vadd.f32 %v4355_v36, %v2104_v12  ;;  %v1751_v25 = vand.u32 255, %v1623_v18  ;;  %v1554_v5 = vunpack.c.0.s8 %v3730_v10  ;;  %v1556_v50 = vunpack.c.1.s8 %v3730_v10 }
 0x19b   : > { %2390 = vmatpush1.bf16.msra.mxu0 %v2319_v49  ;;  %v1877_v2 = vcvt.s32.f32 %v1749_v23  ;;  %v1553_v34 = vunpack.c.0.s8 %v3734_v14  ;;  %v1555_v54 = vunpack.c.1.s8 %v3734_v14  ;;  %v1618_v52 = vunpack.c.0.s8 %v3751_v31 }
 0x19c   : > { %v2352_v53 = vpack.c.bf16 %v2272_v46, %v2270_v22  ;;  %v1879_v44 = vcvt.s32.f32 %v1751_v25  ;;  %v1682_v32 = vand.u32 255, %v1554_v5  ;;  %v1684_v58 = vand.u32 255, %v1556_v50 }
 0x19d   : > { %v2101_v61 = vmul.f32 %v4361_v39, %v1877_v2  ;;  %v1681_v41 = vand.u32 255, %v1553_v34  ;;  %v1683_v62 = vand.u32 255, %v1555_v54  ;;  %v1620_v55 = vunpack.c.1.s8 %v3751_v31 }
 0x19e   : > { %2432 = vmatprep.subr.bf16.mxu1 %v2352_v53  ;;  %v2103_v10 = vmul.f32 %v4361_v39, %v1879_v44  ;;  %v1810_v56 = vcvt.s32.f32 %v1682_v32  ;;  %v1812_v17 = vcvt.s32.f32 %v1684_v58  ;;  %v1746_v35 = vand.u32 255, %v1618_v52  ;;  %v2963_v52 = vld [vmem:[%s3702_s30 + $0x28] sm:$0xff] }
 0x19f   : > { %v2269_v14 = vadd.f32 %v4365_v57, %v2101_v61  ;;  %v1809_v15 = vcvt.s32.f32 %v1681_v41  ;;  %v1811_v47 = vcvt.s32.f32 %v1683_v62  ;;  %v1748_v43 = vand.u32 255, %v1620_v55 }
 0x1a0   : > { %v2271_v0 = vadd.f32 %v4365_v57, %v2103_v10  ;;  %v2034_v24 = vmul.f32 %v4327_v37, %v1810_v56  ;;  %v2036_v6 = vmul.f32 %v4327_v37, %v1812_v17  ;;  %v1874_v11 = vcvt.s32.f32 %v1746_v35  ;;  %v2964_v35 = vld [vmem:[%s3702_s30 + $0xa8] sm:$0xff] }
 0x1a1   : > { %v2033_v31 = vmul.f32 %v4330_v33, %v1809_v15  ;;  %v2035_v51 = vmul.f32 %v4330_v33, %v1811_v47  ;;  %v1876_v8 = vcvt.s32.f32 %v1748_v43  ;;  %v1617_v12 = vunpack.c.0.s8 %v3770_v48 }
 0x1a2   : > { %v2351_v18 = vpack.c.bf16 %v2271_v0, %v2269_v14  ;;  %v2202_v49 = vadd.f32 %v4339_v45, %v2034_v24  ;;  %v2204_v22 = vadd.f32 %v4339_v45, %v2036_v6  ;;  %v2098_v23 = vmul.f32 %v4347_v59, %v1874_v11 }
 0x1a3   : > { %v2201_v46 = vadd.f32 %v4343_v16, %v2033_v31  ;;  %v2203_v25 = vadd.f32 %v4343_v16, %v2035_v51  ;;  %v2100_v5 = vmul.f32 %v4347_v59, %v1876_v8  ;;  %v1619_v50 = vunpack.c.1.s8 %v3770_v48 }
 0x1a4   : > { %2433 = vmatpush1.bf16.msra.mxu1 %v2351_v18  ;;  %v2318_v2 = vpack.c.bf16 %v2204_v22, %v2202_v49  ;;  %v2266_v34 = vadd.f32 %v4355_v36, %v2098_v23  ;;  %v1745_v54 = vand.u32 255, %v1617_v12  ;;  %v1502_v53 = vand.u32 4042322160, %v2963_v52 }
 0x1a5   : > { %v2317_v44 = vpack.c.bf16 %v2203_v25, %v2201_v46  ;;  %v2268_v32 = vadd.f32 %v4355_v36, %v2100_v5  ;;  %v1747_v58 = vand.u32 255, %v1619_v50  ;;  %v1549_v61 = vunpack.c.2.s8 %v3844_v30 }
 0x1a6   : > { %2391 = vmatprep.subr.bf16.mxu0 %v2318_v2  ;;  %v1873_v41 = vcvt.s32.f32 %v1745_v54  ;;  %v1550_v62 = vunpack.c.2.s8 %v1502_v53  ;;  %v1552_v55 = vunpack.c.3.s8 %v1502_v53  ;;  %v1551_v48 = vunpack.c.3.s8 %v3844_v30 }
 0x1a7   : > { %2392 = vmatpush1.bf16.msra.mxu0 %v2317_v44  ;;  %v2350_v10 = vpack.c.bf16 %v2268_v32, %v2266_v34  ;;  %v1875_v56 = vcvt.s32.f32 %v1747_v58  ;;  %v1677_v17 = vand.u32 255, %v1549_v61  ;;  %v4396_v14 = vand.u32 4042322160, %v2964_v35 }
 0x1a8   : > { %v2097_v15 = vmul.f32 %v4361_v39, %v1873_v41  ;;  %v1678_v47 = vand.u32 255, %v1550_v62  ;;  %v1680_v43 = vand.u32 255, %v1552_v55  ;;  %v1679_v0 = vand.u32 255, %v1551_v48 }
 0x1a9   : > { %2434 = vmatprep.subr.bf16.mxu1 %v2350_v10  ;;  %v2099_v24 = vmul.f32 %v4361_v39, %v1875_v56  ;;  %v1805_v6 = vcvt.s32.f32 %v1677_v17  ;;  %v1614_v11 = vunpack.c.2.s8 %v4396_v14  ;;  %v1616_v31 = vunpack.c.3.s8 %v4396_v14 }
 0x1aa   : > { %v2265_v51 = vadd.f32 %v4365_v57, %v2097_v15  ;;  %v1806_v8 = vcvt.s32.f32 %v1678_v47  ;;  %v1808_v12 = vcvt.s32.f32 %v1680_v43  ;;  %v1807_v18 = vcvt.s32.f32 %v1679_v0 }
 0x1ab   : > { %v2267_v49 = vadd.f32 %v4365_v57, %v2099_v24  ;;  %v2029_v22 = vmul.f32 %v4330_v33, %v1805_v6  ;;  %v1742_v23 = vand.u32 255, %v1614_v11  ;;  %v1744_v46 = vand.u32 255, %v1616_v31 }
 0x1ac   : > { %v2030_v25 = vmul.f32 %v4327_v37, %v1806_v8  ;;  %v2032_v5 = vmul.f32 %v4327_v37, %v1808_v12  ;;  %v2031_v50 = vmul.f32 %v4330_v33, %v1807_v18  ;;  %v1613_v2 = vunpack.c.2.s8 %v3870_v28 }
 0x1ad   : > { %v2349_v34 = vpack.c.bf16 %v2267_v49, %v2265_v51  ;;  %v2197_v54 = vadd.f32 %v4343_v16, %v2029_v22  ;;  %v1870_v52 = vcvt.s32.f32 %v1742_v23  ;;  %v1872_v44 = vcvt.s32.f32 %v1744_v46 }
 0x1ae   : > { %v2198_v32 = vadd.f32 %v4339_v45, %v2030_v25  ;;  %v2200_v58 = vadd.f32 %v4339_v45, %v2032_v5  ;;  %v2199_v61 = vadd.f32 %v4343_v16, %v2031_v50  ;;  %v1615_v41 = vunpack.c.3.s8 %v3870_v28 }
 0x1af   : > { %2435 = vmatpush1.bf16.msra.mxu1 %v2349_v34  ;;  %v2094_v62 = vmul.f32 %v4347_v59, %v1870_v52  ;;  %v2096_v55 = vmul.f32 %v4347_v59, %v1872_v44  ;;  %v1741_v48 = vand.u32 255, %v1613_v2  ;;  %v1546_v10 = vunpack.c.0.s8 %v1502_v53 }
 0x1b0   : > { %v2316_v56 = vpack.c.bf16 %v2200_v58, %v2198_v32  ;;  %v2315_v17 = vpack.c.bf16 %v2199_v61, %v2197_v54  ;;  %v1743_v35 = vand.u32 255, %v1615_v41  ;;  %v1548_v15 = vunpack.c.1.s8 %v1502_v53 }
 0x1b1   : > { %v2262_v47 = vadd.f32 %v4355_v36, %v2094_v62  ;;  %v2264_v43 = vadd.f32 %v4355_v36, %v2096_v55  ;;  %v1869_v0 = vcvt.s32.f32 %v1741_v48  ;;  %v1674_v24 = vand.u32 255, %v1546_v10 }
 0x1b2   : > { %2393 = vmatprep.subr.bf16.mxu0 %v2316_v56  ;;  %v1871_v6 = vcvt.s32.f32 %v1743_v35  ;;  %v1676_v11 = vand.u32 255, %v1548_v15  ;;  %v1545_v31 = vunpack.c.0.s8 %v3844_v30  ;;  %v1547_v51 = vunpack.c.1.s8 %v3844_v30 }
 0x1b3   : > { %2394 = vmatpush1.bf16.msra.mxu0 %v2315_v17  ;;  %v2348_v8 = vpack.c.bf16 %v2264_v43, %v2262_v47  ;;  %v2093_v12 = vmul.f32 %v4361_v39, %v1869_v0  ;;  %v1802_v18 = vcvt.s32.f32 %v1674_v24  ;;  %v1610_v53 = vunpack.c.0.s8 %v4396_v14  ;;  %v2965_v43 = vld [vmem:[%s3702_s30 + $0x18] sm:$0xff] }
 0x1b4   : > { %v2095_v49 = vmul.f32 %v4361_v39, %v1871_v6  ;;  %v1804_v22 = vcvt.s32.f32 %v1676_v11  ;;  %v1673_v23 = vand.u32 255, %v1545_v31  ;;  %v1675_v46 = vand.u32 255, %v1547_v51 }
 0x1b5   : > { %2436 = vmatprep.subr.bf16.mxu1 %v2348_v8  ;;  %v2261_v25 = vadd.f32 %v4365_v57, %v2093_v12  ;;  %v2026_v5 = vmul.f32 %v4327_v37, %v1802_v18  ;;  %v1612_v50 = vunpack.c.1.s8 %v4396_v14  ;;  %v1738_v30 = vand.u32 255, %v1610_v53 }
 0x1b6   : > { %v2263_v2 = vadd.f32 %v4365_v57, %v2095_v49  ;;  %v2028_v34 = vmul.f32 %v4327_v37, %v1804_v22  ;;  %v1801_v54 = vcvt.s32.f32 %v1673_v23  ;;  %v1803_v52 = vcvt.s32.f32 %v1675_v46 }
 0x1b7   : > { %v2194_v44 = vadd.f32 %v4339_v45, %v2026_v5  ;;  %v1740_v32 = vand.u32 255, %v1612_v50  ;;  %v1866_v58 = vcvt.s32.f32 %v1738_v30  ;;  %v1609_v61 = vunpack.c.0.s8 %v3870_v28  ;;  %v2966_v5 = vld [vmem:[%s3702_s30 + $0x98] sm:$0xff] }
 0x1b8   : > { %v2347_v41 = vpack.c.bf16 %v2263_v2, %v2261_v25  ;;  %v2196_v62 = vadd.f32 %v4339_v45, %v2028_v34  ;;  %v2025_v55 = vmul.f32 %v4330_v33, %v1801_v54  ;;  %v2027_v14 = vmul.f32 %v4330_v33, %v1803_v52 }
 0x1b9   : > { %v1868_v48 = vcvt.s32.f32 %v1740_v32  ;;  %v2090_v10 = vmul.f32 %v4347_v59, %v1866_v58  ;;  %v1611_v56 = vunpack.c.1.s8 %v3870_v28  ;;  %v1737_v17 = vand.u32 255, %v1609_v61 }
 0x1ba   : > { %2437 = vmatpush1.bf16.msra.mxu1 %v2347_v41  ;;  %v2314_v35 = vpack.c.bf16 %v2196_v62, %v2194_v44  ;;  %v2193_v15 = vadd.f32 %v4343_v16, %v2025_v55  ;;  %v2195_v47 = vadd.f32 %v4343_v16, %v2027_v14  ;;  %v1500_v0 = vand.u32 4042322160, %v2965_v43 }
 0x1bb   : > { %v2092_v24 = vmul.f32 %v4347_v59, %v1868_v48  ;;  %v2258_v6 = vadd.f32 %v4355_v36, %v2090_v10  ;;  %v1739_v11 = vand.u32 255, %v1611_v56  ;;  %v1865_v31 = vcvt.s32.f32 %v1737_v17 }
 0x1bc   : > { %2395 = vmatprep.subr.bf16.mxu0 %v2314_v35  ;;  %v2313_v51 = vpack.c.bf16 %v2195_v47, %v2193_v15  ;;  %v1542_v8 = vunpack.c.2.s8 %v1500_v0  ;;  %v1544_v28 = vunpack.c.3.s8 %v1500_v0  ;;  %v1541_v12 = vunpack.c.2.s8 %v3913_v19 }
 0x1bd   : > { %v2260_v18 = vadd.f32 %v4355_v36, %v2092_v24  ;;  %v1867_v53 = vcvt.s32.f32 %v1739_v11  ;;  %v2089_v49 = vmul.f32 %v4361_v39, %v1865_v31  ;;  %v1543_v22 = vunpack.c.3.s8 %v3913_v19 }
 0x1be   : > { %2396 = vmatpush1.bf16.msra.mxu0 %v2313_v51  ;;  %v1670_v23 = vand.u32 255, %v1542_v8  ;;  %v1672_v46 = vand.u32 255, %v1544_v28  ;;  %v1669_v25 = vand.u32 255, %v1541_v12  ;;  %v4445_v50 = vand.u32 4042322160, %v2966_v5 }
 0x1bf   : > { %v2346_v30 = vpack.c.bf16 %v2260_v18, %v2258_v6  ;;  %v2091_v2 = vmul.f32 %v4361_v39, %v1867_v53  ;;  %v2257_v34 = vadd.f32 %v4365_v57, %v2089_v49  ;;  %v1671_v54 = vand.u32 255, %v1543_v22 }
 0x1c0   : > { %v1798_v52 = vcvt.s32.f32 %v1670_v23  ;;  %v1800_v44 = vcvt.s32.f32 %v1672_v46  ;;  %v1797_v32 = vcvt.s32.f32 %v1669_v25  ;;  %v1606_v58 = vunpack.c.2.s8 %v4445_v50 }
 0x1c1   : > { %2438 = vmatprep.subr.bf16.mxu1 %v2346_v30  ;;  %v2259_v61 = vadd.f32 %v4365_v57, %v2091_v2  ;;  %v1799_v41 = vcvt.s32.f32 %v1671_v54  ;;  %v1608_v62 = vunpack.c.3.s8 %v4445_v50  ;;  %v1605_v55 = vunpack.c.2.s8 %v3918_v4 }
 0x1c2   : > { %v2022_v14 = vmul.f32 %v4327_v37, %v1798_v52  ;;  %v2024_v48 = vmul.f32 %v4327_v37, %v1800_v44  ;;  %v2021_v10 = vmul.f32 %v4330_v33, %v1797_v32  ;;  %v1734_v56 = vand.u32 255, %v1606_v58 }
 0x1c3   : > { %v2345_v17 = vpack.c.bf16 %v2259_v61, %v2257_v34  ;;  %v2023_v35 = vmul.f32 %v4330_v33, %v1799_v41  ;;  %v1736_v15 = vand.u32 255, %v1608_v62  ;;  %v1607_v47 = vunpack.c.3.s8 %v3918_v4 }
 0x1c4   : > { %v2190_v43 = vadd.f32 %v4339_v45, %v2022_v14  ;;  %v2192_v24 = vadd.f32 %v4339_v45, %v2024_v48  ;;  %v2189_v6 = vadd.f32 %v4343_v16, %v2021_v10  ;;  %v1862_v11 = vcvt.s32.f32 %v1734_v56  ;;  %v2959_v10 = vld [vmem:[%s3695_s26 + $0x4] ss:$16 sps:$4 sm:$0xff]  }
 0x1c5   : > { %2439 = vmatpush1.bf16.msra.mxu1 %v2345_v17  ;;  %v2191_v31 = vadd.f32 %v4343_v16, %v2023_v35  ;;  %v1864_v51 = vcvt.s32.f32 %v1736_v15  ;;  %v1733_v8 = vand.u32 255, %v1605_v55  ;;  %v1735_v28 = vand.u32 255, %v1607_v47  ;;  %2421 = vmatprep.mubr.bf16.mxu0 %v2959_v10 }
 0x1c6   : > { %v2312_v12 = vpack.c.bf16 %v2192_v24, %v2190_v43  ;;  %v2086_v18 = vmul.f32 %v4347_v59, %v1862_v11  ;;  %v1538_v53 = vunpack.c.0.s8 %v1500_v0  ;;  %v1540_v49 = vunpack.c.1.s8 %v1500_v0 }
 0x1c7   : > { %v2311_v22 = vpack.c.bf16 %v2191_v31, %v2189_v6  ;;  %v2088_v23 = vmul.f32 %v4347_v59, %v1864_v51  ;;  %v1861_v46 = vcvt.s32.f32 %v1733_v8  ;;  %v1863_v25 = vcvt.s32.f32 %v1735_v28 }
 0x1c8   : > { %2397 = vmatprep.subr.bf16.mxu0 %v2312_v12  ;;  %v2254_v5 = vadd.f32 %v4355_v36, %v2086_v18  ;;  %v1666_v30 = vand.u32 255, %v1538_v53  ;;  %v1668_v2 = vand.u32 255, %v1540_v49  ;;  %v1537_v34 = vunpack.c.0.s8 %v3913_v19  ;;  %v2962_v18 = vld [vmem:[%s3695_s26 + $0xc] ss:$16 sps:$4 sm:$0xff]  }
 0x1c9   : > { %2398 = vmatpush1.bf16.msra.mxu0 %v2311_v22  ;;  %v2256_v54 = vadd.f32 %v4355_v36, %v2088_v23  ;;  %v2085_v52 = vmul.f32 %v4361_v39, %v1861_v46  ;;  %v2087_v0 = vmul.f32 %v4361_v39, %v1863_v25  ;;  %v1539_v44 = vunpack.c.1.s8 %v3913_v19  ;;  %v2967_v23 = vld [vmem:[%s3702_s30 + $0x8] sm:$0xff]  ;;  %2464 = vmatprep.mubr.bf16.mxu1 %v2962_v18 }
 0x1ca   : > { %v1794_v32 = vcvt.s32.f32 %v1666_v30  ;;  %v1796_v58 = vcvt.s32.f32 %v1668_v2  ;;  %v1665_v61 = vand.u32 255, %v1537_v34  ;;  %v1602_v41 = vunpack.c.0.s8 %v4445_v50 }
 0x1cb   : > { %v2344_v62 = vpack.c.bf16 %v2256_v54, %v2254_v5  ;;  %v2253_v55 = vadd.f32 %v4365_v57, %v2085_v52  ;;  %v2255_v14 = vadd.f32 %v4365_v57, %v2087_v0  ;;  %v1667_v48 = vand.u32 255, %v1539_v44 }
 0x1cc   : > { %v2018_v56 = vmul.f32 %v4327_v37, %v1794_v32  ;;  %v2020_v17 = vmul.f32 %v4327_v37, %v1796_v58  ;;  %v1793_v35 = vcvt.s32.f32 %v1665_v61  ;;  %v1604_v15 = vunpack.c.1.s8 %v4445_v50 }
 0x1cd   : > { %2440 = vmatprep.subr.bf16.mxu1 %v2344_v62  ;;  %v2343_v19 = vpack.c.bf16 %v2255_v14, %v2253_v55  ;;  %v1795_v47 = vcvt.s32.f32 %v1667_v48  ;;  %v1730_v43 = vand.u32 255, %v1602_v41  ;;  %v1601_v24 = vunpack.c.0.s8 %v3918_v4 }
 0x1ce   : > { %v2186_v6 = vadd.f32 %v4339_v45, %v2018_v56  ;;  %v2188_v11 = vadd.f32 %v4339_v45, %v2020_v17  ;;  %v2017_v31 = vmul.f32 %v4330_v33, %v1793_v35  ;;  %v1732_v51 = vand.u32 255, %v1604_v15  ;;  %v2968_v56 = vld [vmem:[%s3702_s30 + $0x88] sm:$0xff] }
 0x1cf   : > { %2441 = vmatpush1.bf16.msra.mxu1 %v2343_v19  ;;  %v2019_v8 = vmul.f32 %v4330_v33, %v1795_v47  ;;  %v1858_v50 = vcvt.s32.f32 %v1730_v43  ;;  %v1603_v28 = vunpack.c.1.s8 %v3918_v4  ;;  %v1729_v12 = vand.u32 255, %v1601_v24 }
 0x1d0   : > { %v2310_v53 = vpack.c.bf16 %v2188_v11, %v2186_v6  ;;  %v2185_v49 = vadd.f32 %v4343_v16, %v2017_v31  ;;  %v1860_v22 = vcvt.s32.f32 %v1732_v51  ;;  %v4486_v46 = vand.u32 4042322160, %v2967_v23 }
 0x1d1   : > { %v2187_v25 = vadd.f32 %v4343_v16, %v2019_v8  ;;  %v2082_v5 = vmul.f32 %v4347_v59, %v1858_v50  ;;  %v1731_v30 = vand.u32 255, %v1603_v28  ;;  %v1857_v2 = vcvt.s32.f32 %v1729_v12 }
 0x1d2   : > { %2399 = vmatprep.subr.bf16.mxu0 %v2310_v53  ;;  %v2084_v34 = vmul.f32 %v4347_v59, %v1860_v22  ;;  %v1534_v4 = vunpack.c.2.s8 %v4486_v46  ;;  %v1536_v54 = vunpack.c.3.s8 %v4486_v46  ;;  %v1533_v52 = vunpack.c.2.s8 %v3972_v27 }
 0x1d3   : > { %v2309_v0 = vpack.c.bf16 %v2187_v25, %v2185_v49  ;;  %v2250_v44 = vadd.f32 %v4355_v36, %v2082_v5  ;;  %v1859_v32 = vcvt.s32.f32 %v1731_v30  ;;  %v2081_v58 = vmul.f32 %v4361_v39, %v1857_v2 }
 0x1d4   : > { %v2252_v61 = vadd.f32 %v4355_v36, %v2084_v34  ;;  %v1662_v41 = vand.u32 255, %v1534_v4  ;;  %v1664_v62 = vand.u32 255, %v1536_v54  ;;  %v1535_v55 = vunpack.c.3.s8 %v3972_v27 }
 0x1d5   : > { %2400 = vmatpush1.bf16.msra.mxu0 %v2309_v0  ;;  %v2083_v14 = vmul.f32 %v4361_v39, %v1859_v32  ;;  %v2249_v48 = vadd.f32 %v4365_v57, %v2081_v58  ;;  %v1661_v10 = vand.u32 255, %v1533_v52  ;;  %v4501_v17 = vand.u32 4042322160, %v2968_v56 }
 0x1d6   : > { %v2342_v35 = vpack.c.bf16 %v2252_v61, %v2250_v44  ;;  %v1790_v15 = vcvt.s32.f32 %v1662_v41  ;;  %v1792_v19 = vcvt.s32.f32 %v1664_v62  ;;  %v1663_v47 = vand.u32 255, %v1535_v55 }
 0x1d7   : > { %v2251_v43 = vadd.f32 %v4365_v57, %v2083_v14  ;;  %v1789_v24 = vcvt.s32.f32 %v1661_v10  ;;  %v1598_v6 = vunpack.c.2.s8 %v4501_v17  ;;  %v1600_v11 = vunpack.c.3.s8 %v4501_v17 }
 0x1d8   : > { %2442 = vmatprep.subr.bf16.mxu1 %v2342_v35  ;;  %v2014_v31 = vmul.f32 %v4327_v37, %v1790_v15  ;;  %v2016_v51 = vmul.f32 %v4327_v37, %v1792_v19  ;;  %v1791_v8 = vcvt.s32.f32 %v1663_v47  ;;  %v1597_v50 = vunpack.c.2.s8 %v3980_v40 }
 0x1d9   : > { %v2341_v28 = vpack.c.bf16 %v2251_v43, %v2249_v48  ;;  %v2013_v12 = vmul.f32 %v4330_v33, %v1789_v24  ;;  %v1726_v18 = vand.u32 255, %v1598_v6  ;;  %v1728_v53 = vand.u32 255, %v1600_v11 }
 0x1da   : > { %v2182_v49 = vadd.f32 %v4339_v45, %v2014_v31  ;;  %v2184_v22 = vadd.f32 %v4339_v45, %v2016_v51  ;;  %v2015_v23 = vmul.f32 %v4330_v33, %v1791_v8  ;;  %v1599_v25 = vunpack.c.3.s8 %v3980_v40 }
 0x1db   : > { %2443 = vmatpush1.bf16.msra.mxu1 %v2341_v28  ;;  %v2181_v5 = vadd.f32 %v4343_v16, %v2013_v12  ;;  %v1854_v30 = vcvt.s32.f32 %v1726_v18  ;;  %v1856_v2 = vcvt.s32.f32 %v1728_v53  ;;  %v1725_v34 = vand.u32 255, %v1597_v50 }
 0x1dc   : > { %v2308_v4 = vpack.c.bf16 %v2184_v22, %v2182_v49  ;;  %v2183_v54 = vadd.f32 %v4343_v16, %v2015_v23  ;;  %v1727_v52 = vand.u32 255, %v1599_v25  ;;  %v1530_v0 = vunpack.c.0.s8 %v4486_v46 }
 0x1dd   : > { %v2078_v44 = vmul.f32 %v4347_v59, %v1854_v30  ;;  %v2080_v32 = vmul.f32 %v4347_v59, %v1856_v2  ;;  %v1853_v58 = vcvt.s32.f32 %v1725_v34  ;;  %v1532_v61 = vunpack.c.1.s8 %v4486_v46 }
 0x1de   : > { %2401 = vmatprep.subr.bf16.mxu0 %v2308_v4  ;;  %v2307_v41 = vpack.c.bf16 %v2183_v54, %v2181_v5  ;;  %v1855_v62 = vcvt.s32.f32 %v1727_v52  ;;  %v1658_v55 = vand.u32 255, %v1530_v0  ;;  %v1529_v14 = vunpack.c.0.s8 %v3972_v27  ;;  %v2969_v4 = vld [vmem:[%s3702_s30 + $0x78] sm:$0xff] }
 0x1df   : > { %v2246_v48 = vadd.f32 %v4355_v36, %v2078_v44  ;;  %v2248_v10 = vadd.f32 %v4355_v36, %v2080_v32  ;;  %v2077_v56 = vmul.f32 %v4361_v39, %v1853_v58  ;;  %v1660_v35 = vand.u32 255, %v1532_v61 }
 0x1e0   : > { %2402 = vmatpush1.bf16.msra.mxu0 %v2307_v41  ;;  %v2079_v15 = vmul.f32 %v4361_v39, %v1855_v62  ;;  %v1786_v19 = vcvt.s32.f32 %v1658_v55  ;;  %v1531_v47 = vunpack.c.1.s8 %v3972_v27  ;;  %v1657_v46 = vand.u32 255, %v1529_v14 }
 0x1e1   : > { %v2340_v43 = vpack.c.bf16 %v2248_v10, %v2246_v48  ;;  %v2245_v24 = vadd.f32 %v4365_v57, %v2077_v56  ;;  %v1788_v6 = vcvt.s32.f32 %v1660_v35  ;;  %v1594_v11 = vunpack.c.0.s8 %v4501_v17 }
 0x1e2   : > { %v2247_v31 = vadd.f32 %v4365_v57, %v2079_v15  ;;  %v2010_v51 = vmul.f32 %v4327_v37, %v1786_v19  ;;  %v1659_v8 = vand.u32 255, %v1531_v47  ;;  %v1785_v50 = vcvt.s32.f32 %v1657_v46 }
 0x1e3   : > { %2444 = vmatprep.subr.bf16.mxu1 %v2340_v43  ;;  %v2012_v28 = vmul.f32 %v4327_v37, %v1788_v6  ;;  %v1596_v12 = vunpack.c.1.s8 %v4501_v17  ;;  %v1722_v27 = vand.u32 255, %v1594_v11  ;;  %v1593_v18 = vunpack.c.0.s8 %v3980_v40 }
 0x1e4   : > { %v2339_v53 = vpack.c.bf16 %v2247_v31, %v2245_v24  ;;  %v2178_v49 = vadd.f32 %v4339_v45, %v2010_v51  ;;  %v1787_v22 = vcvt.s32.f32 %v1659_v8  ;;  %v2009_v23 = vmul.f32 %v4330_v33, %v1785_v50  ;;  %v2970_v31 = vld [vmem:[%s3702_s30 + $0xf8] sm:$0xff] }
 0x1e5   : > { %v2180_v25 = vadd.f32 %v4339_v45, %v2012_v28  ;;  %v1724_v5 = vand.u32 255, %v1596_v12  ;;  %v1850_v30 = vcvt.s32.f32 %v1722_v27  ;;  %v1595_v2 = vunpack.c.1.s8 %v3980_v40 }
 0x1e6   : > { %2445 = vmatpush1.bf16.msra.mxu1 %v2339_v53  ;;  %v2011_v37 = vmul.f32 %v4330_v33, %v1787_v22  ;;  %v2177_v17 = vadd.f32 %v4343_v16, %v2009_v23  ;;  %v1721_v34 = vand.u32 255, %v1593_v18  ;;  %v4540_v54 = vand.u32 4042322160, %v2969_v4 }
 0x1e7   : > { %v2306_v52 = vpack.c.bf16 %v2180_v25, %v2178_v49  ;;  %v1852_v0 = vcvt.s32.f32 %v1724_v5  ;;  %v2074_v44 = vmul.f32 %v4347_v59, %v1850_v30  ;;  %v1723_v32 = vand.u32 255, %v1595_v2 }
 0x1e8   : > { %v2179_v45 = vadd.f32 %v4343_v16, %v2011_v37  ;;  %v1849_v58 = vcvt.s32.f32 %v1721_v34  ;;  %v1590_v61 = vunpack.c.2.s8 %v4540_v54  ;;  %v1592_v40 = vunpack.c.3.s8 %v4540_v54 }
 0x1e9   : > { %2403 = vmatprep.subr.bf16.mxu0 %v2306_v52  ;;  %v2076_v33 = vmul.f32 %v4347_v59, %v1852_v0  ;;  %v2242_v41 = vadd.f32 %v4355_v36, %v2074_v44  ;;  %v1851_v62 = vcvt.s32.f32 %v1723_v32  ;;  %v1924_v55 = vcombine.high %v4313_v9, %v4313_v9 }
 0x1ea   : > { %v2305_v14 = vpack.c.bf16 %v2179_v45, %v2177_v17  ;;  %v2073_v48 = vmul.f32 %v4361_v39, %v1849_v58  ;;  %v1718_v10 = vand.u32 255, %v1590_v61  ;;  %v1720_v56 = vand.u32 255, %v1592_v40 }
 0x1eb   : > { %v2244_v16 = vadd.f32 %v4355_v36, %v2076_v33  ;;  %v2075_v35 = vmul.f32 %v4361_v39, %v1851_v62  ;;  %v1938_v15 = vrot.slane %v1924_v55, %v3747_v26  ;;  %v1952_v59 = vcombine.high %v4323_v29, %v4323_v29 }
 0x1ec   : > { %2404 = vmatpush1.bf16.msra.mxu0 %v2305_v14  ;;  %v2241_v19 = vadd.f32 %v4365_v57, %v2073_v48  ;;  %v1846_v47 = vcvt.s32.f32 %v1718_v10  ;;  %v1848_v9 = vcvt.s32.f32 %v1720_v56  ;;  %v1589_v46 = vunpack.c.2.s8 %v4059_v63 }
 0x1ed   : > { %v2338_v43 = vpack.c.bf16 %v2244_v16, %v2242_v41  ;;  %v2243_v24 = vadd.f32 %v4365_v57, %v2075_v35  ;;  %v1966_v36 = vrot.slane %v1952_v59, %v3747_v26  ;;  %v4561_v6 = vrot.slane %v1938_v15, %v3743_v21 }
 0x1ee   : > { %v1591_v39 = vunpack.c.3.s8 %v4059_v63  ;;  %v1717_v11 = vand.u32 255, %v1589_v46  ;;  %v4565_v29 = vrot.slane %v1938_v15, %v3741_v20  ;;  %v4568_v51 = vand.u32 4042322160, %v2970_v31 }
 0x1ef   : > { %2446 = vmatprep.subr.bf16.mxu1 %v2338_v43  ;;  %v2337_v8 = vpack.c.bf16 %v2243_v24, %v2241_v19  ;;  %v2070_v50 = vmul.f32 %v4561_v6, %v1846_v47  ;;  %v2072_v57 = vmul.f32 %v4561_v6, %v1848_v9  ;;  %v4573_v26 = vrot.slane %v1966_v36, %v3743_v21 }
 0x1f0   : > { %v1719_v28 = vand.u32 255, %v1591_v39  ;;  %v1845_v12 = vcvt.s32.f32 %v1717_v11  ;;  %v4576_v27 = vrot.slane %v1966_v36, %v3741_v20  ;;  %v1654_v18 = vunpack.c.2.s8 %v4568_v51 }
 0x1f1   : > { %2447 = vmatpush1.bf16.msra.mxu1 %v2337_v8  ;;  %v2238_v53 = vadd.f32 %v4573_v26, %v2070_v50  ;;  %v2240_v49 = vadd.f32 %v4573_v26, %v2072_v57  ;;  %v1656_v22 = vunpack.c.3.s8 %v4568_v51  ;;  %v1940_v23 = vcombine.high %v1938_v15, %v1938_v15 }
 0x1f2   : > { %v1847_v25 = vcvt.s32.f32 %v1719_v28  ;;  %v2069_v5 = vmul.f32 %v4565_v29, %v1845_v12  ;;  %v1782_v30 = vand.u32 255, %v1654_v18  ;;  %v1968_v2 = vcombine.high %v1966_v36, %v1966_v36 }
 0x1f3   : > { %v2336_v37 = vpack.c.bf16 %v2240_v49, %v2238_v53  ;;  %v1784_v17 = vand.u32 255, %v1656_v22  ;;  %v4584_v34 = vrot.slane %v1940_v23, %v3743_v21  ;;  %v1653_v4 = vunpack.c.2.s8 %v4088_v13 }
 0x1f4   : > { %v2071_v52 = vmul.f32 %v4565_v29, %v1847_v25  ;;  %v2237_v0 = vadd.f32 %v4576_v27, %v2069_v5  ;;  %v1910_v44 = vcvt.s32.f32 %v1782_v30  ;;  %v4590_v32 = vrot.slane %v1968_v2, %v3743_v21 }
 0x1f5   : > { %2405 = vmatprep.subr.bf16.mxu0 %v2336_v37  ;;  %v1912_v45 = vcvt.s32.f32 %v1784_v17  ;;  %v1655_v58 = vunpack.c.3.s8 %v4088_v13  ;;  %v1781_v61 = vand.u32 255, %v1653_v4  ;;  %v4594_v40 = vrot.slane %v1940_v23, %v3741_v20 }
 0x1f6   : > { %v2239_v33 = vadd.f32 %v4576_v27, %v2071_v52  ;;  %v2134_v41 = vmul.f32 %v4584_v34, %v1910_v44  ;;  %v4599_v62 = vrot.slane %v1968_v2, %v3741_v20  ;;  %v1586_v55 = vunpack.c.0.s8 %v4540_v54 }
 0x1f7   : > { %v2136_v21 = vmul.f32 %v4584_v34, %v1912_v45  ;;  %v1783_v14 = vand.u32 255, %v1655_v58  ;;  %v1909_v48 = vcvt.s32.f32 %v1781_v61  ;;  %v1588_v10 = vunpack.c.1.s8 %v4540_v54  ;;  %v2971_v45 = vld [vmem:[%s3702_s30 + $0x68] sm:$0xff] }
 0x1f8   : > { %v2335_v56 = vpack.c.bf16 %v2239_v33, %v2237_v0  ;;  %v2302_v16 = vadd.f32 %v4590_v32, %v2134_v41  ;;  %v1714_v35 = vand.u32 255, %v1586_v55  ;;  %v1585_v15 = vunpack.c.0.s8 %v4059_v63 }
 0x1f9   : > { %v2304_v59 = vadd.f32 %v4590_v32, %v2136_v21  ;;  %v1911_v19 = vcvt.s32.f32 %v1783_v14  ;;  %v2133_v20 = vmul.f32 %v4594_v40, %v1909_v48  ;;  %v1716_v47 = vand.u32 255, %v1588_v10 }
 0x1fa   : > { %2406 = vmatpush2.bf16.msra.mxu0 %v2335_v56  ;;  %v1842_v9 = vcvt.s32.f32 %v1714_v35  ;;  %v1587_v46 = vunpack.c.1.s8 %v4059_v63  ;;  %v1713_v43 = vand.u32 255, %v1585_v15  ;;  %v1650_v24 = vunpack.c.0.s8 %v4568_v51 }
 0x1fb   : > { %v2368_v54 = vpack.c.bf16 %v2304_v59, %v2302_v16  ;;  %v2135_v36 = vmul.f32 %v4594_v40, %v1911_v19  ;;  %v2301_v39 = vadd.f32 %v4599_v62, %v2133_v20  ;;  %v1844_v11 = vcvt.s32.f32 %v1716_v47 }
 0x1fc   : > { %v2066_v31 = vmul.f32 %v4561_v6, %v1842_v9  ;;  %v1715_v8 = vand.u32 255, %v1587_v46  ;;  %v1841_v50 = vcvt.s32.f32 %v1713_v43  ;;  %v1652_v57 = vunpack.c.1.s8 %v4568_v51  ;;  %v2972_v43 = vld [vmem:[%s3702_s30 + $0xe8] sm:$0xff] }
 0x1fd   : > { %2448 = vmatprep.subr.bf16.mxu1 %v2368_v54  ;;  %v2303_v28 = vadd.f32 %v4599_v62, %v2135_v36  ;;  %v2068_v63 = vmul.f32 %v4561_v6, %v1844_v11  ;;  %v1778_v12 = vand.u32 255, %v1650_v24  ;;  %v1649_v18 = vunpack.c.0.s8 %v4088_v13 }
 0x1fe   : > { %v2234_v53 = vadd.f32 %v4573_v26, %v2066_v31  ;;  %v1843_v49 = vcvt.s32.f32 %v1715_v8  ;;  %v2065_v22 = vmul.f32 %v4565_v29, %v1841_v50  ;;  %v1780_v23 = vand.u32 255, %v1652_v57 }
 0x1ff   : > { %v2367_v25 = vpack.c.bf16 %v2303_v28, %v2301_v39  ;;  %v2236_v5 = vadd.f32 %v4573_v26, %v2068_v63  ;;  %v1906_v30 = vcvt.s32.f32 %v1778_v12  ;;  %v1651_v51 = vunpack.c.1.s8 %v4088_v13 }
 0x200   : > { %v2067_v2 = vmul.f32 %v4565_v29, %v1843_v49  ;;  %v2233_v37 = vadd.f32 %v4576_v27, %v2065_v22  ;;  %v1908_v17 = vcvt.s32.f32 %v1780_v23  ;;  %v1777_v4 = vand.u32 255, %v1649_v18 }
 0x201   : > { %2449 = vmatpush2.bf16.msra.mxu1 %v2367_v25  ;;  %v2334_v52 = vpack.c.bf16 %v2236_v5, %v2234_v53  ;;  %v2130_v0 = vmul.f32 %v4584_v34, %v1906_v30  ;;  %v1779_v44 = vand.u32 255, %v1651_v51  ;;  %v1510_v58 = vand.u32 4042322160, %v2971_v45 }
 0x202   : > { %v2235_v61 = vadd.f32 %v4576_v27, %v2067_v2  ;;  %v2132_v33 = vmul.f32 %v4584_v34, %v1908_v17  ;;  %v1905_v41 = vcvt.s32.f32 %v1777_v4  ;;  %v1581_v13 = vunpack.c.2.s8 %v4131_v38 }
 0x203   : > { %2407 = vmatprep.subr.bf16.mxu0 %v2334_v52  ;;  %v2298_v55 = vadd.f32 %v4590_v32, %v2130_v0  ;;  %v1907_v21 = vcvt.s32.f32 %v1779_v44  ;;  %v1582_v14 = vunpack.c.2.s8 %v1510_v58  ;;  %v1584_v48 = vunpack.c.3.s8 %v1510_v58 }
 0x204   : > { %v2333_v10 = vpack.c.bf16 %v2235_v61, %v2233_v37  ;;  %v2300_v56 = vadd.f32 %v4590_v32, %v2132_v33  ;;  %v2129_v16 = vmul.f32 %v4594_v40, %v1905_v41  ;;  %v1583_v35 = vunpack.c.3.s8 %v4131_v38 }
 0x205   : > { %v2131_v15 = vmul.f32 %v4594_v40, %v1907_v21  ;;  %v1710_v59 = vand.u32 255, %v1582_v14  ;;  %v1712_v19 = vand.u32 255, %v1584_v48  ;;  %v1709_v20 = vand.u32 255, %v1581_v13 }
 0x206   : > { %2408 = vmatpush2.bf16.msra.mxu0 %v2333_v10  ;;  %v2366_v47 = vpack.c.bf16 %v2300_v56, %v2298_v55  ;;  %v2297_v9 = vadd.f32 %v4599_v62, %v2129_v16  ;;  %v1711_v46 = vand.u32 255, %v1583_v35  ;;  %v4635_v24 = vand.u32 4042322160, %v2972_v43 }
 0x207   : > { %v2299_v54 = vadd.f32 %v4599_v62, %v2131_v15  ;;  %v1838_v36 = vcvt.s32.f32 %v1710_v59  ;;  %v1840_v39 = vcvt.s32.f32 %v1712_v19  ;;  %v1837_v11 = vcvt.s32.f32 %v1709_v20 }
 0x208   : > { %2450 = vmatprep.subr.bf16.mxu1 %v2366_v47  ;;  %v1839_v31 = vcvt.s32.f32 %v1711_v46  ;;  %v1646_v8 = vunpack.c.2.s8 %v4635_v24  ;;  %v1648_v50 = vunpack.c.3.s8 %v4635_v24  ;;  %v1645_v57 = vunpack.c.2.s8 %v4146_v60 }
 0x209   : > { %v2365_v28 = vpack.c.bf16 %v2299_v54, %v2297_v9  ;;  %v2062_v63 = vmul.f32 %v4561_v6, %v1838_v36  ;;  %v2064_v12 = vmul.f32 %v4561_v6, %v1840_v39  ;;  %v2061_v18 = vmul.f32 %v4565_v29, %v1837_v11 }
 0x20a   : > { %v2063_v53 = vmul.f32 %v4565_v29, %v1839_v31  ;;  %v1774_v49 = vand.u32 255, %v1646_v8  ;;  %v1776_v22 = vand.u32 255, %v1648_v50  ;;  %v1647_v23 = vunpack.c.3.s8 %v4146_v60 }
 0x20b   : > { %2451 = vmatpush2.bf16.msra.mxu1 %v2365_v28  ;;  %v2230_v25 = vadd.f32 %v4573_v26, %v2062_v63  ;;  %v2232_v5 = vadd.f32 %v4573_v26, %v2064_v12  ;;  %v2229_v30 = vadd.f32 %v4576_v27, %v2061_v18  ;;  %v1773_v51 = vand.u32 255, %v1645_v57 }
 0x20c   : > { %v2231_v2 = vadd.f32 %v4576_v27, %v2063_v53  ;;  %v1902_v37 = vcvt.s32.f32 %v1774_v49  ;;  %v1904_v17 = vcvt.s32.f32 %v1776_v22  ;;  %v1775_v4 = vand.u32 255, %v1647_v23 }
 0x20d   : > { %v2332_v52 = vpack.c.bf16 %v2232_v5, %v2230_v25  ;;  %v1901_v0 = vcvt.s32.f32 %v1773_v51  ;;  %v1578_v44 = vunpack.c.0.s8 %v1510_v58  ;;  %v1580_v45 = vunpack.c.1.s8 %v1510_v58  ;;  %v2973_v25 = vld [vmem:[%s3702_s30 + $0x58] sm:$0xff] }
 0x20e   : > { %v2331_v61 = vpack.c.bf16 %v2231_v2, %v2229_v30  ;;  %v2126_v33 = vmul.f32 %v4584_v34, %v1902_v37  ;;  %v2128_v41 = vmul.f32 %v4584_v34, %v1904_v17  ;;  %v1903_v13 = vcvt.s32.f32 %v1775_v4 }
 0x20f   : > { %2409 = vmatprep.subr.bf16.mxu0 %v2332_v52  ;;  %v2125_v55 = vmul.f32 %v4594_v40, %v1901_v0  ;;  %v1706_v21 = vand.u32 255, %v1578_v44  ;;  %v1708_v14 = vand.u32 255, %v1580_v45  ;;  %v1577_v48 = vunpack.c.0.s8 %v4131_v38 }
 0x210   : > { %2410 = vmatpush2.bf16.msra.mxu0 %v2331_v61  ;;  %v2294_v10 = vadd.f32 %v4590_v32, %v2126_v33  ;;  %v2296_v56 = vadd.f32 %v4590_v32, %v2128_v41  ;;  %v2127_v58 = vmul.f32 %v4594_v40, %v1903_v13  ;;  %v1579_v16 = vunpack.c.1.s8 %v4131_v38 }
 0x211   : > { %v2293_v35 = vadd.f32 %v4599_v62, %v2125_v55  ;;  %v1834_v15 = vcvt.s32.f32 %v1706_v21  ;;  %v1836_v59 = vcvt.s32.f32 %v1708_v14  ;;  %v1705_v19 = vand.u32 255, %v1577_v48 }
 0x212   : > { %v2364_v20 = vpack.c.bf16 %v2296_v56, %v2294_v10  ;;  %v2295_v47 = vadd.f32 %v4599_v62, %v2127_v58  ;;  %v1707_v9 = vand.u32 255, %v1579_v16  ;;  %v1642_v46 = vunpack.c.0.s8 %v4635_v24  ;;  %v2974_v10 = vld [vmem:[%s3702_s30 + $0xd8] sm:$0xff] }
 0x213   : > { %v2058_v43 = vmul.f32 %v4561_v6, %v1834_v15  ;;  %v2060_v54 = vmul.f32 %v4561_v6, %v1836_v59  ;;  %v1833_v36 = vcvt.s32.f32 %v1705_v19  ;;  %v1644_v39 = vunpack.c.1.s8 %v4635_v24 }
 0x214   : > { %2452 = vmatprep.subr.bf16.mxu1 %v2364_v20  ;;  %v2363_v38 = vpack.c.bf16 %v2295_v47, %v2293_v35  ;;  %v1835_v11 = vcvt.s32.f32 %v1707_v9  ;;  %v1770_v31 = vand.u32 255, %v1642_v46  ;;  %v1641_v8 = vunpack.c.0.s8 %v4146_v60 }
 0x215   : > { %v2226_v50 = vadd.f32 %v4573_v26, %v2058_v43  ;;  %v2228_v57 = vadd.f32 %v4573_v26, %v2060_v54  ;;  %v2057_v28 = vmul.f32 %v4565_v29, %v1833_v36  ;;  %v1772_v63 = vand.u32 255, %v1644_v39 }
 0x216   : > { %2453 = vmatpush2.bf16.msra.mxu1 %v2363_v38  ;;  %v2059_v12 = vmul.f32 %v4565_v29, %v1835_v11  ;;  %v1898_v18 = vcvt.s32.f32 %v1770_v31  ;;  %v1643_v24 = vunpack.c.1.s8 %v4146_v60  ;;  %v1769_v53 = vand.u32 255, %v1641_v8 }
 0x217   : > { %v2330_v49 = vpack.c.bf16 %v2228_v57, %v2226_v50  ;;  %v2225_v22 = vadd.f32 %v4576_v27, %v2057_v28  ;;  %v1900_v23 = vcvt.s32.f32 %v1772_v63  ;;  %v4672_v5 = vand.u32 4042322160, %v2973_v25 }
 0x218   : > { %v2227_v30 = vadd.f32 %v4576_v27, %v2059_v12  ;;  %v2122_v51 = vmul.f32 %v4584_v34, %v1898_v18  ;;  %v1771_v2 = vand.u32 255, %v1643_v24  ;;  %v1897_v37 = vcvt.s32.f32 %v1769_v53 }
 0x219   : > { %2411 = vmatprep.subr.bf16.mxu0 %v2330_v49  ;;  %v2124_v17 = vmul.f32 %v4584_v34, %v1900_v23  ;;  %v1574_v60 = vunpack.c.2.s8 %v4672_v5  ;;  %v1576_v4 = vunpack.c.3.s8 %v4672_v5  ;;  %v1573_v52 = vunpack.c.2.s8 %v4191_v7 }
 0x21a   : > { %v2329_v0 = vpack.c.bf16 %v2227_v30, %v2225_v22  ;;  %v2290_v44 = vadd.f32 %v4590_v32, %v2122_v51  ;;  %v1899_v45 = vcvt.s32.f32 %v1771_v2  ;;  %v2121_v61 = vmul.f32 %v4594_v40, %v1897_v37 }
 0x21b   : > { %v2292_v33 = vadd.f32 %v4590_v32, %v2124_v17  ;;  %v1702_v41 = vand.u32 255, %v1574_v60  ;;  %v1704_v13 = vand.u32 255, %v1576_v4  ;;  %v1575_v55 = vunpack.c.3.s8 %v4191_v7 }
 0x21c   : > { %2412 = vmatpush2.bf16.msra.mxu0 %v2329_v0  ;;  %v2123_v21 = vmul.f32 %v4594_v40, %v1899_v45  ;;  %v2289_v14 = vadd.f32 %v4599_v62, %v2121_v61  ;;  %v1701_v48 = vand.u32 255, %v1573_v52  ;;  %v4687_v56 = vand.u32 4042322160, %v2974_v10 }
 0x21d   : > { %v2362_v58 = vpack.c.bf16 %v2292_v33, %v2290_v44  ;;  %v1830_v16 = vcvt.s32.f32 %v1702_v41  ;;  %v1832_v35 = vcvt.s32.f32 %v1704_v13  ;;  %v1703_v15 = vand.u32 255, %v1575_v55 }
 0x21e   : > { %v2291_v59 = vadd.f32 %v4599_v62, %v2123_v21  ;;  %v1829_v19 = vcvt.s32.f32 %v1701_v48  ;;  %v1638_v20 = vunpack.c.2.s8 %v4687_v56  ;;  %v1640_v47 = vunpack.c.3.s8 %v4687_v56 }
 0x21f   : > { %2454 = vmatprep.subr.bf16.mxu1 %v2362_v58  ;;  %v2054_v9 = vmul.f32 %v4561_v6, %v1830_v16  ;;  %v2056_v46 = vmul.f32 %v4561_v6, %v1832_v35  ;;  %v1831_v43 = vcvt.s32.f32 %v1703_v15  ;;  %v1637_v54 = vunpack.c.2.s8 %v4200_v42 }
 0x220   : > { %v2361_v36 = vpack.c.bf16 %v2291_v59, %v2289_v14  ;;  %v2053_v39 = vmul.f32 %v4565_v29, %v1829_v19  ;;  %v1766_v38 = vand.u32 255, %v1638_v20  ;;  %v1768_v11 = vand.u32 255, %v1640_v47 }
 0x221   : > { %v2222_v31 = vadd.f32 %v4573_v26, %v2054_v9  ;;  %v2224_v8 = vadd.f32 %v4573_v26, %v2056_v46  ;;  %v2055_v50 = vmul.f32 %v4565_v29, %v1831_v43  ;;  %v1639_v57 = vunpack.c.3.s8 %v4200_v42 }
 0x222   : > { %2455 = vmatpush2.bf16.msra.mxu1 %v2361_v36  ;;  %v2221_v28 = vadd.f32 %v4576_v27, %v2053_v39  ;;  %v1894_v63 = vcvt.s32.f32 %v1766_v38  ;;  %v1896_v12 = vcvt.s32.f32 %v1768_v11  ;;  %v1765_v18 = vand.u32 255, %v1637_v54  ;;  %v2975_v38 = vld [vmem:[%s3702_s30 + $0x48] sm:$0xff] }
 0x223   : > { %v2328_v24 = vpack.c.bf16 %v2224_v8, %v2222_v31  ;;  %v2223_v53 = vadd.f32 %v4576_v27, %v2055_v50  ;;  %v1767_v49 = vand.u32 255, %v1639_v57  ;;  %v1570_v22 = vunpack.c.0.s8 %v4672_v5 }
 0x224   : > { %v2118_v23 = vmul.f32 %v4584_v34, %v1894_v63  ;;  %v2120_v25 = vmul.f32 %v4584_v34, %v1896_v12  ;;  %v1893_v30 = vcvt.s32.f32 %v1765_v18  ;;  %v1572_v51 = vunpack.c.1.s8 %v4672_v5 }
 0x225   : > { %2413 = vmatprep.subr.bf16.mxu0 %v2328_v24  ;;  %v2327_v2 = vpack.c.bf16 %v2223_v53, %v2221_v28  ;;  %v1895_v37 = vcvt.s32.f32 %v1767_v49  ;;  %v1698_v17 = vand.u32 255, %v1570_v22  ;;  %v1569_v60 = vunpack.c.0.s8 %v4191_v7 }
 0x226   : > { %v2286_v4 = vadd.f32 %v4590_v32, %v2118_v23  ;;  %v2288_v52 = vadd.f32 %v4590_v32, %v2120_v25  ;;  %v2117_v0 = vmul.f32 %v4594_v40, %v1893_v30  ;;  %v1700_v44 = vand.u32 255, %v1572_v51 }
 0x227   : > { %2414 = vmatpush2.bf16.msra.mxu0 %v2327_v2  ;;  %v2119_v45 = vmul.f32 %v4594_v40, %v1895_v37  ;;  %v1826_v61 = vcvt.s32.f32 %v1698_v17  ;;  %v1571_v33 = vunpack.c.1.s8 %v4191_v7  ;;  %v1697_v5 = vand.u32 255, %v1569_v60 }
 0x228   : > { %v2360_v41 = vpack.c.bf16 %v2288_v52, %v2286_v4  ;;  %v2285_v13 = vadd.f32 %v4599_v62, %v2117_v0  ;;  %v1828_v55 = vcvt.s32.f32 %v1700_v44  ;;  %v1634_v21 = vunpack.c.0.s8 %v4687_v56  ;;  %v2976_v0 = vld [vmem:[%s3702_s30 + $0xc8] sm:$0xff] }
 0x229   : > { %v2287_v14 = vadd.f32 %v4599_v62, %v2119_v45  ;;  %v2050_v48 = vmul.f32 %v4561_v6, %v1826_v61  ;;  %v1699_v10 = vand.u32 255, %v1571_v33  ;;  %v1825_v58 = vcvt.s32.f32 %v1697_v5 }
 0x22a   : > { %2456 = vmatprep.subr.bf16.mxu1 %v2360_v41  ;;  %v2052_v16 = vmul.f32 %v4561_v6, %v1828_v55  ;;  %v1636_v35 = vunpack.c.1.s8 %v4687_v56  ;;  %v1762_v7 = vand.u32 255, %v1634_v21  ;;  %v1633_v15 = vunpack.c.0.s8 %v4200_v42 }
 0x22b   : > { %v2359_v59 = vpack.c.bf16 %v2287_v14, %v2285_v13  ;;  %v2218_v19 = vadd.f32 %v4573_v26, %v2050_v48  ;;  %v1827_v20 = vcvt.s32.f32 %v1699_v10  ;;  %v2049_v47 = vmul.f32 %v4565_v29, %v1825_v58 }
 0x22c   : > { %v2220_v9 = vadd.f32 %v4573_v26, %v2052_v16  ;;  %v1764_v46 = vand.u32 255, %v1636_v35  ;;  %v1890_v43 = vcvt.s32.f32 %v1762_v7  ;;  %v1635_v54 = vunpack.c.1.s8 %v4200_v42 }
 0x22d   : > { %2457 = vmatpush2.bf16.msra.mxu1 %v2359_v59  ;;  %v2051_v36 = vmul.f32 %v4565_v29, %v1827_v20  ;;  %v2217_v56 = vadd.f32 %v4576_v27, %v2049_v47  ;;  %v1761_v39 = vand.u32 255, %v1633_v15  ;;  %v4726_v11 = vand.u32 4042322160, %v2975_v38 }
 0x22e   : > { %v2326_v31 = vpack.c.bf16 %v2220_v9, %v2218_v19  ;;  %v1892_v8 = vcvt.s32.f32 %v1764_v46  ;;  %v2114_v50 = vmul.f32 %v4584_v34, %v1890_v43  ;;  %v1763_v57 = vand.u32 255, %v1635_v54 }
 0x22f   : > { %v2219_v28 = vadd.f32 %v4576_v27, %v2051_v36  ;;  %v1889_v63 = vcvt.s32.f32 %v1761_v39  ;;  %v1566_v12 = vunpack.c.2.s8 %v4726_v11  ;;  %v1568_v42 = vunpack.c.3.s8 %v4726_v11 }
 0x230   : > { %2415 = vmatprep.subr.bf16.mxu0 %v2326_v31  ;;  %v2116_v18 = vmul.f32 %v4584_v34, %v1892_v8  ;;  %v2282_v24 = vadd.f32 %v4590_v32, %v2114_v50  ;;  %v1891_v53 = vcvt.s32.f32 %v1763_v57  ;;  %v1565_v49 = vunpack.c.2.s8 %v4255_v1 }
 0x231   : > { %v2325_v22 = vpack.c.bf16 %v2219_v28, %v2217_v56  ;;  %v2113_v23 = vmul.f32 %v4594_v40, %v1889_v63  ;;  %v1694_v25 = vand.u32 255, %v1566_v12  ;;  %v1696_v30 = vand.u32 255, %v1568_v42 }
 0x232   : > { %v2284_v51 = vadd.f32 %v4590_v32, %v2116_v18  ;;  %v2115_v2 = vmul.f32 %v4594_v40, %v1891_v53  ;;  %v1567_v37 = vunpack.c.3.s8 %v4255_v1  ;;  %v1693_v17 = vand.u32 255, %v1565_v49 }
 0x233   : > { %2416 = vmatpush2.bf16.msra.mxu0 %v2325_v22  ;;  %v2281_v60 = vadd.f32 %v4599_v62, %v2113_v23  ;;  %v1822_v4 = vcvt.s32.f32 %v1694_v25  ;;  %v1824_v52 = vcvt.s32.f32 %v1696_v30  ;;  %v4741_v44 = vand.u32 4042322160, %v2976_v0 }
 0x234   : > { %v2358_v45 = vpack.c.bf16 %v2284_v51, %v2282_v24  ;;  %v2283_v61 = vadd.f32 %v4599_v62, %v2115_v2  ;;  %v1695_v33 = vand.u32 255, %v1567_v37  ;;  %v1821_v5 = vcvt.s32.f32 %v1693_v17 }
 0x235   : > { %v2046_v41 = vmul.f32 %v4561_v6, %v1822_v4  ;;  %v2048_v13 = vmul.f32 %v4561_v6, %v1824_v52  ;;  %v1630_v55 = vunpack.c.2.s8 %v4741_v44  ;;  %v1632_v21 = vunpack.c.3.s8 %v4741_v44 }
 0x236   : > { %2458 = vmatprep.subr.bf16.mxu1 %v2358_v45  ;;  %v2357_v14 = vpack.c.bf16 %v2283_v61, %v2281_v60  ;;  %v1823_v48 = vcvt.s32.f32 %v1695_v33  ;;  %v2045_v10 = vmul.f32 %v4565_v29, %v1821_v5  ;;  %v1629_v58 = vunpack.c.2.s8 %v4264_v3 }
 0x237   : > { %v2214_v16 = vadd.f32 %v4573_v26, %v2046_v41  ;;  %v2216_v35 = vadd.f32 %v4573_v26, %v2048_v13  ;;  %v1758_v7 = vand.u32 255, %v1630_v55  ;;  %v1760_v15 = vand.u32 255, %v1632_v21 }
 0x238   : > { %2459 = vmatpush2.bf16.msra.mxu1 %v2357_v14  ;;  %v2047_v59 = vmul.f32 %v4565_v29, %v1823_v48  ;;  %v2213_v19 = vadd.f32 %v4576_v27, %v2045_v10  ;;  %v1631_v20 = vunpack.c.3.s8 %v4264_v3  ;;  %v1757_v47 = vand.u32 255, %v1629_v58 }
 0x239   : > { %v2324_v9 = vpack.c.bf16 %v2216_v35, %v2214_v16  ;;  %v1886_v46 = vcvt.s32.f32 %v1758_v7  ;;  %v1888_v43 = vcvt.s32.f32 %v1760_v15  ;;  %v1562_v54 = vunpack.c.0.s8 %v4726_v11 }
 0x23a   : > { %v2215_v36 = vadd.f32 %v4576_v27, %v2047_v59  ;;  %v1759_v56 = vand.u32 255, %v1631_v20  ;;  %v1885_v39 = vcvt.s32.f32 %v1757_v47  ;;  %v1564_v38 = vunpack.c.1.s8 %v4726_v11  ;;  %v2957_v20 = vld [vmem:[%s3695_s26] ss:$16 sps:$4 sm:$0xff]  }
 0x23b   : > { %2417 = vmatprep.subr.bf16.mxu0 %v2324_v9  ;;  %v2110_v31 = vmul.f32 %v4584_v34, %v1886_v46  ;;  %v2112_v8 = vmul.f32 %v4584_v34, %v1888_v43  ;;  %v1690_v50 = vand.u32 255, %v1562_v54  ;;  %v1561_v57 = vunpack.c.0.s8 %v4255_v1  ;;  %v2960_v43 = vld [vmem:[%s3695_s26 + $0x8] ss:$16 sps:$4 sm:$0xff]  }
 0x23c   : > { %v2323_v28 = vpack.c.bf16 %v2215_v36, %v2213_v19  ;;  %v1887_v63 = vcvt.s32.f32 %v1759_v56  ;;  %v2109_v12 = vmul.f32 %v4594_v40, %v1885_v39  ;;  %v1692_v42 = vand.u32 255, %v1564_v38 }
 0x23d   : > { %v2278_v18 = vadd.f32 %v4590_v32, %v2110_v31  ;;  %v2280_v24 = vadd.f32 %v4590_v32, %v2112_v8  ;;  %v1818_v53 = vcvt.s32.f32 %v1690_v50  ;;  %v1563_v11 = vunpack.c.1.s8 %v4255_v1  ;;  %v497_v50 = vld [vmem:[#allocation2 + $0x10] sm:$0xff] }
 0x23e   : > { %2418 = vmatpush2.bf16.msra.mxu0 %v2323_v28  ;;  %v2111_v49 = vmul.f32 %v4594_v40, %v1887_v63  ;;  %v2277_v22 = vadd.f32 %v4599_v62, %v2109_v12  ;;  %v1820_v23 = vcvt.s32.f32 %v1692_v42  ;;  %v1689_v25 = vand.u32 255, %v1561_v57 }
 0x23f   : > { %v2356_v30 = vpack.c.bf16 %v2280_v24, %v2278_v18  ;;  %v2042_v51 = vmul.f32 %v4561_v6, %v1818_v53  ;;  %v1691_v2 = vand.u32 255, %v1563_v11  ;;  %v1626_v37 = vunpack.c.0.s8 %v4741_v44  ;;  %v499_v53 = vld [vmem:[#allocation2 + $0x18] sm:$0xff] }
 0x240   : > { %v2279_v17 = vadd.f32 %v4599_v62, %v2111_v49  ;;  %v2044_v60 = vmul.f32 %v4561_v6, %v1820_v23  ;;  %v1817_v4 = vcvt.s32.f32 %v1689_v25  ;;  %v1628_v1 = vunpack.c.1.s8 %v4741_v44 }
 0x241   : > { %2460 = vmatprep.subr.bf16.mxu1 %v2356_v30  ;;  %v2210_v52 = vadd.f32 %v4573_v26, %v2042_v51  ;;  %v1819_v0 = vcvt.s32.f32 %v1691_v2  ;;  %v1754_v45 = vand.u32 255, %v1626_v37  ;;  %v1625_v61 = vunpack.c.0.s8 %v4264_v3  ;;  %v500_v51 = vld [vmem:[#allocation2 + $0x8] sm:$0xff] }
 0x242   : > { %v2355_v33 = vpack.c.bf16 %v2279_v17, %v2277_v22  ;;  %v2212_v5 = vadd.f32 %v4573_v26, %v2044_v60  ;;  %v2041_v41 = vmul.f32 %v4565_v29, %v1817_v4  ;;  %v1756_v13 = vand.u32 255, %v1628_v1 }
 0x243   : > { %v2043_v55 = vmul.f32 %v4565_v29, %v1819_v0  ;;  %v1882_v21 = vcvt.s32.f32 %v1754_v45  ;;  %v1627_v6 = vunpack.c.1.s8 %v4264_v3  ;;  %v1753_v14 = vand.u32 255, %v1625_v61 }
 0x244   : > { %2461 = vmatpush2.bf16.msra.mxu1 %v2355_v33  ;;  %v2322_v44 = vpack.c.bf16 %v2212_v5, %v2210_v52  ;;  %v2209_v48 = vadd.f32 %v4576_v27, %v2041_v41  ;;  %v1884_v10 = vcvt.s32.f32 %v1756_v13 }
 0x245   : > { %v2211_v58 = vadd.f32 %v4576_v27, %v2043_v55  ;;  %v2106_v16 = vmul.f32 %v4584_v34, %v1882_v21  ;;  %v1755_v26 = vand.u32 255, %v1627_v6  ;;  %v1881_v35 = vcvt.s32.f32 %v1753_v14 }
 0x246   : > { %2419 = vmatprep.subr.bf16.mxu0 %v2322_v44  ;;  %v2108_v29 = vmul.f32 %v4584_v34, %v1884_v10 }
 0x247   : > { %v2321_v7 = vpack.c.bf16 %v2211_v58, %v2209_v48  ;;  %v2274_v3 = vadd.f32 %v4590_v32, %v2106_v16  ;;  %v1883_v15 = vcvt.s32.f32 %v1755_v26  ;;  %v2105_v59 = vmul.f32 %v4594_v40, %v1881_v35 }
 0x248   : > { %v2276_v19 = vadd.f32 %v4590_v32, %v2108_v29 }
 0x249   : > { %2420 = vmatpush2.bf16.msra.mxu0 %v2321_v7  ;;  %v2107_v27 = vmul.f32 %v4594_v40, %v1883_v15  ;;  %v2273_v47 = vadd.f32 %v4599_v62, %v2105_v59 }
 0x24a   : > { %v2354_v9 = vpack.c.bf16 %v2276_v19, %v2274_v3 }
 0x24b   : > { %v2275_v46 = vadd.f32 %v4599_v62, %v2107_v27  ;;  %v498_v62 = vld [vmem:[#allocation2] sm:$0xff] }
 0x24c   : > { %2462 = vmatprep.subr.bf16.mxu1 %v2354_v9  ;;  %2422 = vmatmul.mubr.bf16.vlgmr.msra.gmra.mxu0 %v2957_v20 }
 0x24d   : > { %v2353_v34 = vpack.c.bf16 %v2275_v46, %v2273_v47 }
 0x24f   : > { %2463 = vmatpush2.bf16.msra.mxu1 %v2353_v34 }
 0x251   : > { %v1429_v54 = vpop.f32.mrf.mxu0 }
 0x252   : > { %2465 = vmatmul.mubr.bf16.vlgmr.msra.gmra.mxu1 %v2960_v43 }
 0x253   : > { %v1431_v36 = vpop.f32.mrf.mxu0 }
 0x255   : > { %v1433_v39 = vpop.f32.mrf.mxu0 }
 0x256   : > { %v1472_v56 = vpop.f32.mrf.mxu1 }
 0x257   : > { %v1435_v38 = vpop.f32.mrf.mxu0  ;;  %v1473_v40 = vadd.f32 %v1472_v56, %v1429_v54 }
 0x258   : > { %v1474_v32 = vpop.f32.mrf.mxu1 }
 0x259   : > { %v1475_v63 = vadd.f32 %v1474_v32, %v1431_v36  ;;  %v1481_v42 = vadd.f32 %v1473_v40, %v497_v50 }
 0x25a   : > { %v1476_v31 = vpop.f32.mrf.mxu1 }
 0x25b   : > { %v1477_v18 = vadd.f32 %v1476_v31, %v1433_v39  ;;  %v1482_v22 = vadd.f32 %v1475_v63, %v498_v62 }
 0x25c   : > { %v1478_v57 = vpop.f32.mrf.mxu1 }
 0x25d   : > { %v1479_v23 = vadd.f32 %v1478_v57, %v1435_v38  ;;  %v1483_v37 = vadd.f32 %v1477_v18, %v499_v53 }
 0x25f   : > { %v1484_v52 = vadd.f32 %v1479_v23, %v500_v51 }
 0x30c   : > { %v2423_v8 = vpop.f32.mrf.mxu0 }
 0x30e   : > { %v2425_v28 = vpop.f32.mrf.mxu0 }
 0x310   : > { %v2427_v11 = vpop.f32.mrf.mxu0 }
 0x312   : > { %v2466_v12 = vpop.f32.mrf.mxu1  ;;  %v2429_v4 = vpop.f32.mrf.mxu0 }
 0x313   : > { %v2467_v24 = vadd.f32 %v2466_v12, %v2423_v8 }
 0x314   : > { %v2468_v49 = vpop.f32.mrf.mxu1 }
 0x315   : > { %v2475_v25 = vadd.f32 %v2467_v24, %v1481_v42  ;;  %v2469_v30 = vadd.f32 %v2468_v49, %v2425_v28 }
 0x316   : > { %v2470_v2 = vpop.f32.mrf.mxu1 }
 0x317   : > { %2479 = vst [vmem:[#allocation2 + $0x10] sm:$0xff] %v2475_v25  ;;  %v2476_v17 = vadd.f32 %v2469_v30, %v1482_v22  ;;  %v2471_v60 = vadd.f32 %v2470_v2, %v2427_v11 }
 0x318   : > { %v2472_v1 = vpop.f32.mrf.mxu1 }
 0x319   : > { %2480 = vst [vmem:[#allocation2] sm:$0xff] %v2476_v17  ;;  %v2477_v0 = vadd.f32 %v2471_v60, %v1483_v37  ;;  %v2473_v45 = vadd.f32 %v2472_v1, %v2429_v4  ;;  %2486 = sbr.rel (%p2755_p4) target bundleno = 808 (0x328), region = 68 }
 0x31b   : > { %2481 = vst [vmem:[#allocation2 + $0x18] sm:$0xff] %v2477_v0  ;;  %v2478_v61 = vadd.f32 %v2473_v45, %v1484_v52 }
 0x31d   : > { %2482 = vst [vmem:[#allocation2 + $0x8] sm:$0xff] %v2478_v61 }
 0x31e   : > { %v2487_v33 = vld [vmem:[#allocation2 + $0x10] sm:$0xff] }
 0x320   : > { %v2488_v5 = vld [vmem:[#allocation2] sm:$0xff] }
 0x321   : > { %v2766_v13 = vpack.c.bf16 %v2488_v5, %v2487_v33 }
 0x322   : > { %v2489_v41 = vld [vmem:[#allocation2 + $0x18] sm:$0xff] }
 0x323   : > { %2503 = vst [vmem:[%s3719_s12] sm:$0xff] %v2766_v13 }
 0x324   : > { %v2490_v55 = vld [vmem:[#allocation2 + $0x8] sm:$0xff] }
 0x325   : > { %v2767_v21 = vpack.c.bf16 %v2490_v55, %v2489_v41 }
 0x327   : > { %2504 = vst [vmem:[%s3719_s12 + $0x8] sm:$0xff] %v2767_v21 }
 0x328 PF: > { %s4997_s8 = sld [smem:[#allocation27_spill]]  ;;  %s2522_s6 = sshll.u32 %s3719_s12, 4  ;;  %s4800_s6 = int_to_ptr.vmem [resolvable:$true] %s2522_s6 }
 0x329   : > { %s4999_s2 = sld [smem:[#allocation34_spill]]  ;;  %s4804_s3 = scalar_lea.sflag [#allocation5], %s441_s29 }
 0x32a   : > { %s5000_s21 = sld [smem:[#allocation44_spill]]  ;;  %s3118_s18 = scalar_lea.vmem %s4800_s6, 256 }
 0x32b   : > { %p3119_p3 = scmp.ne.s32.totalorder %s4800_s6, %s3118_s18  ;;  %s3314_s25 = smov [#allocation12]  }
 0x32c   : > { %s3122_s26 = sshll.u32 %s3314_s25, 4  ;;  %s3123_s26 = int_to_ptr.vmem [resolvable:$false] %s3122_s26 }
 0x32d   : > { %s3124_s14 = scalar_lea.vmem %s3123_s26, 512  ;;  %p3125_p11 = scmp.lt.s32.totalorder %s4800_s6, %s3123_s26 }
 0x32e   : > { %s2768_s15 = sshll.u32 %s4997_s8, 7  ;;  %p3126_p1 = scmp.lt.s32.totalorder %s3124_s14, %s3118_s18 }
 0x32f   : > { %p5002_p5 = scmp.ne.s32.totalorder %s4999_s2, 0 }
 0x330   : > { %s5001_s1 = smov %s5000_s21  ;;  %s4797_s0 = scalar_lea.hbm %s5000_s21, %s2768_s15 }
 0x331   : > { %p3120_p10 = pnand %p3119_p3, %p5002_p5  ;;  %p3127_p12 = por %p3126_p1, %p3125_p11 }
 0x333   : > { %p3121_p0 = pneg %p3120_p10 }
 0x335   : > { %p3128_p13 = pnand %p3127_p12, %p3121_p0 }
 0x337   : > { %3131 = shalt.err (!%p3128_p13)
}
 0x338   : > { %s3132_s27 = scalar_lea.hbm %s4797_s0, 256  ;;  %s3136_s10 = scalar_lea.hbm %s5001_s1, 512 }
 0x339   : > { %p3133_p8 = scmp.ne.s32.totalorder %s4797_s0, %s3132_s27  ;;  %p3137_p2 = scmp.lt.s32.totalorder %s4797_s0, %s5001_s1 }
 0x33a   : > { %p3138_p7 = scmp.lt.s32.totalorder %s3136_s10, %s3132_s27 }
 0x33b   : > { %p3134_p9 = pnand %p3133_p8, %p5002_p5 }
 0x33c   : > { %p3139_p4 = por %p3138_p7, %p3137_p2 }
 0x33d   : > { %p3135_p6 = pneg %p3134_p9 }
 0x33f   : > { %p3140_p3 = pnand %p3139_p4, %p3135_p6 }
 0x341   : > { %3143 = shalt.err (!%p3140_p3)
}
 0x342   : > { %s3315_s5 = smov 128   ;;  %s3316_s29 = smov 256  }
 0x343   : > { %s3317_s7 = smov 8  }
 0x344   : > { %2779 = dma.vmem_to_hbm [thread:$0]  (%p5002_p5), %s4800_s6, 256, %s4797_s0, %s4804_s3, %s3315_s5, %s3316_s29, %s3317_s7  }
 0x345 PF: > { %s5003_s13 = sld [smem:[#allocation18_spill]]  ;;  %p2802_p10 = scmp.ge.s32.totalorder %s3298_s9, 2 }
 0x346   : > { %s5004_s12 = sld [smem:[#allocation37_spill]] }
 0x34b   : > { %s2537_s23 = sand.u32 1, %s5003_s13  }
 0x34c   : > { %p5005_p0 = scmp.ne.s32.totalorder %s5004_s12, 0  ;;  %s2538_s11 = scalar_lea.sflag [#allocation5], %s2537_s23 }
 0x34e   : > { %p2798_p11 = pnand %p2802_p10, %p5005_p0 }
 0x350   : > { %p2799_p1 = pneg %p2798_p11 }
 0x352   : > { %3229 = dma.done.wait (%p2799_p1), %s2538_s11, 256  }
 0x353   : > { %3231 = vsyncadd (%p2799_p1), %s2538_s11, 4294967040  ;;  %s27_s9 = sadd.s32 1, %s3298_s9   ;;  %s5007_s18 = sld [smem:[#allocation19_spill]] }
 0x354   : > { %p4832_p12 = scmp.ge.s32.totalorder %s27_s9, 6   ;;  %s5008_s19 = sld [smem:[#allocation20_spill]] }
 0x355   : > { %s5009_s20 = sld [smem:[#allocation35_spill]]  ;;  %s5022_s21 = smov %s3250_s22 }
 0x356   : > { %s5010_s24 = sld [smem:[#allocation21_spill]]  ;;  %s5025_s27 = smov %s3274_s28 }
 0x357   : > { %s5011_s23 = sld [smem:[#allocation36_spill]] }
 0x358   : > { %s5012_s2 = sld [smem:[#allocation22_spill]] }
 0x359   : > { %s5013_s25 = sld [smem:[#allocation23_spill]] }
 0x35a   : > { %s5014_s26 = sld [smem:[#allocation31_spill]] }
 0x35b   : > { %s5015_s15 = sld [smem:[#allocation25_spill]] }
 0x35c   : > { %s5016_s29 = sld [smem:[#allocation38_spill]]  ;;  %s5023_s22 = smov %s5010_s24 }
 0x35d   : > { %s5017_s30 = sld [smem:[#allocation28_spill]] }
 0x35e   : > { %s5018_s6 = sld [smem:[#allocation29_spill]]  ;;  %s5024_s24 = smov %s5012_s2 }
 0x35f   : > { %s5019_s7 = sld [smem:[#allocation30_spill]] }
 0x360   : > { %s5020_s4 = sld [smem:[#allocation32_spill]] }
 0x361   : > { %s5026_s28 = smov %s5015_s15 }
 0x362   :  { %26 = sbr.rel (!%p4832_p12) target bundleno = 23 (0x17), region = 143 }
 0x366   : > { %s5027_s8 = smov %s5020_s4 }
 0x367   :  { %2543 = vsyncpa [#allocation4], 1 }
 0x368   :  { %2545 = vsyncpa [#allocation4 + $0x1], 1 }
 0x369   :  { %2546 = vsyncpa [#allocation7], 1 }
 0x36a   :  { %2548 = vsyncpa [#allocation7 + $0x1], 1 }
 0x36b   :  { %2549 = vsyncpa [#allocation10], 1 }
 0x36c   :  { %2551 = vsyncpa [#allocation10 + $0x1], 1 }
 0x36d   :  { %2552 = vsyncpa [#allocation5], 1 }
 0x36e   :  { %2554 = vsyncpa [#allocation5 + $0x1], 1 }

</bundles_post_ra>
